<compile_context>
chip_gen: v5e
topology: v5e:2x2
jax: 0.10.0
libtpu: 0.0.40
codegen_flags: <defaults>
</compile_context>

<pallas_src>
import functools

import jax
import jax.numpy as jnp
from jax.experimental import pallas as pl
from jax.experimental.pallas import tpu as pltpu

_LANES = 128          # lane width for lane-dense outputs
_EPS = 1e-12          # F.normalize eps (clamp_min)


# --------------------- Pallas kernel 1: fused CDS scores --------------------
# Per grid step (one n_way group of way_block = n_shot*HW tokens):
#   normalize all tokens over channels, build S_all / S_way / S_img sum
#   vectors, take per-row dots, form d_intra / d_inter and cds = sigmoid().
def _cds_score_kernel(x_ref, o_ref, *, way_block, hw, n_tok):
    i = pl.program_id(0)

    x = x_ref[...]                                              # (n_tok, C) f32
    nrm = jnp.sqrt(jnp.sum(x * x, axis=-1, keepdims=True))
    xn = x / jnp.maximum(nrm, _EPS)                             # F.normalize(dim=C)
    s_all = jnp.sum(xn, axis=0, keepdims=True)                  # (1, C)

    # This way's rows, sliced from the resident full operand (no 2nd DMA stream).
    start = pl.multiple_of(i * way_block, way_block)
    r = x_ref[pl.ds(start, way_block), :]                       # (way_block, C)
    rn = jnp.sqrt(jnp.sum(r * r, axis=-1, keepdims=True))
    rows = r / jnp.maximum(rn, _EPS)

    s_way = jnp.sum(rows, axis=0, keepdims=True)                # (1, C)
    n_img = way_block // hw
    rimg = rows.reshape(n_img, hw, rows.shape[-1])              # (n_shot, HW, C)
    s_img = jnp.sum(rimg, axis=1, keepdims=True)                # (n_shot, 1, C)

    diag    = jnp.sum(rows * rows,  axis=-1, keepdims=True)     # exact <xn_r, xn_r>
    dot_way = jnp.sum(rows * s_way, axis=-1, keepdims=True)
    dot_all = jnp.sum(rows * s_all, axis=-1, keepdims=True)
    dot_img = jnp.sum(rimg * s_img, axis=-1, keepdims=True).reshape(way_block, 1)

    # torch .mean() divides by the FULL dim (zeroed entries included).
    d_intra = (dot_way - diag)    * (1.0 / way_block)
    d_inter = (dot_all - dot_img) * (1.0 / n_tok)
    z = d_intra / d_inter
    cds = 1.0 / (1.0 + jnp.exp(-z))                             # sigmoid (EUP)

    # Lane-dense store: broadcast the per-row scalar across the 128 lanes.
    o_ref[...] = jnp.broadcast_to(cds, (way_block, o_ref.shape[-1]))


def cds_scores(x_tok, *, n_way, n_shot, hw):
    """x_tok: (B*HW, C) raw channels-last tokens -> cds (n_way, n_shot*HW)."""
    n_tok, c = x_tok.shape
    way_block = n_shot * hw
    assert n_tok == n_way * way_block, "token count must equal n_way*n_shot*HW"
    assert way_block % hw == 0 and way_block % 8 == 0 and hw % 8 == 0

    kern = functools.partial(_cds_score_kernel,
                             way_block=way_block, hw=hw, n_tok=n_tok)
    out = pl.pallas_call(
        kern,
        out_shape=jax.ShapeDtypeStruct((n_tok, _LANES), jnp.float32),
        grid_spec=pltpu.PrefetchScalarGridSpec(
            num_scalar_prefetch=0,
            grid=(n_way,),
            in_specs=[pl.BlockSpec((n_tok, c), lambda i: (0, 0))],   # invariant block
            out_specs=pl.BlockSpec((way_block, _LANES), lambda i: (i, 0))),
        compiler_params=pltpu.CompilerParams(dimension_semantics=("parallel",)),
    )(x_tok.astype(jnp.float32))
    return out[:, 0].reshape(n_way, way_block)


# ---------- Pallas kernel 2: masked re-normalize + per-image mean -----------
# Fuses: select_local = x * pos_mask; F.normalize over channels; mean over HW.
def _masked_mean_kernel(x_ref, m_ref, o_ref):
    x = x_ref[0]                                                # (HW, C) f32
    m = m_ref[0]                                                # (HW, 1) f32
    xm = x * m
    nrm = jnp.sqrt(jnp.sum(xm * xm, axis=-1, keepdims=True))
    xn = xm / jnp.maximum(nrm, _EPS)                            # zero rows stay zero
    o_ref[0] = jnp.mean(xn, axis=0, keepdims=True)              # (1, C)


def masked_norm_image_means(x_cl, pos_mask_hw):
    """x_cl (B, HW, C), pos_mask_hw (B, HW) -> per-image means (B, C)."""
    b, hw, c = x_cl.shape
    mask3 = pos_mask_hw.reshape(b, hw, 1).astype(jnp.float32)
    out = pl.pallas_call(
        _masked_mean_kernel,
        out_shape=jax.ShapeDtypeStruct((b, 1, c), jnp.float32),
        grid_spec=pltpu.PrefetchScalarGridSpec(
            num_scalar_prefetch=0,
            grid=(b,),
            in_specs=[pl.BlockSpec((1, hw, c), lambda i: (i, 0, 0)),
                      pl.BlockSpec((1, hw, 1), lambda i: (i, 0, 0))],
            out_specs=pl.BlockSpec((1, 1, c), lambda i: (i, 0, 0))),
        compiler_params=pltpu.CompilerParams(dimension_semantics=("parallel",)),
    )(x_cl.astype(jnp.float32), mask3)
    return out[:, 0, :]


# ------------------------------ CDSNet forward ------------------------------

def cdsnet_forward(local_feature, *, n_way, n_shot, top_lr):
    """CDSNet.forward: local_feature (B, C, H, W) -> (loss, pos_index, neg_index)."""
    B, C, H, W = local_feature.shape
    HW = H * W
    assert B == n_way * n_shot and n_way == n_shot, \
        "torch mask_intra logic requires n_way == n_shot"
    way_block = n_shot * HW

    # NCHW -> channels-last ONCE; lane dim = C for both Pallas kernels.
    x_cl = jnp.transpose(local_feature, (0, 2, 3, 1)).reshape(B, HW, C)
    x_cl = x_cl.astype(jnp.float32)

    # Fused normalize + factorized masked-gram means + sigmoid  ->  cds.
    cds = cds_scores(x_cl.reshape(B * HW, C), n_way=n_way, n_shot=n_shot, hw=HW)

    # torch.topk + scatter(1, idx, 1): data-dependent select, kept in XLA glue.
    k = int(way_block * top_lr)
    _, sel_idx = jax.lax.top_k(cds, k)
    sel = jnp.zeros((n_way, way_block), jnp.float32)
    sel = sel.at[jnp.arange(n_way)[:, None], sel_idx].set(1.0)
    pos_mask_hw = sel.reshape(B, HW)

    # Fused mask * x, F.normalize(dim=C), spatial mean -> per-image means.
    img_means = masked_norm_image_means(x_cl, pos_mask_hw)       # (B, C)
    sm = img_means.reshape(n_way, n_shot, C)

    # Tiny (n_way x n_way) / (n_way x n_shot x n_shot) products -> XLA glue.
    l_intra_feat = jnp.mean(sm, axis=1)                          # = mean over shot*HW
    l_intra = l_intra_feat @ l_intra_feat.T                      # (n_way, n_way)
    l_inter = jnp.einsum('wsc,wtc->wst', sm, sm)                 # (n_way, n_shot, n_shot)
    w_mask = 1.0 - jnp.eye(n_way, dtype=jnp.float32)
    s_mask = (1.0 - jnp.eye(n_shot, dtype=jnp.float32))[None]
    loss = jnp.exp(jnp.mean(l_inter * s_mask) / jnp.mean(l_intra * w_mask))

    # pos_index / neg_index in NCHW, matching the torch return values.
    pos_index = jnp.broadcast_to(pos_mask_hw.reshape(B, 1, H, W), (B, C, H, W))
    pos_index = pos_index.astype(jnp.float32)
    neg_index = 1.0 - pos_index
    return loss, pos_index, neg_index
    # TODO(synk): CDSNet.__init__ also builds query_transform / key_transform /
    # Sigmoid modules that the torch forward never calls; they are not built here.


if __name__ == "__main__":
    n_way, n_shot, n_query = 2, 2, 2          # module semantics require n_way == n_shot
    inplanes, H, W = 128, 8, 8
    top_lr = 0.8
    B = n_way * n_shot

    key = jax.random.PRNGKey(0)
    local_feature = jax.random.normal(key, (B, inplanes, H, W), dtype=jnp.float32)

    fwd = jax.jit(functools.partial(cdsnet_forward,
                                    n_way=n_way, n_shot=n_shot, top_lr=top_lr))
    loss, pos_index, neg_index = fwd(local_feature)
    jax.block_until_ready((loss, pos_index, neg_index))
    print("KERNEL_OK")
</pallas_src>

<mosaic_0001>
module attributes {stable_mosaic.version = 11 : i64} {
  func.func @_cds_score_kernel(%arg0: i32, %arg1: memref<256x128xf32, #tpu.memory_space<vmem>>, %arg2: memref<128x128xf32, #tpu.memory_space<vmem>>) attributes {dimension_semantics = [#tpu.dimension_semantics<parallel>], iteration_bounds = array<i64: 2>, scalar_prefetch = 0 : i64, scratch_operands = 0 : i64, tpu.core_type = #tpu.core_type<tc>, window_params = [{pipeline_mode = #tpu.pipeline_mode<synchronous>, transform_indices = @transform_0, window_bounds = array<i64: 256, 128>}, {transform_indices = @transform_1, window_bounds = array<i64: 128, 128>}]} {
    %c0 = arith.constant 0 : index
    %c0_0 = arith.constant 0 : index
    %0 = vector.load %arg1[%c0, %c0_0] : memref<256x128xf32, #tpu.memory_space<vmem>>, vector<256x128xf32>
    %1 = arith.mulf %0, %0 : vector<256x128xf32>
    %cst = arith.constant dense<0.000000e+00> : vector<256xf32>
    %2 = vector.multi_reduction <add>, %1, %cst [1] : vector<256x128xf32> to vector<256xf32>
    %3 = vector.shape_cast %2 : vector<256xf32> to vector<256x1xf32>
    %4 = math.sqrt %3 : vector<256x1xf32>
    %cst_1 = arith.constant 9.99999996E-13 : f32
    %5 = vector.broadcast %cst_1 : f32 to vector<256x1xf32>
    %6 = arith.maximumf %4, %5 : vector<256x1xf32>
    %7 = vector.broadcast %6 : vector<256x1xf32> to vector<256x128xf32>
    %8 = arith.divf %0, %7 : vector<256x128xf32>
    %cst_2 = arith.constant dense<0.000000e+00> : vector<128xf32>
    %9 = vector.multi_reduction <add>, %8, %cst_2 [0] : vector<256x128xf32> to vector<128xf32>
    %10 = vector.shape_cast %9 : vector<128xf32> to vector<1x128xf32>
    %c128_i32 = arith.constant 128 : i32
    %11 = arith.muli %arg0, %c128_i32 : i32
    %12 = tpu.assume_multiple %11, 128 : i32
    %13 = arith.index_cast %12 : i32 to index
    %c0_3 = arith.constant 0 : index
    %14 = vector.load %arg1[%13, %c0_3] : memref<256x128xf32, #tpu.memory_space<vmem>>, vector<128x128xf32>
    %15 = arith.mulf %14, %14 : vector<128x128xf32>
    %cst_4 = arith.constant dense<0.000000e+00> : vector<128xf32>
    %16 = vector.multi_reduction <add>, %15, %cst_4 [1] : vector<128x128xf32> to vector<128xf32>
    %17 = vector.shape_cast %16 : vector<128xf32> to vector<128x1xf32>
    %18 = math.sqrt %17 : vector<128x1xf32>
    %cst_5 = arith.constant 9.99999996E-13 : f32
    %19 = vector.broadcast %cst_5 : f32 to vector<128x1xf32>
    %20 = arith.maximumf %18, %19 : vector<128x1xf32>
    %21 = vector.broadcast %20 : vector<128x1xf32> to vector<128x128xf32>
    %22 = arith.divf %14, %21 : vector<128x128xf32>
    %cst_6 = arith.constant dense<0.000000e+00> : vector<128xf32>
    %23 = vector.multi_reduction <add>, %22, %cst_6 [0] : vector<128x128xf32> to vector<128xf32>
    %24 = vector.shape_cast %23 : vector<128xf32> to vector<1x128xf32>
    %25 = vector.shape_cast %22 : vector<128x128xf32> to vector<2x64x128xf32>
    %cst_7 = arith.constant dense<0.000000e+00> : vector<2x128xf32>
    %26 = vector.multi_reduction <add>, %25, %cst_7 [1] : vector<2x64x128xf32> to vector<2x128xf32>
    %27 = vector.shape_cast %26 : vector<2x128xf32> to vector<2x1x128xf32>
    %28 = arith.mulf %22, %22 : vector<128x128xf32>
    %cst_8 = arith.constant dense<0.000000e+00> : vector<128xf32>
    %29 = vector.multi_reduction <add>, %28, %cst_8 [1] : vector<128x128xf32> to vector<128xf32>
    %30 = vector.shape_cast %29 : vector<128xf32> to vector<128x1xf32>
    %31 = vector.broadcast %24 : vector<1x128xf32> to vector<128x128xf32>
    %32 = arith.mulf %22, %31 : vector<128x128xf32>
    %cst_9 = arith.constant dense<0.000000e+00> : vector<128xf32>
    %33 = vector.multi_reduction <add>, %32, %cst_9 [1] : vector<128x128xf32> to vector<128xf32>
    %34 = vector.shape_cast %33 : vector<128xf32> to vector<128x1xf32>
    %35 = vector.broadcast %10 : vector<1x128xf32> to vector<128x128xf32>
    %36 = arith.mulf %22, %35 : vector<128x128xf32>
    %cst_10 = arith.constant dense<0.000000e+00> : vector<128xf32>
    %37 = vector.multi_reduction <add>, %36, %cst_10 [1] : vector<128x128xf32> to vector<128xf32>
    %38 = vector.shape_cast %37 : vector<128xf32> to vector<128x1xf32>
    %39 = vector.broadcast %27 : vector<2x1x128xf32> to vector<2x64x128xf32>
    %40 = arith.mulf %25, %39 : vector<2x64x128xf32>
    %cst_11 = arith.constant dense<0.000000e+00> : vector<2x64xf32>
    %41 = vector.multi_reduction <add>, %40, %cst_11 [2] : vector<2x64x128xf32> to vector<2x64xf32>
    %42 = vector.shape_cast %41 : vector<2x64xf32> to vector<2x64x1xf32>
    %43 = vector.shape_cast %42 : vector<2x64x1xf32> to vector<128x1xf32>
    %44 = arith.subf %34, %30 : vector<128x1xf32>
    %cst_12 = arith.constant 7.812500e-03 : f32
    %45 = vector.broadcast %cst_12 : f32 to vector<128x1xf32>
    %46 = arith.mulf %44, %45 : vector<128x1xf32>
    %47 = arith.subf %38, %43 : vector<128x1xf32>
    %cst_13 = arith.constant 3.906250e-03 : f32
    %48 = vector.broadcast %cst_13 : f32 to vector<128x1xf32>
    %49 = arith.mulf %47, %48 : vector<128x1xf32>
    %50 = arith.divf %46, %49 : vector<128x1xf32>
    %cst_14 = arith.constant 0.000000e+00 : f32
    %51 = vector.broadcast %cst_14 : f32 to vector<128x1xf32>
    %52 = arith.subf %51, %50 : vector<128x1xf32>
    %53 = math.exp %52 : vector<128x1xf32>
    %cst_15 = arith.constant 1.000000e+00 : f32
    %54 = vector.broadcast %cst_15 : f32 to vector<128x1xf32>
    %55 = arith.addf %54, %53 : vector<128x1xf32>
    %cst_16 = arith.constant 1.000000e+00 : f32
    %56 = vector.broadcast %cst_16 : f32 to vector<128x1xf32>
    %57 = arith.divf %56, %55 : vector<128x1xf32>
    %58 = vector.shape_cast %57 : vector<128x1xf32> to vector<128x1xf32>
    %59 = vector.broadcast %58 : vector<128x1xf32> to vector<128x128xf32>
    %c0_17 = arith.constant 0 : index
    %c0_18 = arith.constant 0 : index
    %60 = vector.load %arg2[%c0_17, %c0_18] : memref<128x128xf32, #tpu.memory_space<vmem>>, vector<128x128xf32>
    tpu.vector_store %arg2[%c0_17, %c0_18], %59 {strides = array<i32>} : memref<128x128xf32, #tpu.memory_space<vmem>>, vector<128x128xf32>,
    return
  }
  func.func @transform_0(%arg0: i32) -> (i32, i32) {
    %c0_i32 = arith.constant 0 : i32
    %c0_i32_0 = arith.constant 0 : i32
    %c0_i32_1 = arith.constant 0 : i32
    return %c0_i32, %c0_i32_0 : i32, i32
  }
  func.func @transform_1(%arg0: i32) -> (i32, i32) {
    %c0_i32 = arith.constant 0 : i32
    %c0_i32_0 = arith.constant 0 : i32
    return %arg0, %c0_i32 : i32, i32
  }
}

module attributes {stable_mosaic.version = 11 : i64} {
  func.func @_masked_mean_kernel(%arg0: i32, %arg1: memref<1x64x128xf32, #tpu.memory_space<vmem>>, %arg2: memref<1x64x1xf32, #tpu.memory_space<vmem>>, %arg3: memref<1x1x128xf32, #tpu.memory_space<vmem>>) attributes {dimension_semantics = [#tpu.dimension_semantics<parallel>], iteration_bounds = array<i64: 4>, scalar_prefetch = 0 : i64, scratch_operands = 0 : i64, tpu.core_type = #tpu.core_type<tc>, window_params = [{transform_indices = @transform_0, window_bounds = array<i64: 1, 64, 128>}, {transform_indices = @transform_1, window_bounds = array<i64: 1, 64, 1>}, {transform_indices = @transform_2, window_bounds = array<i64: 1, 1, 128>}]} {
    %c0 = arith.constant 0 : index
    %c0_0 = arith.constant 0 : index
    %c0_1 = arith.constant 0 : index
    %0 = vector.load %arg1[%c0, %c0_0, %c0_1] : memref<1x64x128xf32, #tpu.memory_space<vmem>>, vector<1x64x128xf32>
    %1 = vector.shape_cast %0 : vector<1x64x128xf32> to vector<64x128xf32>
    %c0_2 = arith.constant 0 : index
    %c0_3 = arith.constant 0 : index
    %c0_4 = arith.constant 0 : index
    %2 = vector.load %arg2[%c0_2, %c0_3, %c0_4] : memref<1x64x1xf32, #tpu.memory_space<vmem>>, vector<1x64x1xf32>
    %3 = vector.shape_cast %2 : vector<1x64x1xf32> to vector<64x1xf32>
    %4 = vector.broadcast %3 : vector<64x1xf32> to vector<64x128xf32>
    %5 = arith.mulf %1, %4 : vector<64x128xf32>
    %6 = arith.mulf %5, %5 : vector<64x128xf32>
    %cst = arith.constant dense<0.000000e+00> : vector<64xf32>
    %7 = vector.multi_reduction <add>, %6, %cst [1] : vector<64x128xf32> to vector<64xf32>
    %8 = vector.shape_cast %7 : vector<64xf32> to vector<64x1xf32>
    %9 = math.sqrt %8 : vector<64x1xf32>
    %cst_5 = arith.constant 9.99999996E-13 : f32
    %10 = vector.broadcast %cst_5 : f32 to vector<64x1xf32>
    %11 = arith.maximumf %9, %10 : vector<64x1xf32>
    %12 = vector.broadcast %11 : vector<64x1xf32> to vector<64x128xf32>
    %13 = arith.divf %5, %12 : vector<64x128xf32>
    %cst_6 = arith.constant dense<0.000000e+00> : vector<128xf32>
    %14 = vector.multi_reduction <add>, %13, %cst_6 [0] : vector<64x128xf32> to vector<128xf32>
    %15 = vector.shape_cast %14 : vector<128xf32> to vector<1x128xf32>
    %cst_7 = arith.constant 6.400000e+01 : f32
    %16 = vector.broadcast %cst_7 : f32 to vector<1x128xf32>
    %17 = arith.divf %15, %16 : vector<1x128xf32>
    %c0_8 = arith.constant 0 : index
    %c0_9 = arith.constant 0 : index
    %c0_10 = arith.constant 0 : index
    %18 = vector.load %arg3[%c0_8, %c0_9, %c0_10] : memref<1x1x128xf32, #tpu.memory_space<vmem>>, vector<1x1x128xf32>
    %19 = vector.shape_cast %18 : vector<1x1x128xf32> to vector<1x128xf32>
    %20 = vector.shape_cast %17 : vector<1x128xf32> to vector<1x1x128xf32>
    tpu.vector_store %arg3[%c0_8, %c0_9, %c0_10], %20 {strides = array<i32>} : memref<1x1x128xf32, #tpu.memory_space<vmem>>, vector<1x1x128xf32>,
    return
  }
  func.func @transform_0(%arg0: i32) -> (i32, i32, i32) {
    %c0_i32 = arith.constant 0 : i32
    %c0_i32_0 = arith.constant 0 : i32
    %c0_i32_1 = arith.constant 0 : i32
    return %arg0, %c0_i32, %c0_i32_0 : i32, i32, i32
  }
  func.func @transform_1(%arg0: i32) -> (i32, i32, i32) {
    %c0_i32 = arith.constant 0 : i32
    %c0_i32_0 = arith.constant 0 : i32
    %c0_i32_1 = arith.constant 0 : i32
    return %arg0, %c0_i32, %c0_i32_0 : i32, i32, i32
  }
  func.func @transform_2(%arg0: i32) -> (i32, i32, i32) {
    %c0_i32 = arith.constant 0 : i32
    %c0_i32_0 = arith.constant 0 : i32
    %c0_i32_1 = arith.constant 0 : i32
    return %arg0, %c0_i32, %c0_i32_0 : i32, i32, i32
  }
}

</mosaic_0001>

<bundles_post_ra>
// kernel: cdsnet_forward.2
= control target key start
LH: loop header
LB: loop body
LE: loop exit
PB: predicated region body
PF: predicated region fallthrough
CT: control target
= control target key end

     0   :  { %6 = vsyncpa [#allocation3], 0  ;;  %s3018_s6 = smov 0   ;;  %s5778_s0 = inlined_call_operand.hbm [shape: f32[256,128], index: 0, kind: input, shape index: {}]   ;;  %s5779_s1 = inlined_call_operand.vmem [shape: f32[256,128], index: 1, kind: output, shape index: {}]  }
   0x1 LB: > { %s75_s9 = sshll.u32 %s5778_s0, 4  ;;  %s3027_s10 = sadd.s32 4294967295, %s3003_s6   ;;  %s3003_s6 = sphi %s3018_s6, %s12_s6   ;;  %s76_s9 = int_to_ptr.hbm [resolvable:$true] %s75_s9 }
   0x2   : > { %p2606_p0 = scmp.ge.s32.totalorder %s3003_s6, 1  ;;  %p64_p1 = scmp.lt.s32.totalorder %s3003_s6, 3 }
   0x3   : > { %p2623_p2 = scmp.eq.s32.totalorder %s3027_s10, 0  ;;  %s3005_s11 = smov [#allocation2]  }
   0x4   : > { %p65_p3 = pnand %p2606_p0, %p64_p1  ;;  %s77_s12 = sshll.u32 %s3005_s11, 4  ;;  %s78_s12 = int_to_ptr.vmem [resolvable:$true] %s77_s12 }
   0x5   : > { %s3006_s13 = smov 128   ;;  %s3007_s14 = smov 8  }
   0x6   : > { %p2619_p4 = pneg %p65_p3  ;;  %93 = sbr.rel (%p65_p3) target bundleno = 865 (0x361), region = 24 }
   0x8   : > { %p2620_p5 = pnand %p2623_p2, %p2619_p4 }
   0xa   : > { %2622 = dma.hbm_to_vmem [thread:$0]  (!%p2620_p5), %s76_s9, 4096, %s78_s12, [#allocation3], %s3006_s13, %s3006_s13, %s3007_s14  }
   0xb   : > { %2998 = dma.done.wait (%p2623_p2), [#allocation3], 4096  }
   0xc   : > { %3000 = vsyncadd (%p2623_p2), [#allocation3], 4294963200  ;;  %v3032_v0 = vld [vmem:[#allocation2 + $0x20] sm:$0xff]  ;;  %v3034_v1 = vld [vmem:[#allocation2 + $0x10] sm:$0xff]  ;;  %s2612_s15 = sshll.u32 %s3027_s10, 7  ;;  %s2610_s17 = sshll.u32 %s3027_s10, 4 }
   0xd   : > { %v3036_v2 = vld [vmem:[#allocation2] sm:$0xff]  ;;  %v151_v3 = vmul.f32 %v3032_v0, %v3032_v0  ;;  %v149_v4 = vmul.f32 %v3034_v1, %v3034_v1  ;;  %v3044_v6 = vld [vmem:[#allocation2 + $0x28] sm:$0xff]  ;;  %v3046_v7 = vld [vmem:[#allocation2 + $0x18] sm:$0xff]  ;;  %s3069_s16 = scalar_lea.vmem [#allocation2], %s2612_s15  ;;  %p5346_p6 = scmp.lt.s32.totalorder %s2610_s17, 31 }
   0xe   : > { %v147_v5 = vmul.f32 %v3036_v2, %v3036_v2  ;;  %v3048_v8 = vld [vmem:[#allocation2 + $0x8] sm:$0xff]  ;;  %v152_v9 = vmul.f32 %v3044_v6, %v3044_v6  ;;  %v150_v10 = vmul.f32 %v3046_v7, %v3046_v7  ;;  %v3056_v12 = vld [vmem:[#allocation2 + $0x40] sm:$0xff]  ;;  %v3058_v13 = vld [vmem:[#allocation2 + $0x38] sm:$0xff] }
   0xf   : > { %187 = vadd.xlane.f32.xlu2 %v151_v3  ;;  %183 = vadd.xlane.f32.xlu1 %v149_v4  ;;  %v148_v11 = vmul.f32 %v3048_v8, %v3048_v8  ;;  %v3060_v14 = vld [vmem:[#allocation2 + $0x30] sm:$0xff]  ;;  %v155_v15 = vmul.f32 %v3056_v12, %v3056_v12  ;;  %v154_v16 = vmul.f32 %v3058_v13, %v3058_v13  ;;  %v126_v18 = vld [vmem:[#allocation2 + $0x58] sm:$0xff]  ;;  %v124_v20 = vld [vmem:[#allocation2 + $0x48] sm:$0xff]  ;;  %s5944_s17 = smov (!%p5346_p6, %s2610_s17), 31 }
  0x10   : > { %179 = vadd.xlane.f32.xlu0 %v147_v5  ;;  %v153_v17 = vmul.f32 %v3060_v14, %v3060_v14  ;;  %v125_v19 = vld [vmem:[#allocation2 + $0x50] sm:$0xff]  ;;  %v158_v21 = vmul.f32 %v126_v18, %v126_v18  ;;  %v156_v23 = vmul.f32 %v124_v20, %v124_v20  ;;  %v128_v25 = vld [vmem:[#allocation2 + $0x68] sm:$0xff]  ;;  %v127_v26 = vld [vmem:[#allocation2 + $0x60] sm:$0xff]  ;;  %s2611_s19 = sshll.u32 %s5944_s17, 3 }
  0x11   : > { %v157_v22 = vmul.f32 %v125_v19, %v125_v19  ;;  %v129_v24 = vld [vmem:[#allocation2 + $0x70] sm:$0xff]  ;;  %v160_v28 = vmul.f32 %v128_v25, %v128_v25  ;;  %v159_v29 = vmul.f32 %v127_v26, %v127_v26  ;;  %v132_v30 = vld [vmem:[#allocation2 + $0x88] sm:$0xff]  ;;  %v131_v31 = vld [vmem:[#allocation2 + $0x80] sm:$0xff]  ;;  %s5416_s22 = scalar_lea.vmem %s5779_s1, %s2611_s19 }
  0x12   : > { %v161_v27 = vmul.f32 %v129_v24, %v129_v24  ;;  %v130_v32 = vld [vmem:[#allocation2 + $0x78] sm:$0xff]  ;;  %v164_v33 = vmul.f32 %v132_v30, %v132_v30  ;;  %v163_v34 = vmul.f32 %v131_v31, %v131_v31  ;;  %v135_v36 = vld [vmem:[#allocation2 + $0xa0] sm:$0xff]  ;;  %v133_v38 = vld [vmem:[#allocation2 + $0x90] sm:$0xff] }
  0x13   : > { %v162_v35 = vmul.f32 %v130_v32, %v130_v32  ;;  %v134_v37 = vld [vmem:[#allocation2 + $0x98] sm:$0xff]  ;;  %v167_v39 = vmul.f32 %v135_v36, %v135_v36  ;;  %v165_v41 = vmul.f32 %v133_v38, %v133_v38  ;;  %v137_v43 = vld [vmem:[#allocation2 + $0xb0] sm:$0xff]  ;;  %v136_v44 = vld [vmem:[#allocation2 + $0xa8] sm:$0xff] }
  0x14   : > { %v166_v40 = vmul.f32 %v134_v37, %v134_v37  ;;  %v138_v42 = vld [vmem:[#allocation2 + $0xb8] sm:$0xff]  ;;  %v169_v46 = vmul.f32 %v137_v43, %v137_v43  ;;  %v168_v47 = vmul.f32 %v136_v44, %v136_v44  ;;  %v141_v48 = vld [vmem:[#allocation2 + $0xd0] sm:$0xff]  ;;  %v140_v49 = vld [vmem:[#allocation2 + $0xc8] sm:$0xff] }
  0x15   : > { %v170_v45 = vmul.f32 %v138_v42, %v138_v42  ;;  %v139_v50 = vld [vmem:[#allocation2 + $0xc0] sm:$0xff]  ;;  %v173_v51 = vmul.f32 %v141_v48, %v141_v48  ;;  %v172_v52 = vmul.f32 %v140_v49, %v140_v49  ;;  %v144_v54 = vld [vmem:[#allocation2 + $0xe8] sm:$0xff]  ;;  %v142_v56 = vld [vmem:[#allocation2 + $0xd8] sm:$0xff] }
  0x16   : > { %v171_v53 = vmul.f32 %v139_v50, %v139_v50  ;;  %v143_v55 = vld [vmem:[#allocation2 + $0xe0] sm:$0xff]  ;;  %v176_v57 = vmul.f32 %v144_v54, %v144_v54  ;;  %v174_v59 = vmul.f32 %v142_v56, %v142_v56  ;;  %v146_v61 = vld [vmem:[#allocation2 + $0xf8] sm:$0xff]  ;;  %v145_v62 = vld [vmem:[#allocation2 + $0xf0] sm:$0xff] }
  0x17   : > { %189 = vadd.xlane.f32.xlu2 %v152_v9  ;;  %185 = vadd.xlane.f32.xlu1 %v150_v10  ;;  %v175_v58 = vmul.f32 %v143_v55, %v143_v55  ;;  %v1178_v60 = vld [vmem:[%s3069_s16] sm:$0xff]  ;;  %v178_v3 = vmul.f32 %v146_v61, %v146_v61  ;;  %v177_v4 = vmul.f32 %v145_v62, %v145_v62  ;;  %v1181_v5 = vld [vmem:[%s3069_s16 + $0x18] sm:$0xff]  ;;  %v1180_v9 = vld [vmem:[%s3069_s16 + $0x10] sm:$0xff] }
  0x18   : > { %181 = vadd.xlane.f32.xlu0 %v148_v11  ;;  %v1194_v63 = vmul.f32 %v1178_v60, %v1178_v60  ;;  %v1179_v10 = vld [vmem:[%s3069_s16 + $0x8] sm:$0xff]  ;;  %v1197_v11 = vmul.f32 %v1181_v5, %v1181_v5  ;;  %v1182_v19 = vld [vmem:[%s3069_s16 + $0x20] sm:$0xff]  ;;  %v1185_v25 = vld [vmem:[%s3069_s16 + $0x38] sm:$0xff] }
  0x19   : > { %v1183_v18 = vld [vmem:[%s3069_s16 + $0x28] sm:$0xff]  ;;  %v1186_v24 = vld [vmem:[%s3069_s16 + $0x40] sm:$0xff]  ;;  %v1189_v30 = vld [vmem:[%s3069_s16 + $0x58] sm:$0xff] }
  0x1a   : > { %v1188_v31 = vld [vmem:[%s3069_s16 + $0x50] sm:$0xff]  ;;  %v1191_v37 = vld [vmem:[%s3069_s16 + $0x68] sm:$0xff] }
  0x1b   : > { %v1192_v36 = vld [vmem:[%s3069_s16 + $0x70] sm:$0xff]  ;;  %v1207_v43 = vmul.f32 %v1191_v37, %v1191_v37 }
  0x1c   : > { %v1208_v42 = vmul.f32 %v1192_v36, %v1192_v36 }
  0x1f   : > { %195 = vadd.xlane.f32.xlu2 %v155_v15  ;;  %193 = vadd.xlane.f32.xlu1 %v154_v16  ;;  %v1196_v15 = vmul.f32 %v1180_v9, %v1180_v9  ;;  %v1195_v16 = vmul.f32 %v1179_v10, %v1179_v10 }
  0x20   : > { %191 = vadd.xlane.f32.xlu0 %v153_v17  ;;  %v1184_v17 = vld [vmem:[%s3069_s16 + $0x30] sm:$0xff] }
  0x21   : > { %v1200_v20 = vmul.f32 %v1184_v17, %v1184_v17 }
  0x27   : > { %201 = vadd.xlane.f32.xlu2 %v158_v21  ;;  %199 = vadd.xlane.f32.xlu1 %v157_v22  ;;  %v1199_v21 = vmul.f32 %v1183_v18, %v1183_v18  ;;  %v1198_v22 = vmul.f32 %v1182_v19, %v1182_v19 }
  0x28   : > { %197 = vadd.xlane.f32.xlu0 %v156_v23  ;;  %v1187_v23 = vld [vmem:[%s3069_s16 + $0x48] sm:$0xff] }
  0x29   : > { %v1203_v26 = vmul.f32 %v1187_v23, %v1187_v23 }
  0x2f   : > { %207 = vadd.xlane.f32.xlu2 %v161_v27  ;;  %205 = vadd.xlane.f32.xlu1 %v160_v28  ;;  %v1202_v27 = vmul.f32 %v1186_v24, %v1186_v24  ;;  %v1201_v28 = vmul.f32 %v1185_v25, %v1185_v25 }
  0x30   : > { %203 = vadd.xlane.f32.xlu0 %v159_v29  ;;  %v1190_v29 = vld [vmem:[%s3069_s16 + $0x60] sm:$0xff] }
  0x31   : > { %v1206_v32 = vmul.f32 %v1190_v29, %v1190_v29 }
  0x37   : > { %213 = vadd.xlane.f32.xlu2 %v164_v33  ;;  %211 = vadd.xlane.f32.xlu1 %v163_v34  ;;  %v1205_v33 = vmul.f32 %v1189_v30, %v1189_v30  ;;  %v1204_v34 = vmul.f32 %v1188_v31, %v1188_v31 }
  0x38   : > { %209 = vadd.xlane.f32.xlu0 %v162_v35  ;;  %v1193_v35 = vld [vmem:[%s3069_s16 + $0x78] sm:$0xff] }
  0x3f   : > { %219 = vadd.xlane.f32.xlu2 %v167_v39  ;;  %217 = vadd.xlane.f32.xlu1 %v166_v40 }
  0x40   : > { %215 = vadd.xlane.f32.xlu0 %v165_v41  ;;  %v1209_v41 = vmul.f32 %v1193_v35, %v1193_v35 }
  0x47   : > { %225 = vadd.xlane.f32.xlu2 %v170_v45  ;;  %223 = vadd.xlane.f32.xlu1 %v169_v46 }
  0x48   : > { %221 = vadd.xlane.f32.xlu0 %v168_v47 }
  0x4f   : > { %231 = vadd.xlane.f32.xlu2 %v173_v51  ;;  %229 = vadd.xlane.f32.xlu1 %v172_v52 }
  0x50   : > { %227 = vadd.xlane.f32.xlu0 %v171_v53 }
  0x57   : > { %237 = vadd.xlane.f32.xlu2 %v176_v57  ;;  %235 = vadd.xlane.f32.xlu1 %v175_v58 }
  0x58   : > { %233 = vadd.xlane.f32.xlu0 %v174_v59 }
  0x5f   : > { %1210 = vadd.xlane.f32.xlu2 %v1194_v63  ;;  %241 = vadd.xlane.f32.xlu1 %v178_v3 }
  0x60   : > { %239 = vadd.xlane.f32.xlu0 %v177_v4 }
  0x67   : > { %1216 = vadd.xlane.f32.xlu2 %v1197_v11  ;;  %1214 = vadd.xlane.f32.xlu1 %v1196_v15 }
  0x68   : > { %1212 = vadd.xlane.f32.xlu0 %v1195_v16 }
  0x6f   : > { %1222 = vadd.xlane.f32.xlu2 %v1200_v20  ;;  %1220 = vadd.xlane.f32.xlu1 %v1199_v21 }
  0x70   : > { %1218 = vadd.xlane.f32.xlu0 %v1198_v22 }
  0x77   : > { %1228 = vadd.xlane.f32.xlu2 %v1203_v26  ;;  %1226 = vadd.xlane.f32.xlu1 %v1202_v27 }
  0x78   : > { %1224 = vadd.xlane.f32.xlu0 %v1201_v28 }
  0x7f   : > { %1234 = vadd.xlane.f32.xlu2 %v1206_v32  ;;  %1232 = vadd.xlane.f32.xlu1 %v1205_v33 }
  0x80   : > { %1230 = vadd.xlane.f32.xlu0 %v1204_v34 }
  0x82   : > { %v188_v38 = vpop.xlane.xlu2 %187  ;;  %v3087_v39 = vpop.xlane.xlu1 %183 }
  0x83   : > { %2636 = vrsqrt.f32 %v188_v38  ;;  %v3089_v40 = vpop.xlane.xlu0 %179  ;;  %vm298_vm0 = vcmp.eq.f32.partialorder %v188_v38, inf  ;;  %vm300_vm1 = vcmp.eq.f32.partialorder %v188_v38, 0.0  ;;  %v301_v61 = vand.u32 2147483648, %v188_v38 }
  0x84   : > { %2638 = vrsqrt.f32 %v3087_v39  ;;  %vm274_vm2 = vcmp.eq.f32.partialorder %v3087_v39, inf  ;;  %vm276_vm3 = vcmp.eq.f32.partialorder %v3087_v39, 0.0  ;;  %v277_v10 = vand.u32 2147483648, %v3087_v39 }
  0x85   : > { %2640 = vrsqrt.f32 %v3089_v40  ;;  %vm250_vm4 = vcmp.eq.f32.partialorder %v3089_v40, inf  ;;  %vm252_vm5 = vcmp.eq.f32.partialorder %v3089_v40, 0.0  ;;  %v253_v21 = vand.u32 2147483648, %v3089_v40 }
  0x87   : > { %1240 = vadd.xlane.f32.xlu2 %v1209_v41  ;;  %1238 = vadd.xlane.f32.xlu1 %v1208_v42 }
  0x88   : > { %1236 = vadd.xlane.f32.xlu0 %v1207_v43 }
  0x89   : > { %v2637_v44 = vpop.eup %2636 }
  0x8a   : > { %v2639_v45 = vpop.eup %2638  ;;  %v292_v46 = vmul.f32 %v2637_v44, %v188_v38  ;;  %v3093_v47 = vpop.xlane.xlu2 %189 }
  0x8b   : > { %v3095_v48 = vpop.xlane.xlu1 %185  ;;  %v2641_v49 = vpop.eup %2640  ;;  %v268_v50 = vmul.f32 %v2639_v45, %v3087_v39  ;;  %2642 = vrsqrt.f32 %v3093_v47  ;;  %vm310_vm6 = vcmp.eq.f32.partialorder %v3093_v47, inf  ;;  %vm312_vm7 = vcmp.eq.f32.partialorder %v3093_v47, 0.0 }
  0x8c   : > { %v3099_v51 = vpop.xlane.xlu0 %181  ;;  %v293_v52 = vmul.f32 %v2637_v44, %v292_v46  ;;  %v244_v53 = vmul.f32 %v2641_v49, %v3089_v40  ;;  %2644 = vrsqrt.f32 %v3095_v48  ;;  %vm286_vm8 = vcmp.eq.f32.partialorder %v3095_v48, inf }
  0x8d   : > { %v269_v54 = vmul.f32 %v2639_v45, %v268_v50  ;;  %2646 = vrsqrt.f32 %v3099_v51  ;;  %v313_v50 = vand.u32 2147483648, %v3093_v47  ;;  %vm288_vm9 = vcmp.eq.f32.partialorder %v3095_v48, 0.0 }
  0x8e   : > { %v294_v55 = vmul.f32 0.5, %v293_v52  ;;  %v245_v56 = vmul.f32 %v2641_v49, %v244_v53  ;;  %v289_v52 = vand.u32 2147483648, %v3095_v48  ;;  %vm262_vm10 = vcmp.eq.f32.partialorder %v3099_v51, inf }
  0x8f   : > { %v270_v57 = vmul.f32 0.5, %v269_v54  ;;  %vm264_vm11 = vcmp.eq.f32.partialorder %v3099_v51, 0.0 }
  0x90   : > { %v295_v58 = vsub.f32 1.5, %v294_v55  ;;  %v246_v59 = vmul.f32 0.5, %v245_v56 }
  0x91   : > { %v2643_v60 = vpop.eup %2642  ;;  %v271_v62 = vsub.f32 1.5, %v270_v57 }
  0x92   : > { %v2645_v63 = vpop.eup %2644  ;;  %v296_v3 = vmul.f32 %v2637_v44, %v295_v58  ;;  %v247_v4 = vsub.f32 1.5, %v246_v59  ;;  %v304_v5 = vmul.f32 %v2643_v60, %v3093_v47  ;;  %v3110_v15 = vpop.xlane.xlu2 %195 }
  0x93   : > { %v272_v9 = vmul.f32 %v2639_v45, %v271_v62  ;;  %v280_v11 = vmul.f32 %v2645_v63, %v3095_v48  ;;  %v2647_v16 = vpop.eup %2646  ;;  %2648 = vrsqrt.f32 %v3110_v15  ;;  %v3134_v41 = vpop.xlane.xlu1 %193 }
  0x94   : > { %v297_v17 = vmul.f32 %v296_v3, %v188_v38  ;;  %v248_v18 = vmul.f32 %v2641_v49, %v247_v4  ;;  %v305_v19 = vmul.f32 %v2643_v60, %v304_v5  ;;  %v256_v23 = vmul.f32 %v2647_v16, %v3099_v51 }
  0x95   : > { %v273_v20 = vmul.f32 %v272_v9, %v3087_v39  ;;  %v281_v22 = vmul.f32 %v2645_v63, %v280_v11 }
  0x96   : > { %v299_v24 = vsel %vm298_vm0, %v188_v38, %v297_v17  ;;  %v249_v25 = vmul.f32 %v248_v18, %v3089_v40  ;;  %v306_v26 = vmul.f32 0.5, %v305_v19  ;;  %v257_v30 = vmul.f32 %v2647_v16, %v256_v23 }
  0x97   : > { %v302_v27 = vsel %vm300_vm1, %v301_v61, %v299_v24  ;;  %v275_v28 = vsel %vm274_vm2, %v3087_v39, %v273_v20  ;;  %v282_v29 = vmul.f32 0.5, %v281_v22  ;;  %v349_v22 = vand.u32 2147483648, %v3110_v15 }
  0x98   : > { %v3123_v31 = vmax.f32 %v302_v27, 1e-12  ;;  %v278_v32 = vsel %vm276_vm3, %v277_v10, %v275_v28  ;;  %v251_v33 = vsel %vm250_vm4, %v3089_v40, %v249_v25  ;;  %v307_v34 = vsub.f32 1.5, %v306_v26 }
  0x99   : > { %v3130_v35 = vmax.f32 %v278_v32, 1e-12  ;;  %v254_v36 = vsel %vm252_vm5, %v253_v21, %v251_v33  ;;  %v283_v37 = vsub.f32 1.5, %v282_v29  ;;  %v258_v38 = vmul.f32 0.5, %v257_v30  ;;  %v3138_v39 = vpop.eup %2648 }
  0x9a   : > { %2650 = vrcp.f32 %v3123_v31  ;;  %v3140_v42 = vmax.f32 %v254_v36, 1e-12  ;;  %v308_v43 = vmul.f32 %v2643_v60, %v307_v34  ;;  %v340_v5 = vmul.f32 %v3138_v39, %v3110_v15 }
  0x9b   : > { %2652 = vrcp.f32 %v3130_v35  ;;  %v284_v44 = vmul.f32 %v2645_v63, %v283_v37  ;;  %v259_v45 = vsub.f32 1.5, %v258_v38  ;;  %v728_v10 = vand.u32 2147483647, %v3123_v31 }
  0x9c   : > { %2654 = vrsqrt.f32 %v3134_v41  ;;  %v309_v40 = vmul.f32 %v308_v43, %v3093_v47  ;;  %v730_v18 = vand.u32 2147483648, %v3123_v31  ;;  %vm724_vm12 = vweird.f32 %v3123_v31 }
  0x9d   : > { %2656 = vrcp.f32 %v3140_v42  ;;  %v285_v46 = vmul.f32 %v284_v44, %v3095_v48  ;;  %v260_v57 = vmul.f32 %v2647_v16, %v259_v45  ;;  %v265_v16 = vand.u32 2147483648, %v3099_v51 }
  0x9e   : > { %v311_v55 = vsel %vm310_vm6, %v3093_v47, %v309_v40  ;;  %v698_v20 = vand.u32 2147483647, %v3130_v35  ;;  %v700_v21 = vand.u32 2147483648, %v3130_v35  ;;  %v668_v23 = vand.u32 2147483647, %v3140_v42 }
  0x9f   : > { %v287_v56 = vsel %vm286_vm8, %v3095_v48, %v285_v46  ;;  %v314_v60 = vsel %vm312_vm7, %v313_v50, %v311_v55  ;;  %v261_v48 = vmul.f32 %v260_v57, %v3099_v51  ;;  %v341_v25 = vmul.f32 %v3138_v39, %v340_v5 }
  0xa0   : > { %v3148_v49 = vpop.eup %2650  ;;  %v290_v61 = vsel %vm288_vm9, %v289_v52, %v287_v56  ;;  %v3164_v63 = vmax.f32 %v314_v60, 1e-12  ;;  %vm3195_vm13 = vcmp.eq.f32.partialorder %v728_v10, 8.507059e+37  ;;  %vm694_vm14 = vweird.f32 %v3130_v35 }
  0xa1   : > { %v3154_v53 = vpop.eup %2652  ;;  %v720_v54 = vmul.f32 %v3148_v49, %v3123_v31  ;;  %v3166_v3 = vmax.f32 %v290_v61, 1e-12  ;;  %v263_v24 = vsel %vm262_vm10, %v3099_v51, %v261_v48  ;;  %vm725_vm15 = vweird.f32 %v3148_v49  ;;  %v3246_v61 = vpop.xlane.xlu2 %201 }
  0xa2   : > { %v3160_v58 = vpop.eup %2654  ;;  %v690_v59 = vmul.f32 %v3154_v53, %v3130_v35  ;;  %2658 = vrcp.f32 %v3164_v63  ;;  %v266_v29 = vsel %vm264_vm11, %v265_v16, %v263_v24  ;;  %v731_v32 = vor.u32 1.1754944e-38, %v730_v18  ;;  %vm3224_vm3 = vmor %vm724_vm12, %vm725_vm15 }
  0xa3   : > { %v721_v62 = vsub.f32 1.0, %v720_v54  ;;  %v3168_v4 = vpop.eup %2656  ;;  %v328_v9 = vmul.f32 %v3160_v58, %v3134_v41  ;;  %2660 = vrcp.f32 %v3166_v3  ;;  %vm3208_vm0 = vcmp.eq.f32.partialorder %v698_v20, 8.507059e+37  ;;  %v3234_v54 = vpop.xlane.xlu0 %191 }
  0xa4   : > { %v660_v47 = vmul.f32 %v3168_v4, %v3140_v42  ;;  %v691_v11 = vsub.f32 1.0, %v690_v59  ;;  %v701_v37 = vor.u32 1.1754944e-38, %v700_v21  ;;  %v670_v38 = vand.u32 2147483648, %v3140_v42 }
  0xa5   : > { %v722_v17 = vmul.f32 %v3148_v49, %v721_v62  ;;  %v329_v26 = vmul.f32 %v3160_v58, %v328_v9  ;;  %v3213_v43 = vmax.f32 %v266_v29, 1e-12  ;;  %vm664_vm1 = vweird.f32 %v3140_v42 }
  0xa6   : > { %v661_v19 = vsub.f32 1.0, %v660_v47  ;;  %v692_v28 = vmul.f32 %v3154_v53, %v691_v11  ;;  %vm3218_vm2 = vcmp.eq.f32.partialorder %v668_v23, 8.507059e+37  ;;  %v342_v45 = vmul.f32 0.5, %v341_v25 }
  0xa7   : > { %v723_v30 = vadd.f32 %v3148_v49, %v722_v17  ;;  %v330_v40 = vmul.f32 0.5, %v329_v26  ;;  %vm695_vm4 = vweird.f32 %v3154_v53  ;;  %vm665_vm5 = vweird.f32 %v3168_v4 }
  0xa8   : > { %v662_v33 = vmul.f32 %v3168_v4, %v661_v19  ;;  %v3206_v34 = vpop.eup %2658  ;;  %v693_v50 = vadd.f32 %v3154_v53, %v692_v28  ;;  %vm346_vm6 = vcmp.eq.f32.partialorder %v3110_v15, inf  ;;  %v745_v56 = vand.u32 2147483648, %v3164_v63  ;;  %vm3252_vm9 = vmor %vm694_vm14, %vm695_vm4 }
  0xa9   : > { %v3215_v51 = vpop.eup %2660  ;;  %v727_v31 = vsel %vm3224_vm3, %v3148_v49, %v723_v30  ;;  %2662 = vrcp.f32 %v3213_v43  ;;  %vm348_vm7 = vcmp.eq.f32.partialorder %v3110_v15, 0.0  ;;  %v671_v57 = vor.u32 1.1754944e-38, %v670_v38  ;;  %vm3268_vm11 = vmor %vm664_vm1, %vm665_vm5 }
  0xaa   : > { %v705_v52 = vmul.f32 %v3215_v51, %v3166_v3  ;;  %v663_v55 = vadd.f32 %v3168_v4, %v662_v33  ;;  %v735_v59 = vmul.f32 %v3206_v34, %v3164_v63  ;;  %v343_v60 = vsub.f32 1.5, %v342_v45 }
  0xab   : > { %vm334_vm8 = vcmp.eq.f32.partialorder %v3134_v41, inf  ;;  %v743_v62 = vand.u32 2147483647, %v3164_v63  ;;  %v331_v47 = vsub.f32 1.5, %v330_v40  ;;  %vm336_vm10 = vcmp.eq.f32.partialorder %v3134_v41, 0.0 }
  0xac   : > { %2664 = vrsqrt.f32 %v3234_v54  ;;  %v732_v48 = vsel %vm3195_vm13, %v731_v32, %v727_v31  ;;  %v697_v5 = vsel %vm3252_vm9, %v3154_v53, %v693_v50  ;;  %v706_v9 = vsub.f32 1.0, %v705_v52 }
  0xad   : > { %v344_v10 = vmul.f32 %v3138_v39, %v343_v60  ;;  %v667_v11 = vsel %vm3268_vm11, %v3168_v4, %v663_v55  ;;  %v3276_v16 = vor.u32 1.1754944e-38, %v745_v56  ;;  %vm709_vm12 = vweird.f32 %v3166_v3  ;;  %v3284_v39 = vpop.xlane.xlu1 %199 }
  0xae   : > { %v332_v53 = vmul.f32 %v3160_v58, %v331_v47  ;;  %2666 = vrsqrt.f32 %v3246_v61  ;;  %v736_v42 = vsub.f32 1.0, %v735_v59  ;;  %v713_v17 = vand.u32 2147483647, %v3166_v3 }
  0xaf   : > { %v715_v18 = vand.u32 2147483648, %v3166_v3  ;;  %v345_v19 = vmul.f32 %v344_v10, %v3110_v15  ;;  %v2663_v20 = vpop.eup %2662  ;;  %v3287_v4 = vmul.f32 %v732_v48, %v3032_v0  ;;  %v702_v21 = vsel %vm3208_vm0, %v701_v37, %v697_v5 }
  0xb0   : > { %v333_v58 = vmul.f32 %v332_v53, %v3134_v41  ;;  %v337_v23 = vand.u32 2147483648, %v3134_v41  ;;  %v672_v24 = vsel %vm3218_vm2, %v671_v57, %v667_v11  ;;  %vm739_vm13 = vweird.f32 %v3164_v63 }
  0xb1   : > { %v707_v25 = vmul.f32 %v3215_v51, %v706_v9  ;;  %vm710_vm14 = vweird.f32 %v3215_v51  ;;  %v675_v26 = vmul.f32 %v2663_v20, %v3213_v43  ;;  %v683_v27 = vand.u32 2147483647, %v3213_v43 }
  0xb2   : > { %v2665_v0 = vpop.eup %2664  ;;  %v347_v28 = vsel %vm346_vm6, %v3110_v15, %v345_v19  ;;  %v335_v29 = vsel %vm334_vm8, %v3134_v41, %v333_v58  ;;  %2668 = vrsqrt.f32 %v3284_v39  ;;  %v737_v30 = vmul.f32 %v3206_v34, %v736_v42  ;;  %vm3338_vm3 = vmor %vm709_vm12, %vm710_vm14 }
  0xb3   : > { %vm3308_vm15 = vcmp.eq.f32.partialorder %v713_v17, 8.507059e+37  ;;  %v676_v33 = vsub.f32 1.0, %v675_v26  ;;  %v350_v36 = vsel %vm348_vm7, %v349_v22, %v347_v28  ;;  %v338_v37 = vsel %vm336_vm10, %v337_v23, %v335_v29 }
  0xb4   : > { %v2667_v38 = vpop.eup %2666  ;;  %v685_v44 = vand.u32 2147483648, %v3213_v43  ;;  %v3319_v45 = vmax.f32 %v350_v36, 1e-12  ;;  %v3321_v40 = vmax.f32 %v338_v37, 1e-12  ;;  %v316_v46 = vmul.f32 %v2665_v0, %v3234_v54 }
  0xb5   : > { %vm3324_vm0 = vcmp.eq.f32.partialorder %v743_v62, 8.507059e+37  ;;  %v708_v52 = vadd.f32 %v3215_v51, %v707_v25  ;;  %v677_v15 = vmul.f32 %v2663_v20, %v676_v33  ;;  %vm680_vm1 = vweird.f32 %v2663_v20 }
  0xb6   : > { %v376_v41 = vmul.f32 %v2667_v38, %v3246_v61  ;;  %v703_v22 = vmul.f32 %v702_v21, %v3034_v1  ;;  %vm740_vm2 = vweird.f32 %v3206_v34  ;;  %v716_v31 = vor.u32 1.1754944e-38, %v715_v18  ;;  %v3344_v1 = vpop.xlane.xlu0 %197 }
  0xb7   : > { %2670 = vrcp.f32 %v3319_v45  ;;  %v738_v55 = vadd.f32 %v3206_v34, %v737_v30  ;;  %v678_v57 = vadd.f32 %v2663_v20, %v677_v15  ;;  %vm679_vm4 = vweird.f32 %v3213_v43  ;;  %vm3355_vm7 = vmor %vm739_vm13, %vm740_vm2 }
  0xb8   : > { %2672 = vrcp.f32 %v3321_v40  ;;  %v2669_v59 = vpop.eup %2668  ;;  %v673_v60 = vmul.f32 %v672_v24, %v3036_v2  ;;  %vm681_vm5 = vmor %vm679_vm4, %vm680_vm1  ;;  %vm684_vm6 = vcmp.eq.f32.partialorder %v683_v27, 8.507059e+37  ;;  %v686_v49 = vor.u32 1.1754944e-38, %v685_v44  ;;  %v3381_v24 = vpop.xlane.xlu2 %207 }
  0xb9   : > { %v317_v62 = vmul.f32 %v2665_v0, %v316_v46  ;;  %v712_v3 = vsel %vm3338_vm3, %v3215_v51, %v708_v52  ;;  %v682_v47 = vsel %vm681_vm5, %v2663_v20, %v678_v57  ;;  %v377_v48 = vmul.f32 %v2667_v38, %v376_v41 }
  0xba   : > { %v364_v5 = vmul.f32 %v2669_v59, %v3284_v39  ;;  %v687_v2 = vsel %vm684_vm6, %v686_v49, %v682_v47  ;;  %vm322_vm8 = vcmp.eq.f32.partialorder %v3234_v54, inf  ;;  %2674 = vrsqrt.f32 %v3344_v1 }
  0xbb   : > { %v318_v35 = vmul.f32 0.5, %v317_v62  ;;  %v742_v51 = vsel %vm3355_vm7, %v3206_v34, %v738_v55  ;;  %v688_v9 = vmul.f32 %v687_v2, %v3048_v8  ;;  %v378_v10 = vmul.f32 0.5, %v377_v48 }
  0xbc   : > { %v365_v11 = vmul.f32 %v2669_v59, %v364_v5  ;;  %v717_v63 = vsel %vm3308_vm15, %v716_v31, %v712_v3  ;;  %vm324_vm9 = vcmp.eq.f32.partialorder %v3234_v54, 0.0  ;;  %v325_v17 = vand.u32 2147483648, %v3234_v54  ;;  %v3427_v3 = vpop.xlane.xlu1 %205 }
  0xbd   : > { %v3365_v53 = vpop.eup %2670  ;;  %v319_v42 = vsub.f32 1.5, %v318_v35  ;;  %v1139_v19 = vadd.f32 %v688_v9, %v673_v60  ;;  %v379_v20 = vsub.f32 1.5, %v378_v10  ;;  %vm382_vm10 = vcmp.eq.f32.partialorder %v3246_v61, inf }
  0xbe   : > { %v3371_v18 = vpop.eup %2672  ;;  %v780_v34 = vmul.f32 %v3365_v53, %v3319_v45  ;;  %v747_v8 = vsel %vm3324_vm0, %v3276_v16, %v742_v51  ;;  %v366_v23 = vmul.f32 0.5, %v365_v11  ;;  %v718_v25 = vmul.f32 %v717_v63, %v3046_v7 }
  0xbf   : > { %v765_v21 = vmul.f32 %v3371_v18, %v3321_v40  ;;  %v320_v58 = vmul.f32 %v2665_v0, %v319_v42  ;;  %v1140_v26 = vadd.f32 %v1139_v19, %v703_v22  ;;  %v380_v28 = vmul.f32 %v2667_v38, %v379_v20 }
  0xc0   : > { %v781_v27 = vsub.f32 1.0, %v780_v34  ;;  %v3384_v29 = vpop.eup %2674  ;;  %vm384_vm11 = vcmp.eq.f32.partialorder %v3246_v61, 0.0  ;;  %v385_v16 = vand.u32 2147483648, %v3246_v61  ;;  %v367_v32 = vsub.f32 1.5, %v366_v23  ;;  %v3474_v23 = vpop.xlane.xlu0 %203 }
  0xc1   : > { %v321_v30 = vmul.f32 %v320_v58, %v3234_v54  ;;  %v748_v33 = vmul.f32 %v747_v8, %v3044_v6  ;;  %v1141_v0 = vadd.f32 %v1140_v26, %v718_v25  ;;  %v381_v36 = vmul.f32 %v380_v28, %v3246_v61 }
  0xc2   : > { %2676 = vrsqrt.f32 %v3381_v24  ;;  %v766_v7 = vsub.f32 1.0, %v765_v21  ;;  %v368_v38 = vmul.f32 %v2669_v59, %v367_v32  ;;  %v352_v44 = vmul.f32 %v3384_v29, %v3344_v1 }
  0xc3   : > { %v323_v37 = vsel %vm322_vm8, %v3234_v54, %v321_v30  ;;  %v782_v46 = vmul.f32 %v3365_v53, %v781_v27  ;;  %v1142_v50 = vadd.f32 %v1141_v0, %v3287_v4  ;;  %v383_v52 = vsel %vm382_vm10, %v3246_v61, %v381_v36 }
  0xc4   : > { %v326_v6 = vsel %vm324_vm9, %v325_v17, %v323_v37  ;;  %v788_v15 = vand.u32 2147483647, %v3319_v45  ;;  %v386_v22 = vsel %vm384_vm11, %v385_v16, %v383_v52  ;;  %v790_v31 = vand.u32 2147483648, %v3319_v45  ;;  %v3486_v16 = vpop.xlane.xlu2 %213 }
  0xc5   : > { %v3405_v41 = vmax.f32 %v326_v6, 1e-12  ;;  %v3410_v55 = vadd.f32 %v1142_v50, %v748_v33  ;;  %v3412_v56 = vmax.f32 %v386_v22, 1e-12  ;;  %v369_v54 = vmul.f32 %v368_v38, %v3284_v39 }
  0xc6   : > { %vm370_vm12 = vcmp.eq.f32.partialorder %v3284_v39, inf  ;;  %vm372_vm13 = vcmp.eq.f32.partialorder %v3284_v39, 0.0  ;;  %v353_v4 = vmul.f32 %v3384_v29, %v352_v44  ;;  %v783_v61 = vadd.f32 %v3365_v53, %v782_v46 }
  0xc7   : > { %2678 = vrcp.f32 %v3405_v41  ;;  %vm785_vm14 = vweird.f32 %v3365_v53  ;;  %v767_v59 = vmul.f32 %v3371_v18, %v766_v7  ;;  %v373_v60 = vand.u32 2147483648, %v3284_v39 }
  0xc8   : > { %v2677_v57 = vpop.eup %2676  ;;  %vm784_vm15 = vweird.f32 %v3319_v45  ;;  %v773_v49 = vand.u32 2147483647, %v3321_v40  ;;  %v775_v62 = vand.u32 2147483648, %v3321_v40  ;;  %2680 = vrcp.f32 %v3412_v56 }
  0xc9   : > { %vm3429_vm0 = vcmp.eq.f32.partialorder %v788_v15, 8.507059e+37  ;;  %v791_v48 = vor.u32 1.1754944e-38, %v790_v31  ;;  %vm769_vm1 = vweird.f32 %v3321_v40  ;;  %v371_v5 = vsel %vm370_vm12, %v3284_v39, %v369_v54  ;;  %vm3437_vm2 = vmor %vm784_vm15, %vm785_vm14 }
  0xca   : > { %vm770_vm3 = vweird.f32 %v3371_v18  ;;  %v374_v43 = vsel %vm372_vm13, %v373_v60, %v371_v5  ;;  %v354_v2 = vmul.f32 0.5, %v353_v4  ;;  %v412_v35 = vmul.f32 %v2677_v57, %v3381_v24 }
  0xcb   : > { %v787_v51 = vsel %vm3437_vm2, %v3365_v53, %v783_v61  ;;  %v768_v9 = vadd.f32 %v3371_v18, %v767_v59  ;;  %v3449_v10 = vmax.f32 %v374_v43, 1e-12  ;;  %2682 = vrsqrt.f32 %v3427_v3  ;;  %vm3468_vm7 = vmor %vm769_vm1, %vm770_vm3 }
  0xcc   : > { %vm3452_vm4 = vcmp.eq.f32.partialorder %v773_v49, 8.507059e+37  ;;  %v776_v39 = vor.u32 1.1754944e-38, %v775_v62  ;;  %v355_v42 = vsub.f32 1.5, %v354_v2  ;;  %v413_v17 = vmul.f32 %v2677_v57, %v412_v35 }
  0xcd   : > { %v2679_v11 = vpop.eup %2678  ;;  %2684 = vrcp.f32 %v3449_v10  ;;  %vm358_vm5 = vcmp.eq.f32.partialorder %v3344_v1, inf  ;;  %vm360_vm6 = vcmp.eq.f32.partialorder %v3344_v1, 0.0  ;;  %v792_v34 = vsel %vm3429_vm0, %v791_v48, %v787_v51 }
  0xce   : > { %v750_v19 = vmul.f32 %v2679_v11, %v3405_v41  ;;  %v3460_v53 = vpop.eup %2680  ;;  %v356_v8 = vmul.f32 %v3384_v29, %v355_v42  ;;  %v361_v21 = vand.u32 2147483648, %v3344_v1  ;;  %v414_v58 = vmul.f32 0.5, %v413_v17 }
  0xcf   : > { %v772_v25 = vsel %vm3468_vm7, %v3371_v18, %v768_v9  ;;  %v760_v27 = vand.u32 2147483648, %v3405_v41  ;;  %v825_v40 = vmul.f32 %v3460_v53, %v3412_v56  ;;  %vm418_vm8 = vcmp.eq.f32.partialorder %v3381_v24, inf }
  0xd0   : > { %v751_v26 = vsub.f32 1.0, %v750_v19  ;;  %vm754_vm9 = vweird.f32 %v3405_v41  ;;  %v758_v28 = vand.u32 2147483647, %v3405_v41  ;;  %v357_v29 = vmul.f32 %v356_v8, %v3344_v1 }
  0xd1   : > { %v415_v30 = vsub.f32 1.5, %v414_v58  ;;  %v2683_v32 = vpop.eup %2682  ;;  %vm755_vm10 = vweird.f32 %v2679_v11  ;;  %v826_v18 = vsub.f32 1.0, %v825_v40  ;;  %vm420_vm11 = vcmp.eq.f32.partialorder %v3381_v24, 0.0 }
  0xd2   : > { %v752_v33 = vmul.f32 %v2679_v11, %v751_v26  ;;  %2686 = vrsqrt.f32 %v3474_v23  ;;  %v777_v0 = vsel %vm3452_vm4, %v776_v39, %v772_v25  ;;  %v359_v36 = vsel %vm358_vm5, %v3344_v1, %v357_v29  ;;  %vm756_vm12 = vmor %vm754_vm9, %vm755_vm10 }
  0xd3   : > { %v416_v7 = vmul.f32 %v2677_v57, %v415_v30  ;;  %v400_v37 = vmul.f32 %v2683_v32, %v3427_v3  ;;  %v3496_v38 = vpop.eup %2684  ;;  %v761_v46 = vor.u32 1.1754944e-38, %v760_v27  ;;  %v362_v50 = vsel %vm360_vm6, %v361_v21, %v359_v36  ;;  %v3552_v21 = vpop.xlane.xlu1 %211 }
  0xd4   : > { %v753_v44 = vadd.f32 %v2679_v11, %v752_v33  ;;  %2688 = vrsqrt.f32 %v3486_v16  ;;  %v835_v6 = vand.u32 2147483648, %v3412_v56  ;;  %v810_v52 = vmul.f32 %v3496_v38, %v3449_v10 }
  0xd5   : > { %v3506_v15 = vmax.f32 %v362_v50, 1e-12  ;;  %v417_v22 = vmul.f32 %v416_v7, %v3381_v24  ;;  %vm759_vm13 = vcmp.eq.f32.partialorder %v758_v28, 8.507059e+37  ;;  %v827_v54 = vmul.f32 %v3460_v53, %v826_v18 }
  0xd6   : > { %v757_v31 = vsel %vm756_vm12, %v2679_v11, %v753_v44  ;;  %v401_v1 = vmul.f32 %v2683_v32, %v400_v37  ;;  %v811_v57 = vsub.f32 1.0, %v810_v52  ;;  %v421_v41 = vand.u32 2147483648, %v3381_v24 }
  0xd7   : > { %v762_v4 = vsel %vm759_vm13, %v761_v46, %v757_v31  ;;  %2690 = vrcp.f32 %v3506_v15  ;;  %v793_v59 = vmul.f32 %v792_v34, %v3056_v12  ;;  %v778_v60 = vmul.f32 %v777_v0, %v3058_v13 }
  0xd8   : > { %v2687_v61 = vpop.eup %2686  ;;  %v763_v49 = vmul.f32 %v762_v4, %v3060_v14  ;;  %v833_v62 = vand.u32 2147483647, %v3412_v56  ;;  %vm829_vm14 = vweird.f32 %v3412_v56  ;;  %v836_v47 = vor.u32 1.1754944e-38, %v835_v6  ;;  %v2924_v4 = vld [vmem:[#allocation2 + $0x48] sm:$0xff] }
  0xd9   : > { %v419_v48 = vsel %vm418_vm8, %v3381_v24, %v417_v22  ;;  %v402_v5 = vmul.f32 0.5, %v401_v1  ;;  %v828_v12 = vadd.f32 %v3460_v53, %v827_v54  ;;  %vm830_vm15 = vweird.f32 %v3460_v53 }
  0xda   : > { %v3520_v45 = vpop.eup %2688  ;;  %v1144_v43 = vadd.f32 %v3410_v55, %v763_v49  ;;  %v820_v13 = vand.u32 2147483648, %v3449_v10  ;;  %v812_v14 = vmul.f32 %v3496_v38, %v811_v57  ;;  %v422_v2 = vsel %vm420_vm11, %v421_v41, %v419_v48  ;;  %vm3545_vm3 = vmor %vm829_vm14, %vm830_vm15  ;;  %v2926_v49 = vld [vmem:[#allocation2 + $0x50] sm:$0xff] }
  0xdb   : > { %v403_v35 = vsub.f32 1.5, %v402_v5  ;;  %v388_v51 = vmul.f32 %v2687_v61, %v3474_v23  ;;  %vm3530_vm0 = vcmp.eq.f32.partialorder %v833_v62, 8.507059e+37  ;;  %v3534_v55 = vmax.f32 %v422_v2, 1e-12 }
  0xdc   : > { %v1145_v9 = vadd.f32 %v1144_v43, %v778_v60  ;;  %vm406_vm1 = vcmp.eq.f32.partialorder %v3427_v3, inf  ;;  %vm408_vm2 = vcmp.eq.f32.partialorder %v3427_v3, 0.0  ;;  %v409_v42 = vand.u32 2147483648, %v3427_v3 }
  0xdd   : > { %v2691_v63 = vpop.eup %2690  ;;  %v404_v39 = vmul.f32 %v2683_v32, %v403_v35  ;;  %v389_v24 = vmul.f32 %v2687_v61, %v388_v51  ;;  %v448_v17 = vmul.f32 %v3520_v45, %v3486_v16  ;;  %vm814_vm4 = vweird.f32 %v3449_v10 }
  0xde   : > { %v818_v34 = vand.u32 2147483647, %v3449_v10  ;;  %v1146_v20 = vadd.f32 %v1145_v9, %v793_v59  ;;  %v795_v8 = vmul.f32 %v2691_v63, %v3506_v15  ;;  %v832_v58 = vsel %vm3545_vm3, %v3460_v53, %v828_v12  ;;  %v3565_v53 = vpop.xlane.xlu0 %209  ;;  %v2925_v59 = vld [vmem:[#allocation2 + $0x58] sm:$0xff] }
  0xdf   : > { %v813_v25 = vadd.f32 %v3496_v38, %v812_v14  ;;  %vm815_vm5 = vweird.f32 %v3496_v38  ;;  %v821_v56 = vor.u32 1.1754944e-38, %v820_v13  ;;  %2692 = vrcp.f32 %v3534_v55 }
  0xe0   : > { %v796_v26 = vsub.f32 1.0, %v795_v8  ;;  %v405_v27 = vmul.f32 %v404_v39, %v3427_v3  ;;  %v390_v40 = vmul.f32 0.5, %v389_v24  ;;  %v803_v28 = vand.u32 2147483647, %v3506_v15  ;;  %vm3569_vm6 = vmor %vm814_vm4, %vm815_vm5 }
  0xe1   : > { %v805_v29 = vand.u32 2147483648, %v3506_v15  ;;  %v449_v30 = vmul.f32 %v3520_v45, %v448_v17  ;;  %2694 = vrsqrt.f32 %v3552_v21  ;;  %vm800_vm7 = vweird.f32 %v2691_v63 }
  0xe2   : > { %v797_v33 = vmul.f32 %v2691_v63, %v796_v26  ;;  %v407_v18 = vsel %vm406_vm1, %v3427_v3, %v405_v27  ;;  %v391_v0 = vsub.f32 1.5, %v390_v40  ;;  %v817_v36 = vsel %vm3569_vm6, %v3496_v38, %v813_v25  ;;  %v3590_v3 = vpop.xlane.xlu2 %219 }
  0xe3   : > { %vm799_vm8 = vweird.f32 %v3506_v15  ;;  %v410_v10 = vsel %vm408_vm2, %v409_v42, %v407_v18  ;;  %v450_v7 = vmul.f32 0.5, %v449_v30  ;;  %2696 = vrsqrt.f32 %v3565_v53 }
  0xe4   : > { %v798_v37 = vadd.f32 %v2691_v63, %v797_v33  ;;  %v3582_v44 = vmax.f32 %v410_v10, 1e-12  ;;  %v392_v46 = vmul.f32 %v2687_v61, %v391_v0  ;;  %v837_v50 = vsel %vm3530_vm0, %v836_v47, %v832_v58  ;;  %vm801_vm10 = vmor %vm799_vm8, %vm800_vm7  ;;  %v3644_v0 = vpop.xlane.xlu1 %217 }
  0xe5   : > { %vm819_vm9 = vcmp.eq.f32.partialorder %v818_v34, 8.507059e+37  ;;  %v806_v6 = vor.u32 1.1754944e-38, %v805_v29  ;;  %v451_v52 = vsub.f32 1.5, %v450_v7  ;;  %v3587_v38 = vpop.eup %2692  ;;  %vm804_vm11 = vcmp.eq.f32.partialorder %v803_v28, 8.507059e+37 }
  0xe6   : > { %v822_v15 = vsel %vm819_vm9, %v821_v56, %v817_v36  ;;  %v802_v22 = vsel %vm801_vm10, %v2691_v63, %v798_v37  ;;  %2698 = vrcp.f32 %v3582_v44  ;;  %vm394_vm12 = vcmp.eq.f32.partialorder %v3474_v23, inf }
  0xe7   : > { %v2695_v31 = vpop.eup %2694  ;;  %v807_v54 = vsel %vm804_vm11, %v806_v6, %v802_v22  ;;  %vm396_vm13 = vcmp.eq.f32.partialorder %v3474_v23, 0.0  ;;  %v397_v1 = vand.u32 2147483648, %v3474_v23  ;;  %v393_v41 = vmul.f32 %v392_v46, %v3474_v23 }
  0xe8   : > { %v808_v57 = vmul.f32 %v2924_v4, %v807_v54  ;;  %v452_v61 = vmul.f32 %v3520_v45, %v451_v52  ;;  %vm454_vm14 = vcmp.eq.f32.partialorder %v3486_v16, inf  ;;  %v838_v60 = vmul.f32 %v2925_v59, %v837_v50  ;;  %v3668_v4 = vpop.xlane.xlu0 %215 }
  0xe9   : > { %v823_v62 = vmul.f32 %v2926_v49, %v822_v15  ;;  %v436_v47 = vmul.f32 %v2695_v31, %v3552_v21  ;;  %2700 = vrsqrt.f32 %v3590_v3  ;;  %v3600_v48 = vpop.eup %2696  ;;  %v870_v43 = vmul.f32 %v3587_v38, %v3534_v55 }
  0xea   : > { %v1147_v5 = vadd.f32 %v1146_v20, %v808_v57  ;;  %v395_v45 = vsel %vm394_vm12, %v3474_v23, %v393_v41  ;;  %v453_v12 = vmul.f32 %v452_v61, %v3486_v16  ;;  %vm456_vm15 = vcmp.eq.f32.partialorder %v3486_v16, 0.0 }
  0xeb   : > { %v398_v13 = vsel %vm396_vm13, %v397_v1, %v395_v45  ;;  %v457_v14 = vand.u32 2147483648, %v3486_v16  ;;  %v437_v2 = vmul.f32 %v2695_v31, %v436_v47  ;;  %v424_v63 = vmul.f32 %v3600_v48, %v3565_v53 }
  0xec   : > { %v3612_v35 = vpop.eup %2698  ;;  %v1148_v51 = vadd.f32 %v1147_v5, %v823_v62  ;;  %v3614_v9 = vmax.f32 %v398_v13, 1e-12  ;;  %v455_v11 = vsel %vm454_vm14, %v3486_v16, %v453_v12  ;;  %v880_v23 = vand.u32 2147483648, %v3534_v55 }
  0xed   : > { %v855_v39 = vmul.f32 %v3612_v35, %v3582_v44  ;;  %v458_v42 = vsel %vm456_vm15, %v457_v14, %v455_v11  ;;  %v438_v24 = vmul.f32 0.5, %v437_v2  ;;  %v871_v17 = vsub.f32 1.0, %v870_v43 }
  0xee   : > { %v3624_v19 = vadd.f32 %v1148_v51, %v838_v60  ;;  %2702 = vrcp.f32 %v3614_v9  ;;  %v878_v20 = vand.u32 2147483647, %v3534_v55  ;;  %vm874_vm0 = vweird.f32 %v3534_v55 }
  0xef   : > { %v2701_v34 = vpop.eup %2700  ;;  %v856_v8 = vsub.f32 1.0, %v855_v39  ;;  %v3629_v16 = vmax.f32 %v458_v42, 1e-12  ;;  %v439_v58 = vsub.f32 1.5, %v438_v24  ;;  %vm442_vm1 = vcmp.eq.f32.partialorder %v3552_v21, inf  ;;  %v2927_v42 = vld [vmem:[#allocation2 + $0x60] sm:$0xff] }
  0xf0   : > { %v425_v25 = vmul.f32 %v3600_v48, %v424_v63  ;;  %v3633_v56 = vor.u32 1.1754944e-38, %v880_v23  ;;  %v863_v26 = vand.u32 2147483647, %v3582_v44  ;;  %v865_v27 = vand.u32 2147483648, %v3582_v44 }
  0xf1   : > { %v484_v40 = vmul.f32 %v2701_v34, %v3590_v3  ;;  %v872_v28 = vmul.f32 %v3587_v38, %v871_v17  ;;  %v857_v29 = vmul.f32 %v3612_v35, %v856_v8  ;;  %vm444_vm2 = vcmp.eq.f32.partialorder %v3552_v21, 0.0 }
  0xf2   : > { %v445_v30 = vand.u32 2147483648, %v3552_v21  ;;  %2704 = vrcp.f32 %v3629_v16  ;;  %v440_v32 = vmul.f32 %v2695_v31, %v439_v58  ;;  %v426_v33 = vmul.f32 0.5, %v425_v25 }
  0xf3   : > { %vm430_vm3 = vcmp.eq.f32.partialorder %v3565_v53, inf  ;;  %v485_v18 = vmul.f32 %v2701_v34, %v484_v40  ;;  %vm875_vm4 = vweird.f32 %v3587_v38  ;;  %vm859_vm5 = vweird.f32 %v3582_v44 }
  0xf4   : > { %v2703_v36 = vpop.eup %2702  ;;  %vm432_vm6 = vcmp.eq.f32.partialorder %v3565_v53, 0.0  ;;  %v433_v10 = vand.u32 2147483648, %v3565_v53  ;;  %vm3650_vm7 = vcmp.eq.f32.partialorder %v878_v20, 8.507059e+37  ;;  %vm3654_vm8 = vcmp.eq.f32.partialorder %v863_v26, 8.507059e+37  ;;  %vm3680_vm11 = vmor %vm874_vm0, %vm875_vm4 }
  0xf5   : > { %v866_v46 = vor.u32 1.1754944e-38, %v865_v27  ;;  %v840_v50 = vmul.f32 %v2703_v36, %v3614_v9  ;;  %v441_v6 = vmul.f32 %v440_v32, %v3552_v21  ;;  %v873_v52 = vadd.f32 %v3587_v38, %v872_v28 }
  0xf6   : > { %v427_v15 = vsub.f32 1.5, %v426_v33  ;;  %v486_v22 = vmul.f32 0.5, %v485_v18  ;;  %vm490_vm9 = vcmp.eq.f32.partialorder %v3590_v3, inf  ;;  %2706 = vrsqrt.f32 %v3644_v0 }
  0xf7   : > { %v858_v31 = vadd.f32 %v3612_v35, %v857_v29  ;;  %vm860_vm10 = vweird.f32 %v3612_v35  ;;  %v841_v54 = vsub.f32 1.0, %v840_v50  ;;  %v443_v1 = vsel %vm442_vm1, %v3552_v21, %v441_v6 }
  0xf8   : > { %v850_v57 = vand.u32 2147483648, %v3614_v9  ;;  %v446_v41 = vsel %vm444_vm2, %v445_v30, %v443_v1  ;;  %v428_v61 = vmul.f32 %v3600_v48, %v427_v15  ;;  %v487_v59 = vsub.f32 1.5, %v486_v22  ;;  %v3674_v60 = vpop.eup %2704  ;;  %vm3694_vm13 = vmor %vm859_vm5, %vm860_vm10  ;;  %v2929_v30 = vld [vmem:[#allocation2 + $0x70] sm:$0xff]  ;;  %v3749_v22 = vpop.xlane.xlu2 %225 }
  0xf9   : > { %v842_v62 = vmul.f32 %v2703_v36, %v841_v54  ;;  %vm845_vm12 = vweird.f32 %v2703_v36  ;;  %v848_v47 = vand.u32 2147483647, %v3614_v9  ;;  %v3685_v5 = vmax.f32 %v446_v41, 1e-12 }
  0xfa   : > { %v877_v21 = vsel %vm3680_vm11, %v3587_v38, %v873_v52  ;;  %v429_v48 = vmul.f32 %v428_v61, %v3565_v53  ;;  %v488_v43 = vmul.f32 %v2701_v34, %v487_v59  ;;  %2708 = vrsqrt.f32 %v3668_v4 }
  0xfb   : > { %v862_v45 = vsel %vm3694_vm13, %v3612_v35, %v858_v31  ;;  %v843_v12 = vadd.f32 %v2703_v36, %v842_v62  ;;  %vm844_vm14 = vweird.f32 %v3614_v9  ;;  %2710 = vrcp.f32 %v3685_v5 }
  0xfc   : > { %v2707_v38 = vpop.eup %2706  ;;  %vm846_vm15 = vmor %vm844_vm14, %vm845_vm12  ;;  %v851_v44 = vor.u32 1.1754944e-38, %v850_v57  ;;  %v915_v13 = vmul.f32 %v3674_v60, %v3629_v16  ;;  %v431_v14 = vsel %vm430_vm3, %v3565_v53, %v429_v48  ;;  %v489_v2 = vmul.f32 %v488_v43, %v3590_v3 }
  0xfd   : > { %v847_v51 = vsel %vm846_vm15, %v2703_v36, %v843_v12  ;;  %vm849_vm0 = vcmp.eq.f32.partialorder %v848_v47, 8.507059e+37  ;;  %v434_v35 = vsel %vm432_vm6, %v433_v10, %v431_v14  ;;  %v472_v9 = vmul.f32 %v2707_v38, %v3644_v0 }
  0xfe   : > { %v882_v11 = vsel %vm3650_vm7, %v3633_v56, %v877_v21  ;;  %v867_v63 = vsel %vm3654_vm8, %v866_v46, %v862_v45  ;;  %v852_v23 = vsel %vm849_vm0, %v851_v44, %v847_v51  ;;  %v3719_v39 = vmax.f32 %v434_v35, 1e-12  ;;  %v2928_v56 = vld [vmem:[#allocation2 + $0x68] sm:$0xff]  ;;  %v3770_v45 = vpop.xlane.xlu1 %223 }
  0xff   : > { %v853_v24 = vmul.f32 %v2927_v42, %v852_v23  ;;  %v491_v17 = vsel %vm490_vm9, %v3590_v3, %v489_v2  ;;  %v493_v53 = vand.u32 2147483648, %v3590_v3  ;;  %v473_v34 = vmul.f32 %v2707_v38, %v472_v9 }
 0x100   : > { %v3725_v20 = vpop.eup %2708  ;;  %v916_v8 = vsub.f32 1.0, %v915_v13  ;;  %v925_v58 = vand.u32 2147483648, %v3629_v16  ;;  %2712 = vrcp.f32 %v3719_v39  ;;  %vm492_vm1 = vcmp.eq.f32.partialorder %v3590_v3, 0.0 }
 0x101   : > { %v3730_v25 = vpop.eup %2710  ;;  %v868_v26 = vmul.f32 %v2928_v56, %v867_v63  ;;  %v1150_v27 = vadd.f32 %v3624_v19, %v853_v24  ;;  %v494_v40 = vsel %vm492_vm1, %v493_v53, %v491_v17  ;;  %v474_v28 = vmul.f32 0.5, %v473_v34  ;;  %v3808_v24 = vpop.xlane.xlu0 %221 }
 0x102   : > { %v900_v29 = vmul.f32 %v3730_v25, %v3685_v5  ;;  %v883_v32 = vmul.f32 %v2929_v30, %v882_v11  ;;  %v923_v18 = vand.u32 2147483647, %v3629_v16  ;;  %v3736_v36 = vmax.f32 %v494_v40, 1e-12 }
 0x103   : > { %v1151_v33 = vadd.f32 %v1150_v27, %v868_v26  ;;  %v917_v3 = vmul.f32 %v3674_v60, %v916_v8  ;;  %vm919_vm2 = vweird.f32 %v3629_v16  ;;  %v475_v7 = vsub.f32 1.5, %v474_v28  ;;  %v2930_v8 = vld [vmem:[#allocation2 + $0x78] sm:$0xff]  ;;  %v2931_v28 = vld [vmem:[#allocation2 + $0x80] sm:$0xff] }
 0x104   : > { %v901_v10 = vsub.f32 1.0, %v900_v29  ;;  %v460_v19 = vmul.f32 %v3725_v20, %v3668_v4  ;;  %v926_v37 = vor.u32 1.1754944e-38, %v925_v58  ;;  %vm478_vm3 = vcmp.eq.f32.partialorder %v3644_v0, inf }
 0x105   : > { %v3742_v46 = vadd.f32 %v1151_v33, %v883_v32  ;;  %vm480_vm4 = vcmp.eq.f32.partialorder %v3644_v0, 0.0  ;;  %vm920_vm5 = vweird.f32 %v3674_v60  ;;  %v476_v52 = vmul.f32 %v2707_v38, %v475_v7 }
 0x106   : > { %v2713_v50 = vpop.eup %2712  ;;  %v902_v6 = vmul.f32 %v3730_v25, %v901_v10  ;;  %v461_v15 = vmul.f32 %v3725_v20, %v460_v19  ;;  %v908_v31 = vand.u32 2147483647, %v3685_v5  ;;  %2714 = vrcp.f32 %v3736_v36  ;;  %vm3792_vm13 = vmor %vm919_vm2, %vm920_vm5 }
 0x107   : > { %v885_v54 = vmul.f32 %v2713_v50, %v3719_v39  ;;  %v481_v1 = vand.u32 2147483648, %v3644_v0  ;;  %v918_v57 = vadd.f32 %v3674_v60, %v917_v3  ;;  %vm3756_vm6 = vcmp.eq.f32.partialorder %v923_v18, 8.507059e+37 }
 0x108   : > { %v910_v61 = vand.u32 2147483648, %v3685_v5  ;;  %v477_v59 = vmul.f32 %v476_v52, %v3644_v0  ;;  %v462_v49 = vmul.f32 0.5, %v461_v15  ;;  %v903_v62 = vadd.f32 %v3730_v25, %v902_v6  ;;  %v3830_v6 = vpop.xlane.xlu2 %231 }
 0x109   : > { %vm905_vm7 = vweird.f32 %v3730_v25  ;;  %v886_v47 = vsub.f32 1.0, %v885_v54  ;;  %2716 = vrsqrt.f32 %v3749_v22  ;;  %v893_v21 = vand.u32 2147483647, %v3719_v39 }
 0x10a   : > { %v895_v55 = vand.u32 2147483648, %v3719_v39  ;;  %v479_v48 = vsel %vm478_vm3, %v3644_v0, %v477_v59  ;;  %v463_v43 = vsub.f32 1.5, %v462_v49  ;;  %vm904_vm8 = vweird.f32 %v3685_v5 }
 0x10b   : > { %v887_v12 = vmul.f32 %v2713_v50, %v886_v47  ;;  %vm890_vm9 = vweird.f32 %v2713_v50  ;;  %v482_v38 = vsel %vm480_vm4, %v481_v1, %v479_v48  ;;  %vm3775_vm10 = vmor %vm904_vm8, %vm905_vm7  ;;  %vm3779_vm11 = vcmp.eq.f32.partialorder %v908_v31, 8.507059e+37  ;;  %v3841_v1 = vpop.xlane.xlu1 %229 }
 0x10c   : > { %v911_v14 = vor.u32 1.1754944e-38, %v910_v61  ;;  %vm889_vm12 = vweird.f32 %v3719_v39  ;;  %v3784_v2 = vmax.f32 %v482_v38, 1e-12  ;;  %v3786_v51 = vpop.eup %2714  ;;  %v907_v5 = vsel %vm3775_vm10, %v3730_v25, %v903_v62 }
 0x10d   : > { %v888_v35 = vadd.f32 %v2713_v50, %v887_v12  ;;  %v464_v9 = vmul.f32 %v3725_v20, %v463_v43  ;;  %2718 = vrsqrt.f32 %v3770_v45  ;;  %v922_v11 = vsel %vm3792_vm13, %v3674_v60, %v918_v57  ;;  %vm891_vm14 = vmor %vm889_vm12, %vm890_vm9  ;;  %v3855_v12 = vpop.xlane.xlu0 %227 }
 0x10e   : > { %vm894_vm15 = vcmp.eq.f32.partialorder %v893_v21, 8.507059e+37  ;;  %v896_v16 = vor.u32 1.1754944e-38, %v895_v55  ;;  %2720 = vrcp.f32 %v3784_v2  ;;  %vm466_vm0 = vcmp.eq.f32.partialorder %v3668_v4, inf }
 0x10f   : > { %v2717_v63 = vpop.eup %2716  ;;  %v892_v23 = vsel %vm891_vm14, %v2713_v50, %v888_v35  ;;  %v465_v39 = vmul.f32 %v464_v9, %v3668_v4  ;;  %v469_v42 = vand.u32 2147483648, %v3668_v4  ;;  %v912_v17 = vsel %vm3779_vm11, %v911_v14, %v907_v5 }
 0x110   : > { %v897_v53 = vsel %vm894_vm15, %v896_v16, %v892_v23  ;;  %v960_v60 = vmul.f32 %v3786_v51, %v3736_v36  ;;  %v520_v34 = vmul.f32 %v2717_v63, %v3749_v22  ;;  %v927_v20 = vsel %vm3756_vm6, %v926_v37, %v922_v11 }
 0x111   : > { %v898_v58 = vmul.f32 %v2930_v8, %v897_v53  ;;  %v467_v25 = vsel %vm466_vm0, %v3668_v4, %v465_v39  ;;  %vm468_vm1 = vcmp.eq.f32.partialorder %v3668_v4, 0.0  ;;  %v970_v56 = vand.u32 2147483648, %v3736_v36  ;;  %v2932_v4 = vld [vmem:[#allocation2 + $0x88] sm:$0xff] }
 0x112   : > { %v470_v26 = vsel %vm468_vm1, %v469_v42, %v467_v25  ;;  %v521_v27 = vmul.f32 %v2717_v63, %v520_v34  ;;  %2722 = vrsqrt.f32 %v3808_v24  ;;  %v913_v29 = vmul.f32 %v2931_v28, %v912_v17 }
 0x113   : > { %v2719_v40 = vpop.eup %2718  ;;  %v1153_v30 = vadd.f32 %v3742_v46, %v898_v58  ;;  %v3822_v32 = vmax.f32 %v470_v26, 1e-12  ;;  %v961_v18 = vsub.f32 1.0, %v960_v60  ;;  %v928_v7 = vmul.f32 %v2932_v4, %v927_v20 }
 0x114   : > { %v3824_v33 = vpop.eup %2720  ;;  %v522_v3 = vmul.f32 0.5, %v521_v27  ;;  %v508_v10 = vmul.f32 %v2719_v40, %v3770_v45  ;;  %v968_v37 = vand.u32 2147483647, %v3736_v36  ;;  %vm964_vm2 = vweird.f32 %v3736_v36 }
 0x115   : > { %v1154_v19 = vadd.f32 %v1153_v30, %v913_v29  ;;  %v945_v50 = vmul.f32 %v3824_v33, %v3784_v2  ;;  %v3833_v46 = vor.u32 1.1754944e-38, %v970_v56  ;;  %2724 = vrcp.f32 %v3822_v32 }
 0x116   : > { %vm526_vm3 = vcmp.eq.f32.partialorder %v3749_v22, inf  ;;  %vm528_vm4 = vcmp.eq.f32.partialorder %v3749_v22, 0.0  ;;  %v953_v15 = vand.u32 2147483647, %v3784_v2  ;;  %v523_v54 = vsub.f32 1.5, %v522_v3 }
 0x117   : > { %v946_v52 = vsub.f32 1.0, %v945_v50  ;;  %v3839_v31 = vadd.f32 %v1154_v19, %v928_v7  ;;  %v962_v41 = vmul.f32 %v3786_v51, %v961_v18  ;;  %v955_v61 = vand.u32 2147483648, %v3784_v2 }
 0x118   : > { %v2723_v57 = vpop.eup %2722  ;;  %v509_v59 = vmul.f32 %v2719_v40, %v508_v10  ;;  %2726 = vrsqrt.f32 %v3830_v6  ;;  %v524_v62 = vmul.f32 %v2717_v63, %v523_v54  ;;  %v529_v47 = vand.u32 2147483648, %v3749_v22 }
 0x119   : > { %v947_v49 = vmul.f32 %v3824_v33, %v946_v52  ;;  %v496_v21 = vmul.f32 %v2723_v57, %v3808_v24  ;;  %vm965_vm5 = vweird.f32 %v3786_v51  ;;  %vm514_vm6 = vcmp.eq.f32.partialorder %v3770_v45, inf }
 0x11a   : > { %v510_v55 = vmul.f32 0.5, %v509_v59  ;;  %2728 = vrsqrt.f32 %v3841_v1  ;;  %vm949_vm7 = vweird.f32 %v3784_v2  ;;  %v525_v48 = vmul.f32 %v524_v62, %v3749_v22  ;;  %vm3881_vm13 = vmor %vm964_vm2, %vm965_vm5  ;;  %v3937_v59 = vpop.xlane.xlu2 %237 }
 0x11b   : > { %vm516_vm8 = vcmp.eq.f32.partialorder %v3770_v45, 0.0  ;;  %v497_v43 = vmul.f32 %v2723_v57, %v496_v21  ;;  %v2725_v38 = vpop.eup %2724  ;;  %v963_v44 = vadd.f32 %v3786_v51, %v962_v41  ;;  %vm3858_vm9 = vcmp.eq.f32.partialorder %v953_v15, 8.507059e+37  ;;  %v2933_v15 = vld [vmem:[#allocation2 + $0x90] sm:$0xff] }
 0x11c   : > { %v956_v14 = vor.u32 1.1754944e-38, %v955_v61  ;;  %v511_v0 = vsub.f32 1.5, %v510_v55  ;;  %v517_v5 = vand.u32 2147483648, %v3770_v45  ;;  %vm3863_vm10 = vcmp.eq.f32.partialorder %v968_v37, 8.507059e+37 }
 0x11d   : > { %v948_v9 = vadd.f32 %v3824_v33, %v947_v49  ;;  %vm950_vm11 = vweird.f32 %v3824_v33  ;;  %v930_v11 = vmul.f32 %v2725_v38, %v3822_v32  ;;  %v527_v16 = vsel %vm526_vm3, %v3749_v22, %v525_v48 }
 0x11e   : > { %v2727_v63 = vpop.eup %2726  ;;  %v530_v23 = vsel %vm528_vm4, %v529_v47, %v527_v16  ;;  %v512_v39 = vmul.f32 %v2719_v40, %v511_v0  ;;  %v498_v42 = vmul.f32 0.5, %v497_v43  ;;  %vm502_vm12 = vcmp.eq.f32.partialorder %v3808_v24, inf  ;;  %vm3900_vm15 = vmor %vm949_vm7, %vm950_vm11  ;;  %v2935_v43 = vld [vmem:[#allocation2 + $0xa0] sm:$0xff] }
 0x11f   : > { %2730 = vrsqrt.f32 %v3855_v12  ;;  %v931_v53 = vsub.f32 1.0, %v930_v11  ;;  %v3885_v60 = vmax.f32 %v530_v23, 1e-12  ;;  %vm504_vm14 = vcmp.eq.f32.partialorder %v3808_v24, 0.0 }
 0x120   : > { %v556_v22 = vmul.f32 %v2727_v63, %v3830_v6  ;;  %v3889_v34 = vpop.eup %2728  ;;  %v967_v20 = vsel %vm3881_vm13, %v3786_v51, %v963_v44  ;;  %v940_v8 = vand.u32 2147483648, %v3822_v32  ;;  %v513_v36 = vmul.f32 %v512_v39, %v3770_v45 }
 0x121   : > { %v499_v58 = vsub.f32 1.5, %v498_v42  ;;  %v932_v56 = vmul.f32 %v2725_v38, %v931_v53  ;;  %vm935_vm0 = vweird.f32 %v2725_v38  ;;  %v938_v26 = vand.u32 2147483647, %v3822_v32 }
 0x122   : > { %2732 = vrcp.f32 %v3885_v60  ;;  %v952_v51 = vsel %vm3900_vm15, %v3824_v33, %v948_v9  ;;  %v515_v27 = vsel %vm514_vm6, %v3770_v45, %v513_v36  ;;  %v557_v2 = vmul.f32 %v2727_v63, %v556_v22 }
 0x123   : > { %v500_v40 = vmul.f32 %v2723_v57, %v499_v58  ;;  %v933_v28 = vadd.f32 %v2725_v38, %v932_v56  ;;  %vm934_vm1 = vweird.f32 %v3822_v32  ;;  %v518_v29 = vsel %vm516_vm8, %v517_v5, %v515_v27 }
 0x124   : > { %v544_v30 = vmul.f32 %v3889_v34, %v3841_v1  ;;  %vm936_vm2 = vmor %vm934_vm1, %vm935_vm0  ;;  %v941_v3 = vor.u32 1.1754944e-38, %v940_v8  ;;  %v3919_v33 = vmax.f32 %v518_v29, 1e-12  ;;  %v558_v4 = vmul.f32 0.5, %v557_v2 }
 0x125   : > { %v3917_v18 = vpop.eup %2730  ;;  %v501_v10 = vmul.f32 %v500_v40, %v3808_v24  ;;  %v957_v7 = vsel %vm3858_vm9, %v956_v14, %v952_v51  ;;  %v937_v19 = vsel %vm936_vm2, %v2725_v38, %v933_v28  ;;  %vm939_vm3 = vcmp.eq.f32.partialorder %v938_v26, 8.507059e+37 }
 0x126   : > { %v505_v45 = vand.u32 2147483648, %v3808_v24  ;;  %v972_v32 = vsel %vm3863_vm10, %v3833_v46, %v967_v20  ;;  %v942_v37 = vsel %vm939_vm3, %v941_v3, %v937_v19  ;;  %2734 = vrcp.f32 %v3919_v33  ;;  %v2934_v46 = vld [vmem:[#allocation2 + $0x98] sm:$0xff] }
 0x127   : > { %v545_v50 = vmul.f32 %v3889_v34, %v544_v30  ;;  %v943_v54 = vmul.f32 %v2933_v15, %v942_v37  ;;  %v503_v57 = vsel %vm502_vm12, %v3808_v24, %v501_v10  ;;  %v559_v41 = vsub.f32 1.5, %v558_v4  ;;  %v3995_v4 = vpop.xlane.xlu1 %235 }
 0x128   : > { %v3930_v52 = vpop.eup %2732  ;;  %v532_v61 = vmul.f32 %v3917_v18, %v3855_v12  ;;  %v958_v49 = vmul.f32 %v2934_v46, %v957_v7  ;;  %v506_v62 = vsel %vm504_vm14, %v505_v45, %v503_v57  ;;  %v973_v38 = vmul.f32 %v2935_v43, %v972_v32 }
 0x129   : > { %v1156_v47 = vadd.f32 %v3839_v31, %v943_v54  ;;  %v1005_v21 = vmul.f32 %v3930_v52, %v3885_v60  ;;  %v3944_v55 = vmax.f32 %v506_v62, 1e-12  ;;  %v560_v48 = vmul.f32 %v2727_v63, %v559_v41 }
 0x12a   : > { %vm562_vm4 = vcmp.eq.f32.partialorder %v3830_v6, inf  ;;  %v546_v44 = vmul.f32 0.5, %v545_v50  ;;  %2736 = vrsqrt.f32 %v3937_v59  ;;  %vm564_vm5 = vcmp.eq.f32.partialorder %v3830_v6, 0.0 }
 0x12b   : > { %v1157_v13 = vadd.f32 %v1156_v47, %v958_v49  ;;  %2738 = vrcp.f32 %v3944_v55  ;;  %v533_v24 = vmul.f32 %v3917_v18, %v532_v61  ;;  %v1015_v14 = vand.u32 2147483648, %v3885_v60 }
 0x12c   : > { %v3951_v31 = vpop.eup %2734  ;;  %v561_v0 = vmul.f32 %v560_v48, %v3830_v6  ;;  %v565_v5 = vand.u32 2147483648, %v3830_v6  ;;  %v547_v35 = vsub.f32 1.5, %v546_v44  ;;  %v1006_v9 = vsub.f32 1.0, %v1005_v21 }
 0x12d   : > { %v990_v11 = vmul.f32 %v3951_v31, %v3919_v33  ;;  %v3958_v16 = vadd.f32 %v1157_v13, %v973_v38  ;;  %vm550_vm6 = vcmp.eq.f32.partialorder %v3841_v1, inf  ;;  %vm552_vm7 = vcmp.eq.f32.partialorder %v3841_v1, 0.0 }
 0x12e   : > { %v563_v63 = vsel %vm562_vm4, %v3830_v6, %v561_v0  ;;  %v548_v23 = vmul.f32 %v3889_v34, %v547_v35  ;;  %v553_v39 = vand.u32 2147483648, %v3841_v1  ;;  %v1013_v42 = vand.u32 2147483647, %v3885_v60 }
 0x12f   : > { %v991_v17 = vsub.f32 1.0, %v990_v11  ;;  %v566_v53 = vsel %vm564_vm5, %v565_v5, %v563_v63  ;;  %v534_v22 = vmul.f32 0.5, %v533_v24  ;;  %vm1009_vm8 = vweird.f32 %v3885_v60  ;;  %v2936_v24 = vld [vmem:[#allocation2 + $0xa8] sm:$0xff]  ;;  %v2937_v5 = vld [vmem:[#allocation2 + $0xb0] sm:$0xff] }
 0x130   : > { %v2737_v20 = vpop.eup %2736  ;;  %v1016_v8 = vor.u32 1.1754944e-38, %v1015_v14  ;;  %v3971_v36 = vmax.f32 %v566_v53, 1e-12  ;;  %v549_v58 = vmul.f32 %v548_v23, %v3841_v1  ;;  %vm538_vm9 = vcmp.eq.f32.partialorder %v3855_v12, inf  ;;  %v2938_v23 = vld [vmem:[#allocation2 + $0xb8] sm:$0xff] }
 0x131   : > { %v2739_v34 = vpop.eup %2738  ;;  %v1007_v25 = vmul.f32 %v3930_v52, %v1006_v9  ;;  %v992_v56 = vmul.f32 %v3951_v31, %v991_v17  ;;  %v535_v26 = vsub.f32 1.5, %v534_v22  ;;  %vm540_vm10 = vcmp.eq.f32.partialorder %v3855_v12, 0.0  ;;  %v4062_v22 = vpop.xlane.xlu0 %233 }
 0x132   : > { %v592_v6 = vmul.f32 %v2737_v20, %v3937_v59  ;;  %vm994_vm11 = vweird.f32 %v3919_v33  ;;  %v998_v51 = vand.u32 2147483647, %v3919_v33  ;;  %v975_v27 = vmul.f32 %v2739_v34, %v3944_v55 }
 0x133   : > { %2740 = vrcp.f32 %v3971_v36  ;;  %vm1010_vm12 = vweird.f32 %v3930_v52  ;;  %vm3984_vm13 = vcmp.eq.f32.partialorder %v1013_v42, 8.507059e+37  ;;  %v993_v2 = vadd.f32 %v3951_v31, %v992_v56 }
 0x134   : > { %vm995_vm14 = vweird.f32 %v3951_v31  ;;  %v1000_v28 = vand.u32 2147483648, %v3919_v33  ;;  %v976_v29 = vsub.f32 1.0, %v975_v27  ;;  %v551_v30 = vsel %vm550_vm6, %v3841_v1, %v549_v58  ;;  %vm4025_vm2 = vmor %vm1009_vm8, %vm1010_vm12 }
 0x135   : > { %v536_v3 = vmul.f32 %v3917_v18, %v535_v26  ;;  %v593_v10 = vmul.f32 %v2737_v20, %v592_v6  ;;  %v1008_v7 = vadd.f32 %v3930_v52, %v1007_v25  ;;  %v983_v19 = vand.u32 2147483647, %v3944_v55  ;;  %vm4009_vm0 = vmor %vm994_vm11, %vm995_vm14 }
 0x136   : > { %v985_v45 = vand.u32 2147483648, %v3944_v55  ;;  %v554_v32 = vsel %vm552_vm7, %v553_v39, %v551_v30  ;;  %v977_v37 = vmul.f32 %v2739_v34, %v976_v29  ;;  %vm980_vm15 = vweird.f32 %v2739_v34  ;;  %v4080_v29 = vpop.xlane.xlu2 %1210 }
 0x137   : > { %v4002_v50 = vmax.f32 %v554_v32, 1e-12  ;;  %v537_v15 = vmul.f32 %v536_v3, %v3855_v12  ;;  %vm4013_vm1 = vcmp.eq.f32.partialorder %v998_v51, 8.507059e+37  ;;  %v541_v1 = vand.u32 2147483648, %v3855_v12 }
 0x138   : > { %v594_v57 = vmul.f32 0.5, %v593_v10  ;;  %2742 = vrsqrt.f32 %v3995_v4  ;;  %v997_v61 = vsel %vm4009_vm0, %v3951_v31, %v993_v2  ;;  %v978_v46 = vadd.f32 %v2739_v34, %v977_v37  ;;  %v4098_v37 = vpop.xlane.xlu1 %241 }
 0x139   : > { %v4019_v41 = vpop.eup %2740  ;;  %vm979_vm3 = vweird.f32 %v3944_v55  ;;  %2744 = vrcp.f32 %v4002_v50  ;;  %v1012_v49 = vsel %vm4025_vm2, %v3930_v52, %v1008_v7  ;;  %v1001_v62 = vor.u32 1.1754944e-38, %v1000_v28 }
 0x13a   : > { %vm981_vm4 = vmor %vm979_vm3, %vm980_vm15  ;;  %v986_v60 = vor.u32 1.1754944e-38, %v985_v45  ;;  %v539_v47 = vsel %vm538_vm9, %v3855_v12, %v537_v15  ;;  %vm984_vm5 = vcmp.eq.f32.partialorder %v983_v19, 8.507059e+37  ;;  %v595_v55 = vsub.f32 1.5, %v594_v57 }
 0x13b   : > { %v982_v21 = vsel %vm981_vm4, %v2739_v34, %v978_v46  ;;  %v542_v48 = vsel %vm540_vm10, %v541_v1, %v539_v47  ;;  %v1002_v43 = vsel %vm4013_vm1, %v1001_v62, %v997_v61  ;;  %v1050_v52 = vmul.f32 %v4019_v41, %v3971_v36  ;;  %v4114_v62 = vpop.xlane.xlu0 %239 }
 0x13c   : > { %v987_v38 = vsel %vm984_vm5, %v986_v60, %v982_v21  ;;  %v4047_v44 = vmax.f32 %v542_v48, 1e-12  ;;  %v1017_v13 = vsel %vm3984_vm13, %v1016_v8, %v1012_v49  ;;  %v596_v14 = vmul.f32 %v2737_v20, %v595_v55 }
 0x13d   : > { %v988_v31 = vmul.f32 %v2936_v24, %v987_v38  ;;  %vm598_vm6 = vcmp.eq.f32.partialorder %v3937_v59, inf  ;;  %vm600_vm7 = vcmp.eq.f32.partialorder %v3937_v59, 0.0  ;;  %v1003_v35 = vmul.f32 %v2937_v5, %v1002_v43  ;;  %v2939_v5 = vld [vmem:[#allocation2 + $0xc0] sm:$0xff] }
 0x13e   : > { %v2743_v0 = vpop.eup %2742  ;;  %2746 = vrcp.f32 %v4047_v44  ;;  %v597_v11 = vmul.f32 %v596_v14, %v3937_v59  ;;  %v1018_v39 = vmul.f32 %v2938_v23, %v1017_v13  ;;  %v1051_v42 = vsub.f32 1.0, %v1050_v52 }
 0x13f   : > { %v4054_v12 = vpop.eup %2744  ;;  %v1159_v9 = vadd.f32 %v3958_v16, %v988_v31  ;;  %v580_v63 = vmul.f32 %v2743_v0, %v3995_v4  ;;  %v601_v53 = vand.u32 2147483648, %v3937_v59  ;;  %v1060_v8 = vand.u32 2147483648, %v3971_v36 }
 0x140   : > { %v1035_v17 = vmul.f32 %v4054_v12, %v4002_v50  ;;  %v599_v16 = vsel %vm598_vm6, %v3937_v59, %v597_v11  ;;  %v1058_v34 = vand.u32 2147483647, %v3971_v36  ;;  %v1043_v56 = vand.u32 2147483647, %v4002_v50 }
 0x141   : > { %v1160_v20 = vadd.f32 %v1159_v9, %v1003_v35  ;;  %v581_v58 = vmul.f32 %v2743_v0, %v580_v63  ;;  %v602_v26 = vsel %vm600_vm7, %v601_v53, %v599_v16  ;;  %v1052_v2 = vmul.f32 %v4019_v41, %v1051_v42  ;;  %v2940_v63 = vld [vmem:[#allocation2 + $0xc8] sm:$0xff]  ;;  %v4156_v53 = vpop.xlane.xlu2 %1216 }
 0x142   : > { %v1036_v25 = vsub.f32 1.0, %v1035_v17  ;;  %v4074_v51 = vmax.f32 %v602_v26, 1e-12  ;;  %vm1054_vm8 = vweird.f32 %v3971_v36  ;;  %2748 = vrsqrt.f32 %v4062_v22 }
 0x143   : > { %v4072_v6 = vadd.f32 %v1160_v20, %v1018_v39  ;;  %v582_v27 = vmul.f32 0.5, %v581_v58  ;;  %v1061_v30 = vor.u32 1.1754944e-38, %v1060_v8  ;;  %vm1039_vm9 = vweird.f32 %v4002_v50  ;;  %v2941_v20 = vld [vmem:[#allocation2 + $0xd0] sm:$0xff] }
 0x144   : > { %v2747_v40 = vpop.eup %2746  ;;  %v1037_v28 = vmul.f32 %v4054_v12, %v1036_v25  ;;  %v1045_v59 = vand.u32 2147483648, %v4002_v50  ;;  %vm1055_vm10 = vweird.f32 %v4019_v41  ;;  %vm4086_vm11 = vcmp.eq.f32.partialorder %v1058_v34, 8.507059e+37 }
 0x145   : > { %v1020_v3 = vmul.f32 %v2747_v40, %v4047_v44  ;;  %vm4090_vm12 = vcmp.eq.f32.partialorder %v1043_v56, 8.507059e+37  ;;  %2750 = vrcp.f32 %v4074_v51  ;;  %v583_v19 = vsub.f32 1.5, %v582_v27  ;;  %vm4120_vm3 = vmor %vm1054_vm8, %vm1055_vm10 }
 0x146   : > { %v1038_v45 = vadd.f32 %v4054_v12, %v1037_v28  ;;  %vm1040_vm13 = vweird.f32 %v4054_v12  ;;  %2752 = vrsqrt.f32 %v4080_v29  ;;  %v1053_v15 = vadd.f32 %v4019_v41, %v1052_v2 }
 0x147   : > { %v1021_v32 = vsub.f32 1.0, %v1020_v3  ;;  %v1028_v18 = vand.u32 2147483647, %v4047_v44  ;;  %v1030_v54 = vand.u32 2147483648, %v4047_v44  ;;  %v584_v1 = vmul.f32 %v2743_v0, %v583_v19  ;;  %vm4106_vm0 = vmor %vm1039_vm9, %vm1040_vm13 }
 0x148   : > { %v1046_v57 = vor.u32 1.1754944e-38, %v1045_v59  ;;  %vm1025_vm14 = vweird.f32 %v2747_v40  ;;  %vm586_vm15 = vcmp.eq.f32.partialorder %v3995_v4, inf  ;;  %v2749_v61 = vpop.eup %2748  ;;  %vm1024_vm1 = vweird.f32 %v4047_v44 }
 0x149   : > { %v1022_v33 = vmul.f32 %v2747_v40, %v1021_v32  ;;  %v585_v49 = vmul.f32 %v584_v1, %v3995_v4  ;;  %vm588_vm2 = vcmp.eq.f32.partialorder %v3995_v4, 0.0  ;;  %2754 = vrsqrt.f32 %v4098_v37  ;;  %vm1026_vm4 = vmor %vm1024_vm1, %vm1025_vm14 }
 0x14a   : > { %v1042_v60 = vsel %vm4106_vm0, %v4054_v12, %v1038_v45  ;;  %v589_v21 = vand.u32 2147483648, %v3995_v4  ;;  %v568_v48 = vmul.f32 %v2749_v61, %v4062_v22  ;;  %v1057_v43 = vsel %vm4120_vm3, %v4019_v41, %v1053_v15 }
 0x14b   : > { %v1023_v47 = vadd.f32 %v2747_v40, %v1022_v33  ;;  %v4129_v55 = vpop.eup %2750  ;;  %vm1029_vm5 = vcmp.eq.f32.partialorder %v1028_v18, 8.507059e+37  ;;  %v1031_v36 = vor.u32 1.1754944e-38, %v1030_v54  ;;  %v587_v38 = vsel %vm586_vm15, %v3995_v4, %v585_v49  ;;  %v4178_v18 = vpop.xlane.xlu1 %1214 }
 0x14c   : > { %v4138_v52 = vpop.eup %2752  ;;  %v590_v13 = vsel %vm588_vm2, %v589_v21, %v587_v38  ;;  %v569_v24 = vmul.f32 %v2749_v61, %v568_v48  ;;  %2756 = vrsqrt.f32 %v4114_v62  ;;  %v1047_v41 = vsel %vm4090_vm12, %v1046_v57, %v1042_v60 }
 0x14d   : > { %v1027_v44 = vsel %vm1026_vm4, %v2747_v40, %v1023_v47  ;;  %v4145_v14 = vmax.f32 %v590_v13, 1e-12  ;;  %v1243_v0 = vmul.f32 %v4138_v52, %v4080_v29  ;;  %v1062_v12 = vsel %vm4086_vm11, %v1061_v30, %v1057_v43 }
 0x14e   : > { %v1032_v31 = vsel %vm1029_vm5, %v1031_v36, %v1027_v44  ;;  %v1095_v4 = vmul.f32 %v4129_v55, %v4074_v51  ;;  %v570_v9 = vmul.f32 0.5, %v569_v24  ;;  %v1048_v23 = vmul.f32 %v2940_v63, %v1047_v41 }
 0x14f   : > { %v1033_v35 = vmul.f32 %v2939_v5, %v1032_v31  ;;  %v2755_v11 = vpop.eup %2754  ;;  %2758 = vrcp.f32 %v4145_v14  ;;  %v1244_v17 = vmul.f32 %v4138_v52, %v1243_v0  ;;  %v1063_v8 = vmul.f32 %v2941_v20, %v1062_v12 }
 0x150   : > { %v571_v42 = vsub.f32 1.5, %v570_v9  ;;  %vm574_vm6 = vcmp.eq.f32.partialorder %v4062_v22, inf  ;;  %v616_v16 = vmul.f32 %v2755_v11, %v4098_v37  ;;  %v1096_v25 = vsub.f32 1.0, %v1095_v4 }
 0x151   : > { %v1162_v39 = vadd.f32 %v4072_v6, %v1033_v35  ;;  %v1245_v26 = vmul.f32 0.5, %v1244_v17  ;;  %v1105_v27 = vand.u32 2147483648, %v4074_v51  ;;  %2760 = vrsqrt.f32 %v4156_v53  ;;  %v4232_v17 = vpop.xlane.xlu0 %1212 }
 0x152   : > { %v2757_v58 = vpop.eup %2756  ;;  %v572_v56 = vmul.f32 %v2749_v61, %v571_v42  ;;  %v617_v40 = vmul.f32 %v2755_v11, %v616_v16  ;;  %vm1099_vm7 = vweird.f32 %v4074_v51  ;;  %v1103_v2 = vand.u32 2147483647, %v4074_v51 }
 0x153   : > { %v1163_v34 = vadd.f32 %v1162_v39, %v1048_v23  ;;  %v604_v6 = vmul.f32 %v2757_v58, %v4114_v62  ;;  %vm576_vm8 = vcmp.eq.f32.partialorder %v4062_v22, 0.0  ;;  %v577_v3 = vand.u32 2147483648, %v4062_v22 }
 0x154   : > { %v573_v30 = vmul.f32 %v572_v56, %v4062_v22  ;;  %v618_v10 = vmul.f32 0.5, %v617_v40  ;;  %v1097_v19 = vmul.f32 %v4129_v55, %v1096_v25  ;;  %v1246_v15 = vsub.f32 1.5, %v1245_v26 }
 0x155   : > { %v4165_v28 = vadd.f32 %v1163_v34, %v1063_v8  ;;  %v4168_v59 = vpop.eup %2758  ;;  %v605_v7 = vmul.f32 %v2757_v58, %v604_v6  ;;  %v1106_v54 = vor.u32 1.1754944e-38, %v1105_v27  ;;  %vm4180_vm9 = vcmp.eq.f32.partialorder %v1103_v2, 8.507059e+37 }
 0x156   : > { %v1080_v45 = vmul.f32 %v4168_v59, %v4145_v14  ;;  %v575_v32 = vsel %vm574_vm6, %v4062_v22, %v573_v30  ;;  %v619_v57 = vsub.f32 1.5, %v618_v10  ;;  %v1252_v50 = vand.u32 2147483648, %v4080_v29 }
 0x157   : > { %v578_v1 = vsel %vm576_vm8, %v577_v3, %v575_v32  ;;  %v606_v33 = vmul.f32 0.5, %v605_v7  ;;  %vm622_vm10 = vcmp.eq.f32.partialorder %v4098_v37, inf  ;;  %v2761_v60 = vpop.eup %2760  ;;  %vm1249_vm11 = vcmp.eq.f32.partialorder %v4080_v29, inf  ;;  %v4263_v7 = vpop.xlane.xlu2 %1222 }
 0x158   : > { %v1081_v46 = vsub.f32 1.0, %v1080_v45  ;;  %v4184_v49 = vmax.f32 %v578_v1, 1e-12  ;;  %v620_v22 = vmul.f32 %v2755_v11, %v619_v57  ;;  %vm624_vm12 = vcmp.eq.f32.partialorder %v4098_v37, 0.0 }
 0x159   : > { %v607_v47 = vsub.f32 1.5, %v606_v33  ;;  %2762 = vrsqrt.f32 %v4178_v18  ;;  %v1098_v21 = vadd.f32 %v4129_v55, %v1097_v19  ;;  %vm1100_vm13 = vweird.f32 %v4129_v55 }
 0x15a   : > { %2764 = vrcp.f32 %v4184_v49  ;;  %v1247_v48 = vmul.f32 %v4138_v52, %v1246_v15  ;;  %v1082_v43 = vmul.f32 %v4168_v59, %v1081_v46  ;;  %v621_v36 = vmul.f32 %v620_v22, %v4098_v37  ;;  %vm4204_vm1 = vmor %vm1099_vm7, %vm1100_vm13 }
 0x15b   : > { %v625_v38 = vand.u32 2147483648, %v4098_v37  ;;  %v608_v44 = vmul.f32 %v2757_v58, %v607_v47  ;;  %vm1084_vm14 = vweird.f32 %v4145_v14  ;;  %vm610_vm15 = vcmp.eq.f32.partialorder %v4114_v62, inf }
 0x15c   : > { %vm612_vm0 = vcmp.eq.f32.partialorder %v4114_v62, 0.0  ;;  %v1279_v13 = vmul.f32 %v2761_v60, %v4156_v53  ;;  %v1088_v52 = vand.u32 2147483647, %v4145_v14  ;;  %vm1251_vm2 = vcmp.eq.f32.partialorder %v4080_v29, 0.0 }
 0x15d   : > { %v623_v41 = vsel %vm622_vm10, %v4098_v37, %v621_v36  ;;  %v609_v31 = vmul.f32 %v608_v44, %v4114_v62  ;;  %v613_v0 = vand.u32 2147483648, %v4114_v62  ;;  %v1102_v51 = vsel %vm4204_vm1, %v4129_v55, %v1098_v21  ;;  %v2944_v44 = vld [vmem:[#allocation2 + $0xd8] sm:$0xff] }
 0x15e   : > { %v1248_v12 = vmul.f32 %v1247_v48, %v4080_v29  ;;  %v626_v5 = vsel %vm624_vm12, %v625_v38, %v623_v41  ;;  %v1280_v35 = vmul.f32 %v2761_v60, %v1279_v13  ;;  %v1083_v9 = vadd.f32 %v4168_v59, %v1082_v43  ;;  %v4291_v38 = vpop.xlane.xlu1 %1220 }
 0x15f   : > { %v2763_v4 = vpop.eup %2762  ;;  %vm1085_vm3 = vweird.f32 %v4168_v59  ;;  %v4223_v11 = vmax.f32 %v626_v5, 1e-12  ;;  %v611_v63 = vsel %vm610_vm15, %v4114_v62, %v609_v31  ;;  %v1090_v55 = vand.u32 2147483648, %v4145_v14  ;;  %v2942_v14 = vld [vmem:[#allocation2 + $0xe8] sm:$0xff] }
 0x160   : > { %v2765_v23 = vpop.eup %2764  ;;  %v614_v39 = vsel %vm612_vm0, %v613_v0, %v611_v63  ;;  %v1281_v37 = vmul.f32 0.5, %v1280_v35  ;;  %v1267_v42 = vmul.f32 %v2763_v4, %v4178_v18  ;;  %v1107_v20 = vsel %vm4180_vm9, %v1106_v54, %v1102_v51  ;;  %vm4244_vm5 = vmor %vm1084_vm14, %vm1085_vm3 }
 0x161   : > { %vm4236_vm4 = vcmp.eq.f32.partialorder %v1088_v52, 8.507059e+37  ;;  %v1065_v16 = vmul.f32 %v2765_v23, %v4184_v49  ;;  %2766 = vrcp.f32 %v4223_v11  ;;  %v1073_v58 = vand.u32 2147483647, %v4184_v49 }
 0x162   : > { %v1250_v34 = vsel %vm1249_vm11, %v4080_v29, %v1248_v12  ;;  %v4252_v25 = vmax.f32 %v614_v39, 1e-12  ;;  %v1282_v56 = vsub.f32 1.5, %v1281_v37  ;;  %v1087_v26 = vsel %vm4244_vm5, %v4168_v59, %v1083_v9  ;;  %v4309_v9 = vpop.xlane.xlu0 %1218 }
 0x163   : > { %v1066_v27 = vsub.f32 1.0, %v1065_v16  ;;  %v1268_v40 = vmul.f32 %v2763_v4, %v1267_v42  ;;  %2768 = vrsqrt.f32 %v4232_v17  ;;  %v4258_v6 = vmul.f32 %v2942_v14, %v1107_v20 }
 0x164   : > { %v1091_v2 = vor.u32 1.1754944e-38, %v1090_v55  ;;  %v1075_v30 = vand.u32 2147483648, %v4184_v49  ;;  %2770 = vrcp.f32 %v4252_v25  ;;  %vm1070_vm6 = vweird.f32 %v2765_v23 }
 0x165   : > { %v1067_v3 = vmul.f32 %v2765_v23, %v1066_v27  ;;  %v1283_v10 = vmul.f32 %v2761_v60, %v1282_v56  ;;  %vm1285_vm7 = vcmp.eq.f32.partialorder %v4156_v53, inf  ;;  %v1253_v19 = vsel %vm1251_vm2, %v1252_v50, %v1250_v34  ;;  %v2943_v50 = vld [vmem:[#allocation2 + $0xe0] sm:$0xff]  ;;  %v4328_v56 = vpop.xlane.xlu2 %1228 }
 0x166   : > { %v1092_v59 = vsel %vm4236_vm4, %v1091_v2, %v1087_v26  ;;  %v1288_v45 = vand.u32 2147483648, %v4156_v53  ;;  %v1269_v32 = vmul.f32 0.5, %v1268_v40  ;;  %vm1069_vm8 = vweird.f32 %v4184_v49 }
 0x167   : > { %v4272_v15 = vpop.eup %2766  ;;  %v1068_v54 = vadd.f32 %v2765_v23, %v1067_v3  ;;  %vm4275_vm9 = vcmp.eq.f32.partialorder %v1073_v58, 8.507059e+37  ;;  %v1133_v57 = vand.u32 2147483647, %v4223_v11  ;;  %vm1071_vm10 = vmor %vm1069_vm8, %vm1070_vm6  ;;  %v1076_v33 = vor.u32 1.1754944e-38, %v1075_v30 }
 0x168   : > { %v1125_v29 = vmul.f32 %v4272_v15, %v4223_v11  ;;  %v1270_v61 = vsub.f32 1.5, %v1269_v32  ;;  %2772 = vrsqrt.f32 %v4263_v7  ;;  %v1093_v60 = vmul.f32 %v2943_v50, %v1092_v59  ;;  %v4342_v59 = vpop.xlane.xlu1 %1226 }
 0x169   : > { %v2769_v46 = vpop.eup %2768  ;;  %v1072_v22 = vsel %vm1071_vm10, %v2765_v23, %v1068_v54  ;;  %v4283_v47 = vmax.f32 %v1253_v19, 1e-12  ;;  %v1284_v49 = vmul.f32 %v1283_v10, %v4156_v53  ;;  %vm1287_vm11 = vcmp.eq.f32.partialorder %v4156_v53, 0.0  ;;  %v2945_v19 = vld [vmem:[#allocation2 + $0xf0] sm:$0xff]  ;;  %v2946_v54 = vld [vmem:[#allocation2 + $0xf8] sm:$0xff] }
 0x16a   : > { %vm1273_vm12 = vcmp.eq.f32.partialorder %v4178_v18, inf  ;;  %v2771_v21 = vpop.eup %2770  ;;  %v1077_v48 = vsel %vm4275_vm9, %v1076_v33, %v1072_v22  ;;  %v1126_v43 = vsub.f32 1.0, %v1125_v29  ;;  %vm1129_vm13 = vweird.f32 %v4223_v11 }
 0x16b   : > { %v1271_v36 = vmul.f32 %v2763_v4, %v1270_v61  ;;  %v1078_v13 = vmul.f32 %v2944_v44, %v1077_v48  ;;  %vm4293_vm14 = vcmp.eq.f32.partialorder %v1133_v57, 8.507059e+37  ;;  %v1135_v52 = vand.u32 2147483648, %v4223_v11 }
 0x16c   : > { %v1110_v41 = vmul.f32 %v2771_v21, %v4252_v25  ;;  %v1127_v31 = vmul.f32 %v4272_v15, %v1126_v43  ;;  %vm1130_vm15 = vweird.f32 %v4272_v15  ;;  %v1118_v0 = vand.u32 2147483647, %v4252_v25 }
 0x16d   : > { %v1255_v51 = vmul.f32 %v2769_v46, %v4232_v17  ;;  %v1165_v12 = vadd.f32 %v4165_v28, %v1078_v13  ;;  %v1120_v35 = vand.u32 2147483648, %v4252_v25  ;;  %v1286_v4 = vsel %vm1285_vm7, %v4156_v53, %v1284_v49  ;;  %vm4318_vm1 = vmor %vm1129_vm13, %vm1130_vm15 }
 0x16e   : > { %v1111_v5 = vsub.f32 1.0, %v1110_v41  ;;  %vm1275_vm0 = vcmp.eq.f32.partialorder %v4178_v18, 0.0  ;;  %v2773_v63 = vpop.eup %2772  ;;  %v1128_v23 = vadd.f32 %v4272_v15, %v1127_v31  ;;  %v1272_v55 = vmul.f32 %v1271_v36, %v4178_v18 }
 0x16f   : > { %v1256_v39 = vmul.f32 %v2769_v46, %v1255_v51  ;;  %2774 = vrsqrt.f32 %v4291_v38  ;;  %v1166_v28 = vadd.f32 %v1165_v12, %v1093_v60  ;;  %vm1115_vm2 = vweird.f32 %v2771_v21  ;;  %v4352_v60 = vpop.xlane.xlu0 %1224 }
 0x170   : > { %v1112_v42 = vmul.f32 %v2771_v21, %v1111_v5  ;;  %v1315_v20 = vmul.f32 %v2773_v63, %v4263_v7  ;;  %v1132_v8 = vsel %vm4318_vm1, %v4272_v15, %v1128_v23  ;;  %v1136_v16 = vor.u32 1.1754944e-38, %v1135_v52 }
 0x171   : > { %vm1114_vm3 = vweird.f32 %v4252_v25  ;;  %v1257_v62 = vmul.f32 0.5, %v1256_v39  ;;  %v1167_v58 = vadd.f32 %v1166_v28, %v4258_v6  ;;  %vm1119_vm4 = vcmp.eq.f32.partialorder %v1118_v0, 8.507059e+37  ;;  %v4369_v0 = vpop.xlane.xlu2 %1234 }
 0x172   : > { %v1113_v34 = vadd.f32 %v2771_v21, %v1112_v42  ;;  %v1316_v11 = vmul.f32 %v2773_v63, %v1315_v20  ;;  %vm1116_vm5 = vmor %vm1114_vm3, %vm1115_vm2  ;;  %v1121_v26 = vor.u32 1.1754944e-38, %v1120_v35  ;;  %v1289_v27 = vsel %vm1287_vm11, %v1288_v45, %v1286_v4 }
 0x173   : > { %v1274_v40 = vsel %vm1273_vm12, %v4178_v18, %v1272_v55  ;;  %v1258_v25 = vsub.f32 1.5, %v1257_v62  ;;  %v1137_v14 = vsel %vm4293_vm14, %v1136_v16, %v1132_v8  ;;  %2776 = vrsqrt.f32 %v4309_v9 }
 0x174   : > { %v1117_v6 = vsel %vm1116_vm5, %v2771_v21, %v1113_v34  ;;  %v1317_v2 = vmul.f32 0.5, %v1316_v11  ;;  %2778 = vrcp.f32 %v4283_v47  ;;  %v1276_v10 = vand.u32 2147483648, %v4178_v18  ;;  %v4390_v34 = vpop.xlane.xlu1 %1232 }
 0x175   : > { %v2775_v30 = vpop.eup %2774  ;;  %v1122_v3 = vsel %vm1119_vm4, %v1121_v26, %v1117_v6  ;;  %v1259_v53 = vmul.f32 %v2769_v46, %v1258_v25  ;;  %2780 = vrsqrt.f32 %v4328_v56  ;;  %v1138_v1 = vmul.f32 %v2946_v54, %v1137_v14 }
 0x176   : > { %v1123_v45 = vmul.f32 %v2945_v19, %v1122_v3  ;;  %v1318_v32 = vsub.f32 1.5, %v1317_v2  ;;  %v1303_v15 = vmul.f32 %v2775_v30, %v4291_v38  ;;  %v4346_v57 = vmax.f32 %v1289_v27, 1e-12 }
 0x177   : > { %v1277_v33 = vsel %vm1275_vm0, %v1276_v10, %v1274_v40  ;;  %v1260_v29 = vmul.f32 %v1259_v53, %v4232_v17  ;;  %2782 = vrsqrt.f32 %v4342_v59  ;;  %vm1261_vm6 = vcmp.eq.f32.partialorder %v4232_v17, inf }
 0x178   : > { %v1168_v61 = vadd.f32 %v1167_v58, %v1123_v45  ;;  %v1319_v46 = vmul.f32 %v2773_v63, %v1318_v32  ;;  %v1304_v50 = vmul.f32 %v2775_v30, %v1303_v15  ;;  %vm1263_vm7 = vcmp.eq.f32.partialorder %v4232_v17, 0.0 }
 0x179   : > { %v1264_v22 = vand.u32 2147483648, %v4232_v17  ;;  %vm1321_vm8 = vcmp.eq.f32.partialorder %v4263_v7, inf  ;;  %v2777_v49 = vpop.eup %2776  ;;  %v4358_v21 = vmax.f32 %v1277_v33, 1e-12  ;;  %v1262_v44 = vsel %vm1261_vm6, %v4232_v17, %v1260_v29  ;;  %v4415_v33 = vpop.xlane.xlu0 %1230 }
 0x17a   : > { %v1169_v18 = vadd.f32 %v1168_v61, %v1138_v1  ;;  %v1320_v48 = vmul.f32 %v1319_v46, %v4263_v7  ;;  %v1305_v43 = vmul.f32 0.5, %v1304_v50  ;;  %v4361_v36 = vpop.eup %2778  ;;  %vm1323_vm9 = vcmp.eq.f32.partialorder %v4263_v7, 0.0 }
 0x17b   : > { %v1291_v13 = vmul.f32 %v2777_v49, %v4309_v9  ;;  %2784 = vrsqrt.f32 %v4352_v60  ;;  %v2781_v24 = vpop.eup %2780  ;;  %v1324_v41 = vand.u32 2147483648, %v4263_v7  ;;  %vm1309_vm10 = vcmp.eq.f32.partialorder %v4291_v38, inf }
 0x17c   : > { %v1170_v52 = vrot.slane %v1169_v18, 4  ;;  %2786 = vrcp.f32 %v4346_v57  ;;  %v1306_v31 = vsub.f32 1.5, %v1305_v43  ;;  %v1322_v51 = vsel %vm1321_vm8, %v4263_v7, %v1320_v48 }
 0x17d   : > { %v1292_v12 = vmul.f32 %v2777_v49, %v1291_v13  ;;  %v1351_v5 = vmul.f32 %v2781_v24, %v4328_v56  ;;  %v2783_v35 = vpop.eup %2782  ;;  %2788 = vrcp.f32 %v4358_v21  ;;  %v1265_v4 = vsel %vm1263_vm7, %v1264_v22, %v1262_v44 }
 0x17e   : > { %v1307_v63 = vmul.f32 %v2775_v30, %v1306_v31  ;;  %v1312_v23 = vand.u32 2147483648, %v4291_v38  ;;  %vm1297_vm11 = vcmp.eq.f32.partialorder %v4309_v9, inf  ;;  %v1339_v28 = vmul.f32 %v2783_v35, %v4342_v59 }
 0x17f   : > { %v1293_v55 = vmul.f32 0.5, %v1292_v12  ;;  %v1352_v39 = vmul.f32 %v2781_v24, %v1351_v5  ;;  %2790 = vrsqrt.f32 %v4369_v0  ;;  %v1171_v37 = vadd.f32 %v1170_v52, %v1169_v18 }
 0x180   : > { %v1325_v42 = vsel %vm1323_vm9, %v1324_v41, %v1322_v51  ;;  %vm1311_vm12 = vcmp.eq.f32.partialorder %v4291_v38, 0.0  ;;  %v1300_v17 = vand.u32 2147483648, %v4309_v9  ;;  %vm1357_vm13 = vcmp.eq.f32.partialorder %v4328_v56, inf }
 0x181   : > { %v2785_v20 = vpop.eup %2784  ;;  %v1294_v8 = vsub.f32 1.5, %v1293_v55  ;;  %v1353_v16 = vmul.f32 0.5, %v1352_v39  ;;  %vm1359_vm14 = vcmp.eq.f32.partialorder %v4328_v56, 0.0  ;;  %v1360_v62 = vand.u32 2147483648, %v4328_v56 }
 0x182   : > { %v1340_v58 = vmul.f32 %v2783_v35, %v1339_v28  ;;  %v4392_v11 = vpop.eup %2786  ;;  %v4394_v7 = vmax.f32 %v1265_v4, 1e-12  ;;  %v1308_v26 = vmul.f32 %v1307_v63, %v4291_v38  ;;  %vm1299_vm15 = vcmp.eq.f32.partialorder %v4309_v9, 0.0 }
 0x183   : > { %vm1345_vm0 = vcmp.eq.f32.partialorder %v4342_v59, inf  ;;  %v1327_v27 = vmul.f32 %v2785_v20, %v4352_v60  ;;  %v4400_v40 = vmax.f32 %v1325_v42, 1e-12  ;;  %v1295_v25 = vmul.f32 %v2777_v49, %v1294_v8  ;;  %v4403_v2 = vpop.eup %2788 }
 0x184   : > { %v1354_v14 = vsub.f32 1.5, %v1353_v16  ;;  %v1341_v6 = vmul.f32 0.5, %v1340_v58  ;;  %vm1347_vm1 = vcmp.eq.f32.partialorder %v4342_v59, 0.0  ;;  %v1172_v30 = vrot.slane %v1171_v37, 2 }
 0x185   : > { %v1348_v3 = vand.u32 2147483648, %v4342_v59  ;;  %v1328_v10 = vmul.f32 %v2785_v20, %v1327_v27  ;;  %2792 = vrsqrt.f32 %v4390_v34  ;;  %v2791_v53 = vpop.eup %2790  ;;  %v1296_v19 = vmul.f32 %v1295_v25, %v4309_v9  ;;  %v4477_v25 = vpop.xlane.xlu0 %1236 }
 0x186   : > { %v1355_v45 = vmul.f32 %v2781_v24, %v1354_v14  ;;  %v1342_v32 = vsub.f32 1.5, %v1341_v6  ;;  %vm1333_vm2 = vcmp.eq.f32.partialorder %v4352_v60, inf  ;;  %2794 = vrcp.f32 %v4394_v7 }
 0x187   : > { %v1310_v15 = vsel %vm1309_vm10, %v4291_v38, %v1308_v26  ;;  %v1329_v54 = vmul.f32 0.5, %v1328_v10  ;;  %vm1335_vm3 = vcmp.eq.f32.partialorder %v4352_v60, 0.0  ;;  %v1387_v1 = vmul.f32 %v2791_v53, %v4369_v0 }
 0x188   : > { %2796 = vrcp.f32 %v4400_v40  ;;  %v1356_v29 = vmul.f32 %v1355_v45, %v4328_v56  ;;  %v1343_v61 = vmul.f32 %v2783_v35, %v1342_v32  ;;  %v1336_v46 = vand.u32 2147483648, %v4352_v60  ;;  %v4445_v35 = vpop.xlane.xlu2 %1240 }
 0x189   : > { %v4420_v50 = vadd.f32 %v1172_v30, %v1171_v37  ;;  %v1298_v22 = vsel %vm1297_vm11, %v4309_v9, %v1296_v19  ;;  %v1330_v49 = vsub.f32 1.5, %v1329_v54  ;;  %v1388_v18 = vmul.f32 %v2791_v53, %v1387_v1 }
 0x18a   : > { %v1313_v48 = vsel %vm1311_vm12, %v1312_v23, %v1310_v15  ;;  %v1358_v43 = vsel %vm1357_vm13, %v4328_v56, %v1356_v29  ;;  %v1344_v44 = vmul.f32 %v1343_v61, %v4342_v59  ;;  %vm1393_vm4 = vcmp.eq.f32.partialorder %v4369_v0, inf }
 0x18b   : > { %2798 = vrsqrt.f32 %v4415_v33  ;;  %v2793_v13 = vpop.eup %2792  ;;  %v1361_v24 = vsel %vm1359_vm14, %v1360_v62, %v1358_v43  ;;  %v1331_v52 = vmul.f32 %v2785_v20, %v1330_v49  ;;  %v1389_v41 = vmul.f32 0.5, %v1388_v18  ;;  %v4466_v20 = vpop.xlane.xlu1 %1238 }
 0x18c   : > { %vm1395_vm5 = vcmp.eq.f32.partialorder %v4369_v0, 0.0  ;;  %v1396_v38 = vand.u32 2147483648, %v4369_v0  ;;  %v1301_v31 = vsel %vm1299_vm15, %v1300_v17, %v1298_v22  ;;  %v4439_v51 = vmax.f32 %v1361_v24, 1e-12  ;;  %v4447_v56 = vpop.eup %2794 }
 0x18d   : > { %v1346_v12 = vsel %vm1345_vm0, %v4342_v59, %v1344_v44  ;;  %v1375_v5 = vmul.f32 %v2793_v13, %v4390_v34  ;;  %v4449_v4 = vmax.f32 %v1313_v48, 1e-12  ;;  %v1332_v9 = vmul.f32 %v1331_v52, %v4352_v60 }
 0x18e   : > { %v1349_v63 = vsel %vm1347_vm1, %v1348_v3, %v1346_v12  ;;  %v1390_v23 = vsub.f32 1.5, %v1389_v41  ;;  %v4454_v55 = vpop.eup %2796  ;;  %v1174_v39 = vrot.slane %v4420_v50, 1  ;;  %2800 = vrcp.f32 %v4439_v51 }
 0x18f   : > { %v4458_v28 = vmax.f32 %v1349_v63, 1e-12  ;;  %v1376_v37 = vmul.f32 %v2793_v13, %v1375_v5  ;;  %v4460_v42 = vmax.f32 %v1301_v31, 1e-12  ;;  %v1334_v17 = vsel %vm1333_vm2, %v4352_v60, %v1332_v9 }
 0x190   : > { %v1391_v59 = vmul.f32 %v2791_v53, %v1390_v23  ;;  %2802 = vrsqrt.f32 %v4445_v35  ;;  %v1337_v16 = vsel %vm1335_vm3, %v1336_v46, %v1334_v17  ;;  %vm1381_vm6 = vcmp.eq.f32.partialorder %v4390_v34, inf }
 0x191   : > { %v2799_v8 = vpop.eup %2798  ;;  %2804 = vrcp.f32 %v4458_v28  ;;  %v1377_v62 = vmul.f32 0.5, %v1376_v37  ;;  %v4473_v58 = vmax.f32 %v1337_v16, 1e-12  ;;  %vm1383_vm7 = vcmp.eq.f32.partialorder %v4390_v34, 0.0 }
 0x192   : > { %2806 = vrcp.f32 %v4449_v4  ;;  %v1392_v26 = vmul.f32 %v1391_v59, %v4369_v0  ;;  %v1363_v27 = vmul.f32 %v2799_v8, %v4415_v33  ;;  %v1384_v6 = vand.u32 2147483648, %v4390_v34 }
 0x193   : > { %v1378_v14 = vsub.f32 1.5, %v1377_v62  ;;  %2808 = vrsqrt.f32 %v4466_v20  ;;  %v1372_v3 = vand.u32 2147483648, %v4415_v33  ;;  %vm1369_vm8 = vcmp.eq.f32.partialorder %v4415_v33, inf }
 0x194   : > { %2810 = vrcp.f32 %v4460_v42  ;;  %v1394_v60 = vsel %vm1393_vm4, %v4369_v0, %v1392_v26  ;;  %v1364_v30 = vmul.f32 %v2799_v8, %v1363_v27  ;;  %v4487_v10 = vpop.eup %2800  ;;  %v1432_v45 = vand.u32 2147483648, %v4445_v35 }
 0x195   : > { %v1397_v53 = vsel %vm1395_vm5, %v1396_v38, %v1394_v60  ;;  %v1379_v19 = vmul.f32 %v2793_v13, %v1378_v14  ;;  %2812 = vrsqrt.f32 %v4477_v25  ;;  %v4496_v15 = vmul.f32 %v4487_v10, %v4439_v51 }
 0x196   : > { %v2803_v32 = vpop.eup %2802  ;;  %2814 = vrcp.f32 %v4473_v58  ;;  %v4499_v54 = vmax.f32 %v1397_v53, 1e-12  ;;  %v1365_v1 = vmul.f32 0.5, %v1364_v30  ;;  %vm1371_vm9 = vcmp.eq.f32.partialorder %v4415_v33, 0.0 }
 0x197   : > { %v4502_v0 = vpop.eup %2804  ;;  %v1380_v29 = vmul.f32 %v1379_v19, %v4390_v34  ;;  %v1423_v61 = vmul.f32 %v2803_v32, %v4445_v35  ;;  %v1420_v46 = vand.u32 2147483648, %v4466_v20  ;;  %v1451_v22 = vmul.f32 %v4361_v36, %v4283_v47 }
 0x198   : > { %v4509_v49 = vpop.eup %2806  ;;  %v1587_v18 = vsub.f32 1.0, %v4496_v15  ;;  %2816 = vrcp.f32 %v4499_v54  ;;  %v1366_v48 = vsub.f32 1.5, %v1365_v1  ;;  %v1408_v43 = vand.u32 2147483648, %v4477_v25 }
 0x199   : > { %v2809_v44 = vpop.eup %2808  ;;  %v4516_v13 = vmul.f32 %v4502_v0, %v4458_v28  ;;  %v1382_v24 = vsel %vm1381_vm6, %v4390_v34, %v1380_v29  ;;  %v1424_v52 = vmul.f32 %v2803_v32, %v1423_v61  ;;  %v1452_v41 = vsub.f32 1.0, %v1451_v22 }
 0x19a   : > { %v4521_v38 = vpop.eup %2810  ;;  %v1385_v31 = vsel %vm1383_vm7, %v1384_v6, %v1382_v24  ;;  %v1367_v12 = vmul.f32 %v2799_v8, %v1366_v48  ;;  %vm1429_vm10 = vcmp.eq.f32.partialorder %v4445_v35, inf  ;;  %v1411_v5 = vmul.f32 %v2809_v44, %v4466_v20 }
 0x19b   : > { %vm1455_vm11 = vweird.f32 %v4283_v47  ;;  %v2813_v63 = vpop.eup %2812  ;;  %v4528_v9 = vmax.f32 %v1385_v31, 1e-12  ;;  %v1425_v23 = vmul.f32 0.5, %v1424_v52  ;;  %vm1431_vm12 = vcmp.eq.f32.partialorder %v4445_v35, 0.0 }
 0x19c   : > { %v1453_v37 = vmul.f32 %v4361_v36, %v1452_v41  ;;  %vm1456_vm13 = vweird.f32 %v4361_v36  ;;  %v4533_v17 = vpop.eup %2814  ;;  %v1368_v34 = vmul.f32 %v1367_v12, %v4415_v33  ;;  %v1412_v59 = vmul.f32 %v2809_v44, %v1411_v5 }
 0x19d   : > { %v1399_v8 = vmul.f32 %v2813_v63, %v4477_v25  ;;  %v1459_v16 = vand.u32 2147483647, %v4283_v47  ;;  %2818 = vrcp.f32 %v4528_v9  ;;  %v1426_v62 = vsub.f32 1.5, %v1425_v23  ;;  %vm4553_vm0 = vmor %vm1455_vm11, %vm1456_vm13  ;;  %v2947_v23 = vld [vmem:[%s3069_s16] sm:$0xff] }
 0x19e   : > { %vm1417_vm14 = vcmp.eq.f32.partialorder %v4466_v20, inf  ;;  %v1454_v26 = vadd.f32 %v4361_v36, %v1453_v37  ;;  %v1461_v27 = vand.u32 2147483648, %v4283_v47  ;;  %v4542_v14 = vpop.eup %2816  ;;  %v1572_v6 = vsub.f32 1.0, %v4516_v13 }
 0x19f   : > { %v1370_v60 = vsel %vm1369_vm8, %v4415_v33, %v1368_v34  ;;  %v1413_v30 = vmul.f32 0.5, %v1412_v59  ;;  %vm1419_vm15 = vcmp.eq.f32.partialorder %v4466_v20, 0.0  ;;  %v1400_v53 = vmul.f32 %v2813_v63, %v1399_v8 }
 0x1a0   : > { %v4559_v1 = vmul.f32 %v4542_v14, %v4499_v54  ;;  %v1373_v29 = vsel %vm1371_vm9, %v1372_v3, %v1370_v60  ;;  %v1427_v61 = vmul.f32 %v2803_v32, %v1426_v62  ;;  %vm1405_vm1 = vcmp.eq.f32.partialorder %v4477_v25, inf }
 0x1a1   : > { %v1458_v22 = vsel %vm4553_vm0, %v4361_v36, %v1454_v26  ;;  %v4567_v47 = vmax.f32 %v1373_v29, 1e-12  ;;  %v1414_v48 = vsub.f32 1.5, %v1413_v30  ;;  %v1401_v24 = vmul.f32 0.5, %v1400_v53 }
 0x1a2   : > { %vm1407_vm2 = vcmp.eq.f32.partialorder %v4477_v25, 0.0  ;;  %v1462_v52 = vor.u32 1.1754944e-38, %v1461_v27  ;;  %v1632_v41 = vsub.f32 1.0, %v4559_v1  ;;  %v1428_v33 = vmul.f32 %v1427_v61, %v4445_v35 }
 0x1a3   : > { %vm1460_vm3 = vcmp.eq.f32.partialorder %v1459_v16, 8.507059e+37  ;;  %v1481_v3 = vmul.f32 %v4403_v2, %v4358_v21  ;;  %2820 = vrcp.f32 %v4567_v47  ;;  %v1415_v32 = vmul.f32 %v2809_v44, %v1414_v48  ;;  %v4575_v12 = vpop.eup %2818 }
 0x1a4   : > { %v1402_v36 = vsub.f32 1.5, %v1401_v24  ;;  %v1463_v31 = vsel %vm1460_vm3, %v1462_v52, %v1458_v22  ;;  %v1430_v5 = vsel %vm1429_vm10, %v4445_v35, %v1428_v33  ;;  %vm1486_vm4 = vweird.f32 %v4403_v2 }
 0x1a5   : > { %v4581_v37 = vmul.f32 %v2947_v23, %v1463_v31  ;;  %v1482_v34 = vsub.f32 1.0, %v1481_v3  ;;  %v4586_v59 = vmul.f32 %v4575_v12, %v4528_v9  ;;  %v1433_v44 = vsel %vm1431_vm12, %v1432_v45, %v1430_v5 }
 0x1a6   : > { %v1416_v8 = vmul.f32 %v1415_v32, %v4466_v20  ;;  %v1403_v16 = vmul.f32 %v2813_v63, %v1402_v36  ;;  %v4593_v62 = vmax.f32 %v1433_v44, 1e-12  ;;  %v1489_v60 = vand.u32 2147483647, %v4358_v21  ;;  %v2948_v32 = vld [vmem:[%s3069_s16 + $0x10] sm:$0xff] }
 0x1a7   : > { %v1730_v26 = vmul.f32 %v4581_v37, %v4581_v37  ;;  %v1483_v27 = vmul.f32 %v4403_v2, %v1482_v34  ;;  %vm1485_vm5 = vweird.f32 %v4358_v21  ;;  %v1491_v35 = vand.u32 2147483648, %v4358_v21 }
 0x1a8   : > { %v1418_v30 = vsel %vm1417_vm14, %v4466_v20, %v1416_v8  ;;  %v1404_v53 = vmul.f32 %v1403_v16, %v4477_v25  ;;  %v1617_v45 = vsub.f32 1.0, %v4586_v59  ;;  %2822 = vrcp.f32 %v4593_v62  ;;  %vm1487_vm6 = vmor %vm1485_vm5, %vm1486_vm4 }
 0x1a9   : > { %v1421_v63 = vsel %vm1419_vm15, %v1420_v46, %v1418_v30  ;;  %1746 = vadd.xlane.f32.xlu0 %v1730_v26  ;;  %v1484_v19 = vadd.f32 %v4403_v2, %v1483_v27  ;;  %v4612_v29 = vpop.eup %2820  ;;  %v1492_v22 = vor.u32 1.1754944e-38, %v1491_v35  ;;  %v1496_v20 = vmul.f32 %v4392_v11, %v4346_v57 }
 0x1aa   : > { %v4614_v61 = vmax.f32 %v1421_v63, 1e-12  ;;  %v1406_v21 = vsel %vm1405_vm1, %v4477_v25, %v1404_v53  ;;  %v4625_v46 = vmul.f32 %v4612_v29, %v4567_v47  ;;  %vm1490_vm7 = vcmp.eq.f32.partialorder %v1489_v60, 8.507059e+37 }
 0x1ab   : > { %v1409_v48 = vsel %vm1407_vm2, %v1408_v43, %v1406_v21  ;;  %v1488_v24 = vsel %vm1487_vm6, %v4403_v2, %v1484_v19  ;;  %v1497_v3 = vsub.f32 1.0, %v1496_v20  ;;  %vm1500_vm8 = vweird.f32 %v4346_v57 }
 0x1ac   : > { %2824 = vrcp.f32 %v4614_v61  ;;  %v4633_v52 = vmax.f32 %v1409_v48, 1e-12  ;;  %v1493_v33 = vsel %vm1490_vm7, %v1492_v22, %v1488_v24  ;;  %vm1501_vm9 = vweird.f32 %v4392_v11 }
 0x1ad   : > { %v4636_v36 = vmul.f32 %v2948_v32, %v1493_v33  ;;  %v1504_v31 = vand.u32 2147483647, %v4346_v57  ;;  %v1498_v2 = vmul.f32 %v4392_v11, %v1497_v3  ;;  %v1506_v25 = vand.u32 2147483648, %v4346_v57  ;;  %vm1502_vm13 = vmor %vm1500_vm8, %vm1501_vm9 }
 0x1ae   : > { %2826 = vrcp.f32 %v4633_v52  ;;  %v1466_v43 = vmul.f32 %v4447_v56, %v4394_v7  ;;  %v4646_v5 = vpop.eup %2822  ;;  %v1602_v23 = vsub.f32 1.0, %v4625_v46  ;;  %vm1470_vm11 = vweird.f32 %v4394_v7 }
 0x1af   : > { %v1732_v34 = vmul.f32 %v4636_v36, %v4636_v36  ;;  %vm4651_vm10 = vcmp.eq.f32.partialorder %v1504_v31, 8.507059e+37  ;;  %v4658_v8 = vmul.f32 %v4646_v5, %v4593_v62  ;;  %v1499_v16 = vadd.f32 %v4392_v11, %v1498_v2 }
 0x1b0   : > { %v1467_v26 = vsub.f32 1.0, %v1466_v43  ;;  %vm1471_vm12 = vweird.f32 %v4447_v56  ;;  %v1507_v27 = vor.u32 1.1754944e-38, %v1506_v25  ;;  %v1474_v60 = vand.u32 2147483647, %v4394_v7 }
 0x1b1   : > { %1750 = vadd.xlane.f32.xlu2 %v1732_v34  ;;  %v1476_v30 = vand.u32 2147483648, %v4394_v7  ;;  %v1526_v53 = vmul.f32 %v4509_v49, %v4449_v4  ;;  %v1677_v63 = vsub.f32 1.0, %v4658_v8  ;;  %v1503_v19 = vsel %vm1502_vm13, %v4392_v11, %v1499_v16  ;;  %v2949_v11 = vld [vmem:[%s3069_s16 + $0x18] sm:$0xff]  ;;  %vm1472_vm1 = vmor %vm1470_vm11, %vm1471_vm12 }
 0x1b2   : > { %v4670_v35 = vpop.eup %2824  ;;  %v1468_v21 = vmul.f32 %v4447_v56, %v1467_v26  ;;  %vm1530_vm14 = vweird.f32 %v4449_v4  ;;  %v1508_v22 = vsel %vm4651_vm10, %v1507_v27, %v1503_v19  ;;  %vm4682_vm15 = vcmp.eq.f32.partialorder %v1474_v60, 8.507059e+37 }
 0x1b3   : > { %v4678_v57 = vmul.f32 %v4670_v35, %v4614_v61  ;;  %vm1531_vm0 = vweird.f32 %v4509_v49  ;;  %v4690_v24 = vmul.f32 %v2949_v11, %v1508_v22  ;;  %v1527_v3 = vsub.f32 1.0, %v1526_v53  ;;  %v2950_v53 = vld [vmem:[%s3069_s16 + $0x8] sm:$0xff] }
 0x1b4   : > { %v4687_v48 = vpop.eup %2826  ;;  %v1469_v33 = vadd.f32 %v4447_v56, %v1468_v21  ;;  %v1534_v32 = vand.u32 2147483647, %v4449_v4  ;;  %v1477_v2 = vor.u32 1.1754944e-38, %v1476_v30  ;;  %v1536_v25 = vand.u32 2147483648, %v4449_v4  ;;  %vm1532_vm5 = vmor %vm1530_vm14, %vm1531_vm0 }
 0x1b5   : > { %v1662_v31 = vsub.f32 1.0, %v4678_v57  ;;  %v1541_v43 = vmul.f32 %v4454_v55, %v4400_v40  ;;  %v4704_v34 = vmul.f32 %v4687_v48, %v4633_v52  ;;  %v1733_v44 = vmul.f32 %v4690_v24, %v4690_v24 }
 0x1b6   : > { %v1473_v16 = vsel %vm1472_vm1, %v4447_v56, %v1469_v33  ;;  %v1528_v26 = vmul.f32 %v4509_v49, %v1527_v3  ;;  %vm4712_vm2 = vcmp.eq.f32.partialorder %v1534_v32, 8.507059e+37  ;;  %v1537_v60 = vor.u32 1.1754944e-38, %v1536_v25 }
 0x1b7   : > { %v1478_v7 = vsel %vm4682_vm15, %v1477_v2, %v1473_v16  ;;  %v1542_v30 = vsub.f32 1.0, %v1541_v43  ;;  %1752 = vadd.xlane.f32.xlu0 %v1733_v44  ;;  %vm1545_vm3 = vweird.f32 %v4400_v40  ;;  %vm1546_vm4 = vweird.f32 %v4454_v55  ;;  %v2951_v44 = vld [vmem:[%s3069_s16 + $0x28] sm:$0xff] }
 0x1b8   : > { %v4717_v19 = vmul.f32 %v2950_v53, %v1478_v7  ;;  %v1529_v21 = vadd.f32 %v4509_v49, %v1528_v26  ;;  %v1549_v22 = vand.u32 2147483647, %v4400_v40  ;;  %v1551_v20 = vand.u32 2147483648, %v4400_v40  ;;  %vm1547_vm8 = vmor %vm1545_vm3, %vm1546_vm4 }
 0x1b9   : > { %v1543_v56 = vmul.f32 %v4454_v55, %v1542_v30  ;;  %v1511_v11 = vmul.f32 %v4521_v38, %v4460_v42  ;;  %vm1515_vm6 = vweird.f32 %v4460_v42  ;;  %vm1516_vm9 = vweird.f32 %v4521_v38 }
 0x1ba   : > { %v1731_v33 = vmul.f32 %v4717_v19, %v4717_v19  ;;  %v1690_v3 = vadd.f32 %v4717_v19, %v4581_v37  ;;  %v1533_v32 = vsel %vm1532_vm5, %v4509_v49, %v1529_v21  ;;  %vm1550_vm7 = vcmp.eq.f32.partialorder %v1549_v22, 8.507059e+37  ;;  %vm1517_vm11 = vmor %vm1515_vm6, %vm1516_vm9 }
 0x1bb   : > { %v1538_v4 = vsel %vm4712_vm2, %v1537_v60, %v1533_v32  ;;  %v1544_v2 = vadd.f32 %v4454_v55, %v1543_v56  ;;  %v1552_v25 = vor.u32 1.1754944e-38, %v1551_v20  ;;  %v1512_v49 = vsub.f32 1.0, %v1511_v11  ;;  %v2952_v56 = vld [vmem:[%s3069_s16 + $0x30] sm:$0xff] }
 0x1bc   : > { %1748 = vadd.xlane.f32.xlu1 %v1731_v33  ;;  %v1691_v43 = vadd.f32 %v1690_v3, %v4636_v36  ;;  %v4742_v16 = vmul.f32 %v2951_v44, %v1538_v4  ;;  %v1519_v7 = vand.u32 2147483647, %v4460_v42  ;;  %v1521_v27 = vand.u32 2147483648, %v4460_v42 }
 0x1bd   : > { %v1548_v26 = vsel %vm1547_vm8, %v4454_v55, %v1544_v2  ;;  %v1573_v60 = vmul.f32 %v4502_v0, %v1572_v6  ;;  %v1513_v40 = vmul.f32 %v4521_v38, %v1512_v49  ;;  %vm1575_vm12 = vweird.f32 %v4458_v28 }
 0x1be   : > { %v1735_v30 = vmul.f32 %v4742_v16, %v4742_v16  ;;  %v1553_v53 = vsel %vm1550_vm7, %v1552_v25, %v1548_v26  ;;  %v1692_v21 = vadd.f32 %v1691_v43, %v4690_v24  ;;  %vm4762_vm10 = vcmp.eq.f32.partialorder %v1519_v7, 8.507059e+37  ;;  %v2953_v43 = vld [vmem:[%s3069_s16 + $0x20] sm:$0xff] }
 0x1bf   : > { %v4760_v22 = vmul.f32 %v2952_v56, %v1553_v53  ;;  %v1522_v20 = vor.u32 1.1754944e-38, %v1521_v27  ;;  %v1574_v13 = vadd.f32 %v4502_v0, %v1573_v60  ;;  %v1514_v6 = vadd.f32 %v4521_v38, %v1513_v40 }
 0x1c0   : > { %1756 = vadd.xlane.f32.xlu2 %v1735_v30  ;;  %vm1576_vm13 = vweird.f32 %v4502_v0  ;;  %v1579_v11 = vand.u32 2147483647, %v4458_v28  ;;  %v1581_v32 = vand.u32 2147483648, %v4458_v28  ;;  %v1588_v42 = vmul.f32 %v4487_v10, %v1587_v18 }
 0x1c1   : > { %v1736_v33 = vmul.f32 %v4760_v22, %v4760_v22  ;;  %vm4777_vm14 = vmor %vm1575_vm12, %vm1576_vm13  ;;  %vm1590_vm15 = vweird.f32 %v4439_v51  ;;  %v1518_v4 = vsel %vm1517_vm11, %v4521_v38, %v1514_v6  ;;  %vm1591_vm1 = vweird.f32 %v4487_v10  ;;  %v2955_v6 = vld [vmem:[%s3069_s16 + $0x48] sm:$0xff] }
 0x1c2   : > { %v1578_v2 = vsel %vm4777_vm14, %v4502_v0, %v1574_v13  ;;  %vm1580_vm0 = vcmp.eq.f32.partialorder %v1579_v11, 8.507059e+37  ;;  %v1523_v25 = vsel %vm4762_vm10, %v1522_v20, %v1518_v4  ;;  %v1582_v28 = vor.u32 1.1754944e-38, %v1581_v32  ;;  %vm4798_vm2 = vmor %vm1590_vm15, %vm1591_vm1 }
 0x1c3   : > { %1758 = vadd.xlane.f32.xlu0 %v1736_v33  ;;  %v1589_v15 = vadd.f32 %v4487_v10, %v1588_v42  ;;  %v1594_v18 = vand.u32 2147483647, %v4439_v51  ;;  %v4796_v44 = vmul.f32 %v2953_v43, %v1523_v25  ;;  %v1596_v0 = vand.u32 2147483648, %v4439_v51  ;;  %v2954_v51 = vld [vmem:[%s3069_s16 + $0x40] sm:$0xff] }
 0x1c4   : > { %v1556_v49 = vmul.f32 %v4533_v17, %v4473_v58  ;;  %vm1560_vm3 = vweird.f32 %v4473_v58  ;;  %v1583_v26 = vsel %vm1580_vm0, %v1582_v28, %v1578_v2  ;;  %vm1561_vm5 = vweird.f32 %v4533_v17  ;;  %v2959_v28 = vld [vmem:[%s3069_s16 + $0x50] sm:$0xff] }
 0x1c5   : > { %v1593_v7 = vsel %vm4798_vm2, %v4487_v10, %v1589_v15  ;;  %vm1595_vm4 = vcmp.eq.f32.partialorder %v1594_v18, 8.507059e+37  ;;  %v1734_v27 = vmul.f32 %v4796_v44, %v4796_v44  ;;  %v1693_v60 = vadd.f32 %v1692_v21, %v4796_v44  ;;  %vm1562_vm10 = vmor %vm1560_vm3, %vm1561_vm5 }
 0x1c6   : > { %v4814_v30 = vmul.f32 %v2954_v51, %v1583_v26  ;;  %v1597_v53 = vor.u32 1.1754944e-38, %v1596_v0  ;;  %v1557_v40 = vsub.f32 1.0, %v1556_v49  ;;  %v1564_v56 = vand.u32 2147483647, %v4473_v58  ;;  %v2956_v49 = vld [vmem:[%s3069_s16 + $0x38] sm:$0xff] }
 0x1c7   : > { %v1566_v55 = vand.u32 2147483648, %v4473_v58  ;;  %v1618_v10 = vmul.f32 %v4575_v12, %v1617_v45  ;;  %1754 = vadd.xlane.f32.xlu1 %v1734_v27  ;;  %v1694_v20 = vadd.f32 %v1693_v60, %v4742_v16  ;;  %vm1620_vm6 = vweird.f32 %v4528_v9 }
 0x1c8   : > { %v1738_v13 = vmul.f32 %v4814_v30, %v4814_v30  ;;  %v1598_v21 = vsel %vm1595_vm4, %v1597_v53, %v1593_v7  ;;  %v1558_v33 = vmul.f32 %v4533_v17, %v1557_v40  ;;  %vm4829_vm7 = vcmp.eq.f32.partialorder %v1564_v56, 8.507059e+37  ;;  %v2957_v7 = vld [vmem:[%s3069_s16 + $0x58] sm:$0xff] }
 0x1c9   : > { %v4826_v11 = vmul.f32 %v2955_v6, %v1598_v21  ;;  %v1567_v59 = vor.u32 1.1754944e-38, %v1566_v55  ;;  %v1695_v45 = vadd.f32 %v1694_v20, %v4760_v22  ;;  %v1619_v32 = vadd.f32 %v4575_v12, %v1618_v10  ;;  %v2958_v21 = vld [vmem:[%s3069_s16 + $0x60] sm:$0xff] }
 0x1ca   : > { %1762 = vadd.xlane.f32.xlu2 %v1738_v13  ;;  %vm1621_vm8 = vweird.f32 %v4575_v12  ;;  %v1624_v42 = vand.u32 2147483647, %v4528_v9  ;;  %v1559_v25 = vadd.f32 %v4533_v17, %v1558_v33  ;;  %v1626_v15 = vand.u32 2147483648, %v4528_v9 }
 0x1cb   : > { %v4839_v4 = vadd.f32 %v4826_v11, %v4814_v30  ;;  %v1739_v2 = vmul.f32 %v4826_v11, %v4826_v11  ;;  %vm4844_vm9 = vmor %vm1620_vm6, %vm1621_vm8  ;;  %v1633_v43 = vmul.f32 %v4542_v14, %v1632_v41  ;;  %vm1635_vm12 = vweird.f32 %v4499_v54 }
 0x1cc   : > { %v1623_v18 = vsel %vm4844_vm9, %v4575_v12, %v1619_v32  ;;  %vm1625_vm11 = vcmp.eq.f32.partialorder %v1624_v42, 8.507059e+37  ;;  %v1563_v9 = vsel %vm1562_vm10, %v4533_v17, %v1559_v25  ;;  %v1627_v38 = vor.u32 1.1754944e-38, %v1626_v15 }
 0x1cd   : > { %1764 = vadd.xlane.f32.xlu0 %v1739_v2  ;;  %vm1636_vm13 = vweird.f32 %v4542_v14  ;;  %v1639_v58 = vand.u32 2147483647, %v4499_v54  ;;  %v1568_v0 = vsel %vm4829_vm7, %v1567_v59, %v1563_v9  ;;  %v1634_v12 = vadd.f32 %v4542_v14, %v1633_v43 }
 0x1ce   : > { %v1641_v1 = vand.u32 2147483648, %v4499_v54  ;;  %v1603_v41 = vmul.f32 %v4612_v29, %v1602_v23  ;;  %v4871_v26 = vmul.f32 %v2956_v49, %v1568_v0  ;;  %v1628_v17 = vsel %vm1625_vm11, %v1627_v38, %v1623_v18  ;;  %vm1637_vm14 = vmor %vm1635_vm12, %vm1636_vm13 }
 0x1cf   : > { %vm1640_vm15 = vcmp.eq.f32.partialorder %v1639_v58, 8.507059e+37  ;;  %vm1605_vm0 = vweird.f32 %v4567_v47  ;;  %v4875_v27 = vmul.f32 %v2957_v7, %v1628_v17  ;;  %v1638_v60 = vsel %vm1637_vm14, %v4542_v14, %v1634_v12 }
 0x1d0   : > { %v1642_v51 = vor.u32 1.1754944e-38, %v1641_v1  ;;  %v1604_v54 = vadd.f32 %v4612_v29, %v1603_v41  ;;  %v1737_v46 = vmul.f32 %v4871_v26, %v4871_v26  ;;  %v1696_v23 = vadd.f32 %v1695_v45, %v4871_v26 }
 0x1d1   : > { %vm1606_vm1 = vweird.f32 %v4612_v29  ;;  %v1609_v53 = vand.u32 2147483647, %v4567_v47  ;;  %v1741_v40 = vmul.f32 %v4875_v27, %v4875_v27  ;;  %v1611_v14 = vand.u32 2147483648, %v4567_v47 }
 0x1d2   : > { %v1643_v56 = vsel %vm1640_vm15, %v1642_v51, %v1638_v60  ;;  %vm4886_vm2 = vmor %vm1605_vm0, %vm1606_vm1  ;;  %v1663_v10 = vmul.f32 %v4670_v35, %v1662_v31  ;;  %1760 = vadd.xlane.f32.xlu1 %v1737_v46  ;;  %v1697_v20 = vadd.f32 %v1696_v23, %v4814_v30  ;;  %v1711_v13 = vrot.slane %v1696_v23, 4 }
 0x1d3   : > { %v4896_v6 = vmul.f32 %v2958_v21, %v1643_v56  ;;  %v1608_v33 = vsel %vm4886_vm2, %v4612_v29, %v1604_v54  ;;  %v1647_v3 = vsub.f32 1.0, %v4704_v34  ;;  %1768 = vadd.xlane.f32.xlu2 %v1741_v40  ;;  %vm1610_vm3 = vcmp.eq.f32.partialorder %v1609_v53, 8.507059e+37 }
 0x1d4   : > { %v1612_v47 = vor.u32 1.1754944e-38, %v1611_v14  ;;  %v1664_v57 = vadd.f32 %v4670_v35, %v1663_v10  ;;  %v1712_v31 = vadd.f32 %v1711_v13, %v1696_v23  ;;  %vm1665_vm4 = vweird.f32 %v4614_v61  ;;  %v2961_v23 = vld [vmem:[%s3069_s16 + $0x78] sm:$0xff] }
 0x1d5   : > { %v1742_v59 = vmul.f32 %v4896_v6, %v4896_v6  ;;  %vm1666_vm5 = vweird.f32 %v4670_v35  ;;  %v1669_v29 = vand.u32 2147483647, %v4614_v61  ;;  %v1671_v34 = vand.u32 2147483648, %v4614_v61 }
 0x1d6   : > { %v1613_v45 = vsel %vm1610_vm3, %v1612_v47, %v1608_v33  ;;  %vm4907_vm6 = vmor %vm1665_vm4, %vm1666_vm5  ;;  %v1678_v42 = vmul.f32 %v4646_v5, %v1677_v63  ;;  %v1698_v2 = vadd.f32 %v1697_v20, %v4826_v11  ;;  %v1713_v25 = vrot.slane %v1712_v31, 2  ;;  %v2962_v33 = vld [vmem:[%s3069_s16 + $0x68] sm:$0xff] }
 0x1d7   : > { %1770 = vadd.xlane.f32.xlu0 %v1742_v59  ;;  %v4918_v15 = vmul.f32 %v2959_v28, %v1613_v45  ;;  %v1668_v18 = vsel %vm4907_vm6, %v4670_v35, %v1664_v57  ;;  %v1672_v43 = vor.u32 1.1754944e-38, %v1671_v34  ;;  %vm1680_vm7 = vweird.f32 %v4593_v62 }
 0x1d8   : > { %v1679_v9 = vadd.f32 %v4646_v5, %v1678_v42  ;;  %vm1681_vm8 = vweird.f32 %v4646_v5  ;;  %vm1670_vm9 = vcmp.eq.f32.partialorder %v1669_v29, 8.507059e+37  ;;  %v4934_v35 = vadd.f32 %v1174_v39, %v4420_v50 }
 0x1d9   : > { %v1740_v61 = vmul.f32 %v4918_v15, %v4918_v15  ;;  %v1699_v8 = vadd.f32 %v1698_v2, %v4918_v15  ;;  %v1718_v63 = vadd.f32 %v4839_v4, %v4918_v15  ;;  %v1673_v38 = vsel %vm1670_vm9, %v1672_v43, %v1668_v18  ;;  %vm4936_vm10 = vmor %vm1680_vm7, %vm1681_vm8  ;;  %v2960_v4 = vld [vmem:[%s3069_s16 + $0x70] sm:$0xff] }
 0x1da   : > { %v1684_v0 = vand.u32 2147483647, %v4593_v62  ;;  %v1686_v12 = vand.u32 2147483648, %v4593_v62  ;;  %v1714_v1 = vadd.f32 %v1713_v25, %v1712_v31  ;;  %v4944_v49 = vmul.f32 %v2960_v4, %v1673_v38 }
 0x1db   : > { %1766 = vadd.xlane.f32.xlu1 %v1740_v61  ;;  %v1719_v41 = vadd.f32 %v1718_v63, %v4875_v27  ;;  %v1683_v50 = vsel %vm4936_vm10, %v4646_v5, %v1679_v9  ;;  %v1700_v39 = vadd.f32 %v1699_v8, %v4875_v27  ;;  %v1648_v7 = vmul.f32 %v4687_v48, %v1647_v3 }
 0x1dc   : > { %vm1685_vm11 = vcmp.eq.f32.partialorder %v1684_v0, 8.507059e+37  ;;  %v1687_v17 = vor.u32 1.1754944e-38, %v1686_v12  ;;  %v1744_v62 = vmul.f32 %v4944_v49, %v4944_v49  ;;  %vm1651_vm12 = vweird.f32 %v4687_v48 }
 0x1dd   : > { %v1654_v60 = vand.u32 2147483647, %v4633_v52  ;;  %v1656_v51 = vand.u32 2147483648, %v4633_v52  ;;  %v1649_v46 = vadd.f32 %v4687_v48, %v1648_v7  ;;  %vm1650_vm13 = vweird.f32 %v4633_v52 }
 0x1de   : > { %v1688_v54 = vsel %vm1685_vm11, %v1687_v17, %v1683_v50  ;;  %v1720_v5 = vadd.f32 %v1719_v41, %v4896_v6  ;;  %1774 = vadd.xlane.f32.xlu2 %v1744_v62  ;;  %vm1652_vm14 = vmor %vm1650_vm13, %vm1651_vm12  ;;  %v4964_v56 = vmul.f32 %v4717_v19, %v4934_v35  ;;  %v1715_v55 = vrot.slane %v1714_v1, 1 }
 0x1df   : > { %v4960_v53 = vmul.f32 %v2961_v23, %v1688_v54  ;;  %v1657_v40 = vor.u32 1.1754944e-38, %v1656_v51  ;;  %v1653_v14 = vsel %vm1652_vm14, %v4687_v48, %v1649_v46  ;;  %vm1655_vm15 = vcmp.eq.f32.partialorder %v1654_v60, 8.507059e+37 }
 0x1e0   : > { %v4969_v52 = vmul.f32 %v4796_v44, %v4934_v35  ;;  %v1701_v13 = vadd.f32 %v1700_v39, %v4896_v6  ;;  %v4976_v21 = vmul.f32 %v4871_v26, %v4934_v35  ;;  %v4983_v48 = vmul.f32 %v4760_v22, %v4934_v35 }
 0x1e1   : > { %v1745_v10 = vmul.f32 %v4960_v53, %v4960_v53  ;;  %v1658_v20 = vsel %vm1655_vm15, %v1657_v40, %v1653_v14  ;;  %v4987_v47 = vmul.f32 %v4742_v16, %v4934_v35  ;;  %v4991_v57 = vmul.f32 %v4918_v15, %v4934_v35 }
 0x1e2   : > { %v4979_v3 = vmul.f32 %v2962_v33, %v1658_v20  ;;  %v4995_v31 = vmul.f32 %v4826_v11, %v4934_v35  ;;  %v4999_v59 = vmul.f32 %v4814_v30, %v4934_v35  ;;  %v5003_v45 = vmul.f32 %v4896_v6, %v4934_v35 }
 0x1e3   : > { %1776 = vadd.xlane.f32.xlu0 %v1745_v10  ;;  %v5007_v32 = vmul.f32 %v4875_v27, %v4934_v35  ;;  %v5017_v25 = vadd.f32 %v1715_v55, %v1714_v1  ;;  %v5021_v28 = vmul.f32 %v4960_v53, %v4934_v35  ;;  %v5025_v18 = vmul.f32 %v4944_v49, %v4934_v35 }
 0x1e4   : > { %v1743_v29 = vmul.f32 %v4979_v3, %v4979_v3  ;;  %v1702_v34 = vadd.f32 %v1701_v13, %v4979_v3  ;;  %v1721_v42 = vadd.f32 %v1720_v5, %v4979_v3  ;;  %v5015_v2 = vmul.f32 %v4979_v3, %v4934_v35 }
 0x1e5   : > { %v5031_v61 = vmul.f32 %v5017_v25, %v4717_v19  ;;  %v5036_v63 = vmul.f32 %v5017_v25, %v4760_v22  ;;  %v5040_v38 = vmul.f32 %v5017_v25, %v4742_v16  ;;  %v5044_v58 = vmul.f32 %v5017_v25, %v4796_v44 }
 0x1e6   : > { %1772 = vadd.xlane.f32.xlu1 %v1743_v29  ;;  %v1703_v43 = vadd.f32 %v1702_v34, %v4944_v49  ;;  %v1722_v9 = vadd.f32 %v1721_v42, %v4944_v49  ;;  %v5049_v12 = vmul.f32 %v5017_v25, %v4871_v26 }
 0x1e8   : > { %v1704_v8 = vadd.f32 %v1703_v43, %v4960_v53  ;;  %v1723_v0 = vadd.f32 %v1722_v9, %v4960_v53 }
 0x1ea   : > { %v1705_v1 = vrot.slane %v1704_v8, 4  ;;  %v1724_v41 = vrot.slane %v1723_v0, 4 }
 0x1ec   : > { %v1706_v4 = vadd.f32 %v1705_v1, %v1704_v8  ;;  %v1725_v50 = vadd.f32 %v1724_v41, %v1723_v0 }
 0x1ee   : > { %v1707_v39 = vrot.slane %v1706_v4, 2  ;;  %v1726_v17 = vrot.slane %v1725_v50, 2 }
 0x1f0   : > { %v1708_v7 = vadd.f32 %v1707_v39, %v1706_v4  ;;  %v1727_v62 = vadd.f32 %v1726_v17, %v1725_v50 }
 0x1f2   : > { %v1709_v60 = vrot.slane %v1708_v7, 1  ;;  %v1728_v51 = vrot.slane %v1727_v62, 1 }
 0x1f4   : > { %v1710_v54 = vadd.f32 %v1709_v60, %v1708_v7  ;;  %v1729_v40 = vadd.f32 %v1728_v51, %v1727_v62 }
 0x1f6   : > { %v1780_v46 = vmul.f32 %v1710_v54, %v4636_v36  ;;  %v1779_v5 = vmul.f32 %v1710_v54, %v4717_v19  ;;  %v1778_v23 = vmul.f32 %v1710_v54, %v4581_v37  ;;  %v5055_v55 = vmul.f32 %v1729_v40, %v4826_v11 }
 0x1f7   : > { %v5058_v14 = vmul.f32 %v1729_v40, %v4814_v30  ;;  %v5061_v10 = vmul.f32 %v1729_v40, %v4896_v6  ;;  %v5064_v20 = vmul.f32 %v1729_v40, %v4875_v27  ;;  %v5067_v19 = vmul.f32 %v1729_v40, %v4918_v15 }
 0x1f8   : > { %1798 = vadd.xlane.f32.xlu0 %v1780_v46  ;;  %1796 = vadd.xlane.f32.xlu2 %v1779_v5  ;;  %v5070_v13 = vmul.f32 %v1729_v40, %v4960_v53  ;;  %v5073_v33 = vmul.f32 %v1729_v40, %v4944_v49  ;;  %v5076_v29 = vmul.f32 %v1729_v40, %v4979_v3 }
 0x1f9   : > { %1794 = vadd.xlane.f32.xlu1 %v1778_v23  ;;  %v1783_v34 = vmul.f32 %v1710_v54, %v4742_v16  ;;  %v1782_v42 = vmul.f32 %v1710_v54, %v4796_v44  ;;  %v1781_v43 = vmul.f32 %v1710_v54, %v4690_v24  ;;  %v1786_v9 = vmul.f32 %v1710_v54, %v4814_v30 }
 0x1fa   : > { %v1785_v8 = vmul.f32 %v1710_v54, %v4871_v26  ;;  %v1784_v0 = vmul.f32 %v1710_v54, %v4760_v22  ;;  %v1789_v1 = vmul.f32 %v1710_v54, %v4875_v27  ;;  %v1788_v16 = vmul.f32 %v1710_v54, %v4918_v15 }
 0x1fb   : > { %v1787_v44 = vmul.f32 %v1710_v54, %v4826_v11  ;;  %v1792_v41 = vmul.f32 %v1710_v54, %v4944_v49  ;;  %v1791_v30 = vmul.f32 %v1710_v54, %v4979_v3  ;;  %v1790_v26 = vmul.f32 %v1710_v54, %v4896_v6 }
 0x1fc   : > { %v1826_v22 = vmul.f32 %v4581_v37, %v4934_v35  ;;  %v1793_v27 = vmul.f32 %v1710_v54, %v4960_v53  ;;  %v1829_v11 = vmul.f32 %v4690_v24, %v4934_v35  ;;  %v1828_v15 = vmul.f32 %v4636_v36, %v4934_v35 }
 0x1fd   : > { %v1874_v3 = vmul.f32 %v5017_v25, %v4581_v37 }
 0x200   : > { %1804 = vadd.xlane.f32.xlu0 %v1783_v34  ;;  %1802 = vadd.xlane.f32.xlu2 %v1782_v42 }
 0x201   : > { %1800 = vadd.xlane.f32.xlu1 %v1781_v43 }
 0x208   : > { %1810 = vadd.xlane.f32.xlu0 %v1786_v9  ;;  %1808 = vadd.xlane.f32.xlu2 %v1785_v8 }
 0x209   : > { %1806 = vadd.xlane.f32.xlu1 %v1784_v0 }
 0x210   : > { %1816 = vadd.xlane.f32.xlu0 %v1789_v1  ;;  %1814 = vadd.xlane.f32.xlu2 %v1788_v16 }
 0x211   : > { %1812 = vadd.xlane.f32.xlu1 %v1787_v44 }
 0x218   : > { %1822 = vadd.xlane.f32.xlu0 %v1792_v41  ;;  %1820 = vadd.xlane.f32.xlu2 %v1791_v30 }
 0x219   : > { %1818 = vadd.xlane.f32.xlu1 %v1790_v26 }
 0x21c   : > { %v5102_v6 = vpop.xlane.xlu0 %1746 }
 0x220   : > { %1844 = vadd.xlane.f32.xlu0 %v4964_v56  ;;  %1842 = vadd.xlane.f32.xlu2 %v1826_v22 }
 0x221   : > { %1824 = vadd.xlane.f32.xlu1 %v1793_v27 }
 0x224   : > { %v5107_v49 = vpop.xlane.xlu2 %1750 }
 0x228   : > { %1850 = vadd.xlane.f32.xlu0 %v4969_v52  ;;  %1848 = vadd.xlane.f32.xlu2 %v1829_v11 }
 0x229   : > { %1846 = vadd.xlane.f32.xlu1 %v1828_v15 }
 0x22a   : > { %v5109_v35 = vpop.xlane.xlu0 %1752 }
 0x22f   : > { %v5111_v53 = vpop.xlane.xlu1 %1748 }
 0x230   : > { %1856 = vadd.xlane.f32.xlu0 %v4976_v21  ;;  %1854 = vadd.xlane.f32.xlu2 %v4983_v48  ;;  %v1877_v48 = vmul.f32 %v5017_v25, %v4690_v24 }
 0x231   : > { %1852 = vadd.xlane.f32.xlu1 %v4987_v47  ;;  %v1876_v47 = vmul.f32 %v5017_v25, %v4636_v36 }
 0x233   : > { %v5116_v56 = vpop.xlane.xlu2 %1756 }
 0x236   : > { %v5118_v52 = vpop.xlane.xlu0 %1758 }
 0x238   : > { %1862 = vadd.xlane.f32.xlu0 %v4991_v57  ;;  %1860 = vadd.xlane.f32.xlu2 %v4995_v31 }
 0x239   : > { %1858 = vadd.xlane.f32.xlu1 %v4999_v59 }
 0x23a   : > { %v5120_v21 = vpop.xlane.xlu1 %1754 }
 0x23d   : > { %v5130_v57 = vpop.xlane.xlu2 %1762 }
 0x240   : > { %1868 = vadd.xlane.f32.xlu0 %v5015_v2  ;;  %1866 = vadd.xlane.f32.xlu2 %v5003_v45  ;;  %v5132_v31 = vpop.xlane.xlu0 %1764 }
 0x241   : > { %1864 = vadd.xlane.f32.xlu1 %v5007_v32 }
 0x245   : > { %v5134_v59 = vpop.xlane.xlu1 %1760 }
 0x246   : > { %v5139_v37 = vpop.xlane.xlu2 %1768 }
 0x248   : > { %1890 = vadd.xlane.f32.xlu0 %v1874_v3  ;;  %1872 = vadd.xlane.f32.xlu2 %v5021_v28 }
 0x249   : > { %1870 = vadd.xlane.f32.xlu1 %v5025_v18 }
 0x24a   : > { %v5141_v24 = vpop.xlane.xlu0 %1770 }
 0x24e   : > { %v5144_v36 = vpop.xlane.xlu1 %1766 }
 0x250   : > { %1896 = vadd.xlane.f32.xlu0 %v1877_v48  ;;  %1894 = vadd.xlane.f32.xlu2 %v1876_v47 }
 0x251   : > { %1892 = vadd.xlane.f32.xlu1 %v5031_v61  ;;  %v5149_v45 = vpop.xlane.xlu2 %1774 }
 0x256   : > { %v5151_v32 = vpop.xlane.xlu0 %1776 }
 0x258   : > { %1902 = vadd.xlane.f32.xlu0 %v5036_v63  ;;  %1900 = vadd.xlane.f32.xlu2 %v5040_v38 }
 0x259   : > { %1898 = vadd.xlane.f32.xlu1 %v5044_v58  ;;  %v5153_v2 = vpop.xlane.xlu1 %1772 }
 0x260   : > { %1908 = vadd.xlane.f32.xlu0 %v5055_v55  ;;  %1906 = vadd.xlane.f32.xlu2 %v5058_v14 }
 0x261   : > { %1904 = vadd.xlane.f32.xlu1 %v5049_v12 }
 0x268   : > { %1914 = vadd.xlane.f32.xlu0 %v5061_v10  ;;  %1912 = vadd.xlane.f32.xlu2 %v5064_v20 }
 0x269   : > { %1910 = vadd.xlane.f32.xlu1 %v5067_v19 }
 0x26b   : > { %v1797_v25 = vpop.xlane.xlu2 %1796  ;;  %v5158_v28 = vpop.xlane.xlu0 %1798 }
 0x26c   : > { %v1923_v18 = vsub.f32 %v1797_v25, %v5111_v53  ;;  %v1795_v61 = vpop.xlane.xlu1 %1794  ;;  %v1924_v63 = vsub.f32 %v5158_v28, %v5107_v49 }
 0x26d   : > { %v1922_v3 = vsub.f32 %v1795_v61, %v5102_v6 }
 0x26e   : > { %v5238_v9 = vmul.f32 0.0078125, %v1924_v63 }
 0x270   : > { %1920 = vadd.xlane.f32.xlu0 %v5070_v13  ;;  %1918 = vadd.xlane.f32.xlu2 %v5073_v33 }
 0x271   : > { %1916 = vadd.xlane.f32.xlu1 %v5076_v29 }
 0x273   : > { %v1803_v38 = vpop.xlane.xlu2 %1802  ;;  %v1805_v58 = vpop.xlane.xlu0 %1804 }
 0x274   : > { %v1926_v12 = vsub.f32 %v1803_v38, %v5120_v21  ;;  %v1801_v4 = vpop.xlane.xlu1 %1800  ;;  %v1927_v50 = vsub.f32 %v1805_v58, %v5116_v56  ;;  %v5232_v58 = vmul.f32 0.0078125, %v1923_v18 }
 0x275   : > { %v1925_v39 = vsub.f32 %v1801_v4, %v5109_v35 }
 0x276   : > { %v5242_v6 = vmul.f32 0.0078125, %v1926_v12  ;;  %v5244_v61 = vmul.f32 0.0078125, %v1927_v50 }
 0x27b   : > { %v5169_v17 = vpop.xlane.xlu2 %1808  ;;  %v5171_v7 = vpop.xlane.xlu0 %1810 }
 0x27c   : > { %v1929_v62 = vsub.f32 %v5169_v17, %v5134_v59  ;;  %v5175_v60 = vpop.xlane.xlu1 %1806  ;;  %v1930_v51 = vsub.f32 %v5171_v7, %v5130_v57  ;;  %v1938_v7 = vmul.f32 0.0078125, %v1922_v3 }
 0x27d   : > { %v1928_v54 = vsub.f32 %v5175_v60, %v5118_v52 }
 0x27e   : > { %v5252_v63 = vmul.f32 0.0078125, %v1930_v51 }
 0x283   : > { %v5181_v46 = vpop.xlane.xlu2 %1814  ;;  %v5183_v5 = vpop.xlane.xlu0 %1816 }
 0x284   : > { %v1932_v23 = vsub.f32 %v5181_v46, %v5144_v36  ;;  %v5187_v40 = vpop.xlane.xlu1 %1812 }
 0x286   : > { %v5354_v60 = vmul.f32 0.0078125, %v1932_v23 }
 0x28b   : > { %v5193_v10 = vpop.xlane.xlu2 %1820  ;;  %v5195_v20 = vpop.xlane.xlu0 %1822 }
 0x28c   : > { %v5199_v13 = vpop.xlane.xlu1 %1818 }
 0x293   : > { %v1843_v34 = vpop.xlane.xlu2 %1842  ;;  %v1845_v42 = vpop.xlane.xlu0 %1844 }
 0x294   : > { %v5205_v43 = vpop.xlane.xlu1 %1824 }
 0x29b   : > { %v1849_v8 = vpop.xlane.xlu2 %1848  ;;  %v5209_v0 = vpop.xlane.xlu0 %1850 }
 0x29c   : > { %v1847_v1 = vpop.xlane.xlu1 %1846 }
 0x2a3   : > { %v5211_v16 = vpop.xlane.xlu2 %1854  ;;  %v5213_v44 = vpop.xlane.xlu0 %1856 }
 0x2a4   : > { %v1853_v41 = vpop.xlane.xlu1 %1852 }
 0x2ab   : > { %v5215_v30 = vpop.xlane.xlu2 %1860  ;;  %v5217_v26 = vpop.xlane.xlu0 %1862 }
 0x2ac   : > { %v5219_v22 = vpop.xlane.xlu1 %1858 }
 0x2b3   : > { %v5221_v27 = vpop.xlane.xlu2 %1866  ;;  %v5223_v11 = vpop.xlane.xlu0 %1868 }
 0x2b4   : > { %v5225_v15 = vpop.xlane.xlu1 %1864 }
 0x2bb   : > { %v5227_v49 = vpop.xlane.xlu2 %1872  ;;  %v1891_v35 = vpop.xlane.xlu0 %1890 }
 0x2bc   : > { %v5229_v53 = vpop.xlane.xlu1 %1870  ;;  %v1954_v56 = vsub.f32 %v1843_v34, %v1891_v35 }
 0x2be   : > { %v1970_v21 = vmul.f32 0.00390625, %v1954_v56  ;;  %v5250_v56 = vmul.f32 0.0078125, %v1929_v62 }
 0x2c0   : > { %2828 = vrcp.f32 %v1970_v21  ;;  %vm1991_vm0 = vweird.f32 %v1970_v21 }
 0x2c3   : > { %v1895_v48 = vpop.xlane.xlu2 %1894  ;;  %v1897_v47 = vpop.xlane.xlu0 %1896 }
 0x2c4   : > { %v1956_v57 = vsub.f32 %v1847_v1, %v1895_v48  ;;  %v1893_v59 = vpop.xlane.xlu1 %1892  ;;  %v1957_v25 = vsub.f32 %v1849_v8, %v1897_v47  ;;  %v1995_v1 = vand.u32 2147483647, %v1970_v21  ;;  %v1997_v8 = vand.u32 2147483648, %v1970_v21 }
 0x2c5   : > { %v1955_v28 = vsub.f32 %v1845_v42, %v1893_v59  ;;  %v5247_v42 = vmul.f32 0.0078125, %v1925_v39 }
 0x2c6   : > { %v2829_v38 = vpop.eup %2828  ;;  %v5234_v4 = vmul.f32 0.00390625, %v1956_v57  ;;  %v5236_v17 = vmul.f32 0.00390625, %v1957_v25  ;;  %vm5257_vm2 = vcmp.eq.f32.partialorder %v1995_v1, 8.507059e+37 }
 0x2c7   : > { %v1987_v34 = vmul.f32 %v2829_v38, %v1970_v21  ;;  %v5240_v35 = vmul.f32 0.00390625, %v1955_v28  ;;  %vm1992_vm1 = vweird.f32 %v2829_v38  ;;  %v1998_v28 = vor.u32 1.1754944e-38, %v1997_v8 }
 0x2c8   : > { %2830 = vrcp.f32 %v5234_v4  ;;  %v2027_v3 = vand.u32 2147483648, %v5234_v4  ;;  %v2025_v50 = vand.u32 2147483647, %v5234_v4  ;;  %vm2021_vm3 = vweird.f32 %v5234_v4  ;;  %vm1993_vm4 = vmor %vm1991_vm0, %vm1992_vm1 }
 0x2c9   : > { %v1988_v18 = vsub.f32 1.0, %v1987_v34  ;;  %2832 = vrcp.f32 %v5240_v35  ;;  %v2010_v62 = vand.u32 2147483647, %v5240_v35  ;;  %v2012_v51 = vand.u32 2147483648, %v5240_v35 }
 0x2ca   : > { %2834 = vrcp.f32 %v5236_v17  ;;  %v2028_v33 = vor.u32 1.1754944e-38, %v2027_v3  ;;  %vm2006_vm5 = vweird.f32 %v5240_v35  ;;  %v2040_v1 = vand.u32 2147483647, %v5236_v17 }
 0x2cb   : > { %v1989_v12 = vmul.f32 %v2829_v38, %v1988_v18  ;;  %v1901_v48 = vpop.xlane.xlu2 %1900  ;;  %v1903_v39 = vpop.xlane.xlu0 %1902  ;;  %vm5272_vm6 = vcmp.eq.f32.partialorder %v2025_v50, 8.507059e+37  ;;  %vm2036_vm7 = vweird.f32 %v5236_v17  ;;  %vm5282_vm8 = vcmp.eq.f32.partialorder %v2010_v62, 8.507059e+37 }
 0x2cc   : > { %v1959_v57 = vsub.f32 %v1853_v41, %v1901_v48  ;;  %v1899_v59 = vpop.xlane.xlu1 %1898  ;;  %v1960_v19 = vsub.f32 %v5211_v16, %v1903_v39  ;;  %vm5289_vm10 = vcmp.eq.f32.partialorder %v2040_v1, 8.507059e+37 }
 0x2cd   : > { %v1990_v25 = vadd.f32 %v2829_v38, %v1989_v12  ;;  %v1958_v34 = vsub.f32 %v5209_v0, %v1899_v59 }
 0x2ce   : > { %v2831_v18 = vpop.eup %2830  ;;  %v5268_v29 = vmul.f32 0.00390625, %v1959_v57 }
 0x2cf   : > { %v2833_v41 = vpop.eup %2832  ;;  %v1994_v48 = vsel %vm1993_vm4, %v2829_v38, %v1990_v25  ;;  %v2017_v8 = vmul.f32 %v2831_v18, %v5234_v4  ;;  %v5277_v0 = vmul.f32 0.00390625, %v1958_v34  ;;  %v2013_v38 = vor.u32 1.1754944e-38, %v2012_v51 }
 0x2d0   : > { %v2835_v21 = vpop.eup %2834  ;;  %v1999_v3 = vsel %vm5257_vm2, %v1998_v28, %v1994_v48  ;;  %v2002_v57 = vmul.f32 %v2833_v41, %v5240_v35  ;;  %2836 = vrcp.f32 %v5268_v29  ;;  %v2042_v25 = vand.u32 2147483648, %v5236_v17 }
 0x2d1   : > { %v2000_v50 = vmul.f32 %v1999_v3, %v1938_v7  ;;  %v2018_v39 = vsub.f32 1.0, %v2017_v8  ;;  %v2032_v59 = vmul.f32 %v2835_v21, %v5236_v17  ;;  %vm2022_vm9 = vweird.f32 %v2831_v18 }
 0x2d2   : > { %v2003_v34 = vsub.f32 1.0, %v2002_v57  ;;  %v5293_v28 = vmul.f32 0.00390625, %v1960_v19  ;;  %2838 = vrcp.f32 %v5277_v0  ;;  %vm2007_vm11 = vweird.f32 %v2833_v41  ;;  %vm2023_vm13 = vmor %vm2021_vm3, %vm2022_vm9 }
 0x2d3   : > { %v2226_v62 = vsub.f32 0.0, %v2000_v50  ;;  %v2019_v48 = vmul.f32 %v2831_v18, %v2018_v39  ;;  %v2033_v14 = vsub.f32 1.0, %v2032_v59  ;;  %v2070_v7 = vand.u32 2147483647, %v5268_v29  ;;  %vm2008_vm15 = vmor %vm2006_vm5, %vm2007_vm11  ;;  %v1907_v52 = vpop.xlane.xlu2 %1906 }
 0x2d4   : > { %v2004_v51 = vmul.f32 %v2833_v41, %v2003_v34  ;;  %v2072_v8 = vand.u32 2147483648, %v5268_v29  ;;  %vm2037_vm12 = vweird.f32 %v2835_v21  ;;  %v2043_v50 = vor.u32 1.1754944e-38, %v2042_v25 }
 0x2d5   : > { %v2242_v3 = vmul.f32 1.442695, %v2226_v62  ;;  %v2020_v55 = vadd.f32 %v2831_v18, %v2019_v48  ;;  %v2034_v57 = vmul.f32 %v2835_v21, %v2033_v14  ;;  %vm2066_vm14 = vweird.f32 %v5268_v29  ;;  %vm2038_vm0 = vmor %vm2036_vm7, %vm2037_vm12 }
 0x2d6   : > { %v2837_v1 = vpop.eup %2836  ;;  %v2005_v19 = vadd.f32 %v2833_v41, %v2004_v51  ;;  %2840 = vrcp.f32 %v5293_v28  ;;  %vm5311_vm1 = vcmp.eq.f32.partialorder %v2070_v7, 8.507059e+37  ;;  %v2073_v62 = vor.u32 1.1754944e-38, %v2072_v8 }
 0x2d7   : > { %2842 = vpow2.f32 %v2242_v3  ;;  %v2024_v39 = vsel %vm2023_vm13, %v2831_v18, %v2020_v55  ;;  %v2035_v59 = vadd.f32 %v2835_v21, %v2034_v57  ;;  %v2062_v14 = vmul.f32 %v2837_v1, %v5268_v29 }
 0x2d8   : > { %v2029_v34 = vsel %vm5272_vm6, %v2028_v33, %v2024_v39  ;;  %v2009_v4 = vsel %vm2008_vm15, %v2833_v41, %v2005_v19  ;;  %v2839_v55 = vpop.eup %2838  ;;  %vm2051_vm2 = vweird.f32 %v5277_v0  ;;  %vm2067_vm3 = vweird.f32 %v2837_v1 }
 0x2d9   : > { %v2030_v18 = vmul.f32 %v2029_v34, %v5238_v9  ;;  %v2014_v35 = vsel %vm5282_vm8, %v2013_v38, %v2009_v4  ;;  %v2039_v48 = vsel %vm2038_vm0, %v2835_v21, %v2035_v59  ;;  %v2063_v51 = vsub.f32 1.0, %v2062_v14  ;;  %vm2068_vm4 = vmor %vm2066_vm14, %vm2067_vm3 }
 0x2da   : > { %v2015_v12 = vmul.f32 %v2014_v35, %v5232_v58  ;;  %v2044_v33 = vsel %vm5289_vm10, %v2043_v50, %v2039_v48  ;;  %v2047_v17 = vmul.f32 %v2839_v55, %v5277_v0  ;;  %v2055_v21 = vand.u32 2147483647, %v5277_v0 }
 0x2db   : > { %v2228_v41 = vsub.f32 0.0, %v2030_v18  ;;  %v2045_v7 = vmul.f32 %v2044_v33, %v5247_v42  ;;  %v2064_v8 = vmul.f32 %v2837_v1, %v2063_v51  ;;  %v2057_v58 = vand.u32 2147483648, %v5277_v0 }
 0x2dc   : > { %v2841_v9 = vpop.eup %2840  ;;  %v2227_v3 = vsub.f32 0.0, %v2015_v12  ;;  %v2048_v16 = vsub.f32 1.0, %v2047_v17  ;;  %vm2052_vm5 = vweird.f32 %v2839_v55  ;;  %v2085_v18 = vand.u32 2147483647, %v5293_v28 }
 0x2dd   : > { %v2843_v38 = vpop.eup %2842  ;;  %v2246_v47 = vmul.f32 1.442695, %v2228_v41  ;;  %v2229_v57 = vsub.f32 0.0, %v2045_v7  ;;  %v2065_v19 = vadd.f32 %v2837_v1, %v2064_v8  ;;  %v2077_v50 = vmul.f32 %v2841_v9, %v5293_v28  ;;  %vm2053_vm7 = vmor %vm2051_vm2, %vm2052_vm5 }
 0x2de   : > { %v5327_v39 = vadd.f32 1.0, %v2843_v38  ;;  %v2244_v59 = vmul.f32 1.442695, %v2227_v3  ;;  %v2049_v42 = vmul.f32 %v2839_v55, %v2048_v16  ;;  %vm2082_vm6 = vweird.f32 %v2841_v9 }
 0x2df   : > { %2844 = vpow2.f32 %v2246_v47  ;;  %v2248_v14 = vmul.f32 1.442695, %v2229_v57  ;;  %v2069_v34 = vsel %vm2068_vm4, %v2837_v1, %v2065_v19  ;;  %v2078_v4 = vsub.f32 1.0, %v2077_v50  ;;  %v5390_v50 = vpop.xlane.xlu1 %1904 }
 0x2e0   : > { %2846 = vrcp.f32 %v5327_v39  ;;  %v2087_v35 = vand.u32 2147483648, %v5293_v28  ;;  %v2074_v29 = vsel %vm5311_vm1, %v2073_v62, %v2069_v34  ;;  %v2050_v48 = vadd.f32 %v2839_v55, %v2049_v42 }
 0x2e1   : > { %2848 = vpow2.f32 %v2244_v59  ;;  %v2079_v51 = vmul.f32 %v2841_v9, %v2078_v4  ;;  %v1944_v1 = vmul.f32 0.0078125, %v1928_v54  ;;  %v2075_v12 = vmul.f32 %v2074_v29, %v5244_v61  ;;  %v5402_v4 = vpop.xlane.xlu0 %1908 }
 0x2e2   : > { %2850 = vpow2.f32 %v2248_v14  ;;  %v2058_v33 = vor.u32 1.1754944e-38, %v2057_v58  ;;  %v2054_v25 = vsel %vm2053_vm7, %v2839_v55, %v2050_v48  ;;  %vm2056_vm8 = vcmp.eq.f32.partialorder %v2055_v21, 8.507059e+37 }
 0x2e3   : > { %v2080_v62 = vadd.f32 %v2841_v9, %v2079_v51  ;;  %vm2081_vm9 = vweird.f32 %v5293_v28  ;;  %v2231_v54 = vsub.f32 0.0, %v2075_v12  ;;  %v2088_v0 = vor.u32 1.1754944e-38, %v2087_v35 }
 0x2e4   : > { %v2059_v61 = vsel %vm2056_vm8, %v2058_v33, %v2054_v25  ;;  %vm2083_vm10 = vmor %vm2081_vm9, %vm2082_vm6  ;;  %v5903_v55 = vsub.f32 %v5183_v5, %v5139_v37  ;;  %vm2086_vm11 = vcmp.eq.f32.partialorder %v2085_v18, 8.507059e+37  ;;  %v1962_v3 = vsub.f32 %v5219_v22, %v1907_v52 }
 0x2e5   : > { %v2845_v17 = vpop.eup %2844  ;;  %v2060_v28 = vmul.f32 %v2059_v61, %v5242_v6  ;;  %v2084_v7 = vsel %vm2083_vm10, %v2841_v9, %v2080_v62  ;;  %v2252_v23 = vmul.f32 1.442695, %v2231_v54  ;;  %v5904_v21 = vsub.f32 %v5187_v40, %v5132_v31 }
 0x2e6   : > { %v5360_v41 = vmul.f32 0.0078125, %v5903_v55  ;;  %v2847_v36 = vpop.eup %2846  ;;  %v5363_v46 = vadd.f32 1.0, %v2845_v17  ;;  %v2089_v8 = vsel %vm2086_vm11, %v2088_v0, %v2084_v7  ;;  %v5905_v38 = vsub.f32 %v5193_v10, %v5153_v2 }
 0x2e7   : > { %v2849_v16 = vpop.eup %2848  ;;  %v5369_v58 = vmul.f32 0.0078125, %v5904_v21  ;;  %v2291_v37 = vmul.f32 %v2847_v36, %v5327_v39  ;;  %v2230_v5 = vsub.f32 0.0, %v2060_v28  ;;  %v2090_v6 = vmul.f32 %v2089_v8, %v1944_v1 }
 0x2e8   : > { %v2851_v9 = vpop.eup %2850  ;;  %v5381_v22 = vmul.f32 0.0078125, %v5905_v38  ;;  %v2299_v47 = vand.u32 2147483647, %v5327_v39  ;;  %v2301_v31 = vand.u32 2147483648, %v5327_v39  ;;  %2852 = vrcp.f32 %v5363_v46 }
 0x2e9   : > { %v2292_v40 = vsub.f32 1.0, %v2291_v37  ;;  %v5386_v57 = vadd.f32 1.0, %v2849_v16  ;;  %v5388_v19 = vadd.f32 1.0, %v2851_v9  ;;  %2854 = vpow2.f32 %v2252_v23 }
 0x2ea   : > { %v5906_v59 = vsub.f32 %v5199_v13, %v5141_v24  ;;  %v2250_v10 = vmul.f32 1.442695, %v2230_v5  ;;  %v2232_v42 = vsub.f32 0.0, %v2090_v6  ;;  %v5397_v14 = vmul.f32 0.00390625, %v1962_v3 }
 0x2eb   : > { %v2293_v34 = vmul.f32 %v2847_v36, %v2292_v40  ;;  %vm2295_vm12 = vweird.f32 %v5327_v39  ;;  %vm2296_vm13 = vweird.f32 %v2847_v36  ;;  %2856 = vrcp.f32 %v5386_v57 }
 0x2ec   : > { %v5395_v2 = vmul.f32 0.0078125, %v5906_v59  ;;  %vm5404_vm14 = vcmp.eq.f32.partialorder %v2299_v47, 8.507059e+37  ;;  %v2302_v24 = vor.u32 1.1754944e-38, %v2301_v31  ;;  %2858 = vrcp.f32 %v5388_v19  ;;  %vm2297_vm15 = vmor %vm2295_vm12, %vm2296_vm13 }
 0x2ed   : > { %v1961_v13 = vsub.f32 %v5213_v44, %v5390_v50  ;;  %v2294_v35 = vadd.f32 %v2847_v36, %v2293_v34  ;;  %v2329_v29 = vand.u32 2147483647, %v5363_v46  ;;  %v2331_v39 = vand.u32 2147483648, %v5363_v46 }
 0x2ee   : > { %2860 = vpow2.f32 %v2250_v10  ;;  %v2853_v48 = vpop.eup %2852  ;;  %vm2325_vm0 = vweird.f32 %v5363_v46  ;;  %v2254_v51 = vmul.f32 1.442695, %v2232_v42  ;;  %v1963_v1 = vsub.f32 %v5215_v30, %v5402_v4 }
 0x2ef   : > { %2862 = vrcp.f32 %v5397_v14  ;;  %v2855_v12 = vpop.eup %2854  ;;  %v2298_v33 = vsel %vm2297_vm15, %v2847_v36, %v2294_v35  ;;  %v2321_v25 = vmul.f32 %v2853_v48, %v5363_v46  ;;  %v2314_v62 = vand.u32 2147483647, %v5386_v57 }
 0x2f0   : > { %v2316_v52 = vand.u32 2147483648, %v5386_v57  ;;  %v2303_v54 = vsel %vm5404_vm14, %v2302_v24, %v2298_v33  ;;  %v2344_v61 = vand.u32 2147483647, %v5388_v19  ;;  %v5428_v0 = vadd.f32 1.0, %v2855_v12 }
 0x2f1   : > { %2864 = vpow2.f32 %v2254_v51  ;;  %v2857_v17 = vpop.eup %2856  ;;  %2530 = vst [vmem:[%s5416_s22] sm:$0xff] %v2303_v54  ;;  %v2322_v55 = vsub.f32 1.0, %v2321_v25  ;;  %vm5431_vm1 = vcmp.eq.f32.partialorder %v2329_v29, 8.507059e+37  ;;  %v2332_v7 = vor.u32 1.1754944e-38, %v2331_v39 }
 0x2f2   : > { %v2346_v36 = vand.u32 2147483648, %v5388_v19  ;;  %v2859_v23 = vpop.eup %2858  ;;  %v2306_v8 = vmul.f32 %v2857_v17, %v5386_v57  ;;  %vm2310_vm2 = vweird.f32 %v5386_v57  ;;  %vm2340_vm3 = vweird.f32 %v5388_v19 }
 0x2f3   : > { %2866 = vrcp.f32 %v5428_v0  ;;  %v2323_v16 = vmul.f32 %v2853_v48, %v2322_v55  ;;  %vm2326_vm4 = vweird.f32 %v2853_v48  ;;  %vm5440_vm5 = vcmp.eq.f32.partialorder %v2314_v62, 8.507059e+37 }
 0x2f4   : > { %v2861_v3 = vpop.eup %2860  ;;  %v2336_v37 = vmul.f32 %v2859_v23, %v5388_v19  ;;  %v2307_v6 = vsub.f32 1.0, %v2306_v8  ;;  %v2317_v9 = vor.u32 1.1754944e-38, %v2316_v52  ;;  %vm5447_vm6 = vcmp.eq.f32.partialorder %v2344_v61, 8.507059e+37  ;;  %vm2327_vm7 = vmor %vm2325_vm0, %vm2326_vm4  ;;  %v1913_v8 = vpop.xlane.xlu2 %1912 }
 0x2f5   : > { %v5445_v5 = vpop.eup %2862  ;;  %v5451_v47 = vadd.f32 1.0, %v2861_v3  ;;  %v2324_v31 = vadd.f32 %v2853_v48, %v2323_v16  ;;  %v2347_v59 = vor.u32 1.1754944e-38, %v2346_v36  ;;  %vm2311_vm8 = vweird.f32 %v2857_v17 }
 0x2f6   : > { %v2337_v40 = vsub.f32 1.0, %v2336_v37  ;;  %v2107_v10 = vmul.f32 %v5445_v5, %v5397_v14  ;;  %v2308_v34 = vmul.f32 %v2857_v17, %v2307_v6  ;;  %vm2111_vm9 = vweird.f32 %v5397_v14  ;;  %vm2312_vm11 = vmor %vm2310_vm2, %vm2311_vm8 }
 0x2f7   : > { %v2865_v42 = vpop.eup %2864  ;;  %2868 = vrcp.f32 %v5451_v47  ;;  %v2115_v18 = vand.u32 2147483647, %v5397_v14  ;;  %v2328_v24 = vsel %vm2327_vm7, %v2853_v48, %v2324_v31  ;;  %vm2341_vm10 = vweird.f32 %v2859_v23 }
 0x2f8   : > { %v2338_v35 = vmul.f32 %v2859_v23, %v2337_v40  ;;  %v2117_v29 = vand.u32 2147483648, %v5397_v14  ;;  %v2333_v51 = vsel %vm5431_vm1, %v2332_v7, %v2328_v24  ;;  %v2309_v46 = vadd.f32 %v2857_v17, %v2308_v34  ;;  %vm2342_vm12 = vmor %vm2340_vm3, %vm2341_vm10 }
 0x2f9   : > { %v2867_v39 = vpop.eup %2866  ;;  %v5463_v12 = vadd.f32 1.0, %v2865_v42  ;;  %v2108_v33 = vsub.f32 1.0, %v2107_v10  ;;  %2532 = vst [vmem:[%s5416_s22 + $0x10] sm:$0xff] %v2333_v51  ;;  %v2374_v62 = vand.u32 2147483647, %v5428_v0  ;;  %v5473_v52 = vmul.f32 0.00390625, %v1961_v13 }
 0x2fa   : > { %v2339_v25 = vadd.f32 %v2859_v23, %v2338_v35  ;;  %v2366_v48 = vmul.f32 %v2867_v39, %v5428_v0  ;;  %v2313_v54 = vsel %vm2312_vm11, %v2857_v17, %v2309_v46  ;;  %vm2370_vm13 = vweird.f32 %v5428_v0 }
 0x2fb   : > { %v2376_v57 = vand.u32 2147483648, %v5428_v0  ;;  %2870 = vrcp.f32 %v5463_v12  ;;  %v2318_v61 = vsel %vm5440_vm5, %v2317_v9, %v2313_v54  ;;  %v2359_v44 = vand.u32 2147483647, %v5451_v47 }
 0x2fc   : > { %v2343_v55 = vsel %vm2342_vm12, %v2859_v23, %v2339_v25  ;;  %v2367_v28 = vsub.f32 1.0, %v2366_v48  ;;  %2531 = vst [vmem:[%s5416_s22 + $0x8] sm:$0xff] %v2318_v61  ;;  %v2109_v19 = vmul.f32 %v5445_v5, %v2108_v33  ;;  %vm2112_vm14 = vweird.f32 %v5445_v5  ;;  %v1911_v25 = vpop.xlane.xlu1 %1910 }
 0x2fd   : > { %v2869_v50 = vpop.eup %2868  ;;  %v2348_v13 = vsel %vm5447_vm6, %v2347_v59, %v2343_v55  ;;  %vm5488_vm15 = vcmp.eq.f32.partialorder %v2115_v18, 8.507059e+37  ;;  %vm2371_vm0 = vweird.f32 %v2867_v39  ;;  %vm5493_vm1 = vcmp.eq.f32.partialorder %v2374_v62, 8.507059e+37  ;;  %vm2113_vm4 = vmor %vm2111_vm9, %vm2112_vm14 }
 0x2fe   : > { %2533 = vst [vmem:[%s5416_s22 + $0x18] sm:$0xff] %v2348_v13  ;;  %v2368_v7 = vmul.f32 %v2867_v39, %v2367_v28  ;;  %v2351_v23 = vmul.f32 %v2869_v50, %v5451_v47  ;;  %v2377_v3 = vor.u32 1.1754944e-38, %v2376_v57  ;;  %vm2355_vm2 = vweird.f32 %v5451_v47  ;;  %vm2372_vm5 = vmor %vm2370_vm13, %vm2371_vm0 }
 0x2ff   : > { %v2110_v16 = vadd.f32 %v5445_v5, %v2109_v19  ;;  %2872 = vrcp.f32 %v5473_v52  ;;  %vm5501_vm3 = vcmp.eq.f32.partialorder %v2359_v44, 8.507059e+37  ;;  %v2361_v9 = vand.u32 2147483648, %v5451_v47 }
 0x300   : > { %v2369_v21 = vadd.f32 %v2867_v39, %v2368_v7  ;;  %v2352_v37 = vsub.f32 1.0, %v2351_v23  ;;  %v2118_v40 = vor.u32 1.1754944e-38, %v2117_v29  ;;  %v5516_v59 = vmul.f32 0.00390625, %v1963_v1 }
 0x301   : > { %v2871_v38 = vpop.eup %2870  ;;  %v2114_v31 = vsel %vm2113_vm4, %v5445_v5, %v2110_v16  ;;  %v1965_v10 = vsub.f32 %v5225_v15, %v1913_v8  ;;  %vm2356_vm6 = vweird.f32 %v2869_v50  ;;  %v2389_v0 = vand.u32 2147483647, %v5463_v12 }
 0x302   : > { %v2373_v42 = vsel %vm2372_vm5, %v2867_v39, %v2369_v21  ;;  %v2353_v34 = vmul.f32 %v2869_v50, %v2352_v37  ;;  %v2381_v14 = vmul.f32 %v2871_v38, %v5463_v12  ;;  %v2391_v5 = vand.u32 2147483648, %v5463_v12  ;;  %vm2357_vm7 = vmor %vm2355_vm2, %vm2356_vm6 }
 0x303   : > { %v2378_v18 = vsel %vm5493_vm1, %v2377_v3, %v2373_v42  ;;  %v2119_v24 = vsel %vm5488_vm15, %v2118_v40, %v2114_v31  ;;  %2874 = vrcp.f32 %v5516_v59  ;;  %v2362_v35 = vor.u32 1.1754944e-38, %v2361_v9  ;;  %v1919_v42 = vpop.xlane.xlu2 %1918 }
 0x304   : > { %2535 = vst [vmem:[%s5416_s22 + $0x28] sm:$0xff] %v2378_v18  ;;  %v2354_v30 = vadd.f32 %v2869_v50, %v2353_v34  ;;  %v2382_v4 = vsub.f32 1.0, %v2381_v14  ;;  %v2120_v15 = vmul.f32 %v2119_v24, %v5252_v63  ;;  %vm2385_vm8 = vweird.f32 %v5463_v12  ;;  %v1915_v63 = vpop.xlane.xlu0 %1914  ;;  %v5574_v18 = vpop.xlane.xlu1 %1916 }
 0x305   : > { %v2873_v1 = vpop.eup %2872  ;;  %vm2386_vm9 = vweird.f32 %v2871_v38  ;;  %v5532_v29 = vmul.f32 0.00390625, %v1965_v10  ;;  %vm5537_vm10 = vcmp.eq.f32.partialorder %v2389_v0, 8.507059e+37  ;;  %v2392_v62 = vor.u32 1.1754944e-38, %v2391_v5 }
 0x306   : > { %v2358_v39 = vsel %vm2357_vm7, %v2869_v50, %v2354_v30  ;;  %v2383_v51 = vmul.f32 %v2871_v38, %v2382_v4  ;;  %v2234_v46 = vsub.f32 0.0, %v2120_v15  ;;  %v2092_v33 = vmul.f32 %v2873_v1, %v5473_v52  ;;  %vm2387_vm11 = vmor %vm2385_vm8, %vm2386_vm9 }
 0x307   : > { %v2363_v48 = vsel %vm5501_vm3, %v2362_v35, %v2358_v39  ;;  %v2100_v54 = vand.u32 2147483647, %v5473_v52  ;;  %2876 = vrcp.f32 %v5532_v29  ;;  %vm2097_vm12 = vweird.f32 %v2873_v1 }
 0x308   : > { %2534 = vst [vmem:[%s5416_s22 + $0x20] sm:$0xff] %v2363_v48  ;;  %v2384_v57 = vadd.f32 %v2871_v38, %v2383_v51  ;;  %v2258_v61 = vmul.f32 1.442695, %v2234_v46  ;;  %v2093_v55 = vsub.f32 1.0, %v2092_v33  ;;  %v2102_v28 = vand.u32 2147483648, %v5473_v52 }
 0x309   : > { %v2130_v44 = vand.u32 2147483647, %v5516_v59  ;;  %v1964_v50 = vsub.f32 %v5217_v26, %v1911_v25  ;;  %v2875_v13 = vpop.eup %2874  ;;  %v1966_v7 = vsub.f32 %v5221_v27, %v1915_v63  ;;  %vm2096_vm13 = vweird.f32 %v5473_v52 }
 0x30a   : > { %v2388_v19 = vsel %vm2387_vm11, %v2871_v38, %v2384_v57  ;;  %2878 = vpow2.f32 %v2258_v61  ;;  %v2094_v17 = vmul.f32 %v2873_v1, %v2093_v55  ;;  %v2122_v12 = vmul.f32 %v2875_v13, %v5516_v59  ;;  %vm2098_vm15 = vmor %vm2096_vm13, %vm2097_vm12 }
 0x30b   : > { %v2393_v36 = vsel %vm5537_vm10, %v2392_v62, %v2388_v19  ;;  %v2132_v23 = vand.u32 2147483648, %v5516_v59  ;;  %vm2101_vm14 = vcmp.eq.f32.partialorder %v2100_v54, 8.507059e+37  ;;  %v5557_v3 = vmul.f32 0.00390625, %v1964_v50 }
 0x30c   : > { %2536 = vst [vmem:[%s5416_s22 + $0x30] sm:$0xff] %v2393_v36  ;;  %v2095_v8 = vadd.f32 %v2873_v1, %v2094_v17  ;;  %v5559_v26 = vmul.f32 0.00390625, %v1966_v7  ;;  %v2103_v16 = vor.u32 1.1754944e-38, %v2102_v28  ;;  %v2123_v27 = vsub.f32 1.0, %v2122_v12  ;;  %v5576_v0 = vpop.xlane.xlu0 %1920 }
 0x30d   : > { %vm2126_vm0 = vweird.f32 %v5516_v59  ;;  %vm5563_vm1 = vcmp.eq.f32.partialorder %v2130_v44, 8.507059e+37  ;;  %v2877_v52 = vpop.eup %2876  ;;  %v2160_v6 = vand.u32 2147483647, %v5532_v29  ;;  %v2162_v9 = vand.u32 2147483648, %v5532_v29 }
 0x30e   : > { %v2099_v37 = vsel %vm2098_vm15, %v2873_v1, %v2095_v8  ;;  %2880 = vrcp.f32 %v5557_v3  ;;  %v2124_v31 = vmul.f32 %v2875_v13, %v2123_v27  ;;  %v2133_v40 = vor.u32 1.1754944e-38, %v2132_v23 }
 0x30f   : > { %v2104_v38 = vsel %vm2101_vm14, %v2103_v16, %v2099_v37  ;;  %v2152_v10 = vmul.f32 %v2877_v52, %v5532_v29  ;;  %vm2127_vm2 = vweird.f32 %v2875_v13  ;;  %vm2156_vm3 = vweird.f32 %v5532_v29 }
 0x310   : > { %v2879_v34 = vpop.eup %2878  ;;  %v2105_v14 = vmul.f32 %v2104_v38, %v5250_v56  ;;  %2882 = vrcp.f32 %v5559_v26  ;;  %v2125_v24 = vadd.f32 %v2875_v13, %v2124_v31  ;;  %v2145_v4 = vand.u32 2147483647, %v5557_v3  ;;  %vm2128_vm5 = vmor %vm2126_vm0, %vm2127_vm2 }
 0x311   : > { %v5578_v5 = vadd.f32 1.0, %v2879_v34  ;;  %v2153_v30 = vsub.f32 1.0, %v2152_v10  ;;  %vm5581_vm4 = vcmp.eq.f32.partialorder %v2160_v6, 8.507059e+37  ;;  %v2163_v56 = vor.u32 1.1754944e-38, %v2162_v9 }
 0x312   : > { %v2233_v15 = vsub.f32 0.0, %v2105_v14  ;;  %v1968_v35 = vsub.f32 %v5229_v53, %v1919_v42  ;;  %v2147_v39 = vand.u32 2147483648, %v5557_v3  ;;  %v1967_v51 = vsub.f32 %v5223_v11, %v5574_v18 }
 0x313   : > { %2884 = vrcp.f32 %v5578_v5  ;;  %v1969_v46 = vsub.f32 %v5227_v49, %v5576_v0  ;;  %v2129_v63 = vsel %vm2128_vm5, %v2875_v13, %v2125_v24  ;;  %v2154_v48 = vmul.f32 %v2877_v52, %v2153_v30 }
 0x314   : > { %v2881_v33 = vpop.eup %2880  ;;  %v2256_v25 = vmul.f32 1.442695, %v2233_v15  ;;  %vm2157_vm6 = vweird.f32 %v2877_v52  ;;  %v2134_v53 = vsel %vm5563_vm1, %v2133_v40, %v2129_v63  ;;  %vm2141_vm7 = vweird.f32 %v5557_v3 }
 0x315   : > { %v2137_v47 = vmul.f32 %v2881_v33, %v5557_v3  ;;  %vm5598_vm8 = vcmp.eq.f32.partialorder %v2145_v4, 8.507059e+37  ;;  %v2135_v62 = vmul.f32 %v2134_v53, %v5369_v58  ;;  %v2155_v54 = vadd.f32 %v2877_v52, %v2154_v48  ;;  %vm2158_vm10 = vmor %vm2156_vm3, %vm2157_vm6 }
 0x316   : > { %v2883_v11 = vpop.eup %2882  ;;  %2886 = vpow2.f32 %v2256_v25  ;;  %vm2171_vm9 = vweird.f32 %v5559_v26  ;;  %v2148_v61 = vor.u32 1.1754944e-38, %v2147_v39  ;;  %v2175_v28 = vand.u32 2147483647, %v5559_v26 }
 0x317   : > { %v2138_v57 = vsub.f32 1.0, %v2137_v47  ;;  %v2167_v55 = vmul.f32 %v2883_v11, %v5559_v26  ;;  %v2235_v44 = vsub.f32 0.0, %v2135_v62  ;;  %v2159_v50 = vsel %vm2158_vm10, %v2877_v52, %v2155_v54 }
 0x318   : > { %v2177_v13 = vand.u32 2147483648, %v5559_v26  ;;  %v5609_v19 = vmul.f32 0.00390625, %v1968_v35  ;;  %v2164_v58 = vsel %vm5581_vm4, %v2163_v56, %v2159_v50  ;;  %vm2142_vm11 = vweird.f32 %v2881_v33 }
 0x319   : > { %v2885_v17 = vpop.eup %2884  ;;  %v2139_v7 = vmul.f32 %v2881_v33, %v2138_v57  ;;  %v2168_v29 = vsub.f32 1.0, %v2167_v55  ;;  %vm2415_vm12 = vweird.f32 %v5578_v5  ;;  %v2260_v12 = vmul.f32 1.442695, %v2235_v44  ;;  %vm2143_vm13 = vmor %vm2141_vm7, %vm2142_vm11 }
 0x31a   : > { %v2411_v36 = vmul.f32 %v2885_v17, %v5578_v5  ;;  %v2165_v23 = vmul.f32 %v2164_v58, %v5360_v41  ;;  %v2419_v8 = vand.u32 2147483647, %v5578_v5  ;;  %2888 = vrcp.f32 %v5609_v19 }
 0x31b   : > { %v2140_v16 = vadd.f32 %v2881_v33, %v2139_v7  ;;  %v2169_v27 = vmul.f32 %v2883_v11, %v2168_v29  ;;  %2890 = vpow2.f32 %v2260_v12  ;;  %vm2172_vm14 = vweird.f32 %v2883_v11 }
 0x31c   : > { %v2887_v21 = vpop.eup %2886  ;;  %v2412_v52 = vsub.f32 1.0, %v2411_v36  ;;  %v2237_v37 = vsub.f32 0.0, %v2165_v23  ;;  %v2421_v6 = vand.u32 2147483648, %v5578_v5  ;;  %vm2416_vm15 = vweird.f32 %v2885_v17  ;;  %vm2173_vm0 = vmor %vm2171_vm9, %vm2172_vm14 }
 0x31d   : > { %v5621_v9 = vadd.f32 1.0, %v2887_v21  ;;  %v2144_v38 = vsel %vm2143_vm13, %v2881_v33, %v2140_v16  ;;  %v2170_v41 = vadd.f32 %v2883_v11, %v2169_v27  ;;  %vm2176_vm1 = vcmp.eq.f32.partialorder %v2175_v28, 8.507059e+37  ;;  %vm2417_vm2 = vmor %vm2415_vm12, %vm2416_vm15 }
 0x31e   : > { %v2413_v31 = vmul.f32 %v2885_v17, %v2412_v52  ;;  %v2264_v40 = vmul.f32 1.442695, %v2237_v37  ;;  %v2149_v10 = vsel %vm5598_vm8, %v2148_v61, %v2144_v38  ;;  %v2178_v3 = vor.u32 1.1754944e-38, %v2177_v13 }
 0x31f   : > { %2892 = vrcp.f32 %v5621_v9  ;;  %v5628_v42 = vmul.f32 0.00390625, %v1967_v51  ;;  %v2150_v14 = vmul.f32 %v2149_v10, %v5354_v60  ;;  %v2174_v18 = vsel %vm2173_vm0, %v2883_v11, %v2170_v41 }
 0x320   : > { %v2414_v34 = vadd.f32 %v2885_v17, %v2413_v31  ;;  %2894 = vpow2.f32 %v2264_v40  ;;  %v5631_v24 = vpop.eup %2888  ;;  %v5929_v30 = vsub.f32 %v5195_v20, %v5149_v45  ;;  %vm2420_vm3 = vcmp.eq.f32.partialorder %v2419_v8, 8.507059e+37 }
 0x321   : > { %v2422_v26 = vor.u32 1.1754944e-38, %v2421_v6  ;;  %v2179_v15 = vsel %vm2176_vm1, %v2178_v3, %v2174_v18  ;;  %v2891_v1 = vpop.eup %2890  ;;  %v2236_v35 = vsub.f32 0.0, %v2150_v14  ;;  %v2197_v39 = vmul.f32 %v5631_v24, %v5609_v19 }
 0x322   : > { %v5636_v4 = vmul.f32 0.0078125, %v5929_v30  ;;  %v2418_v56 = vsel %vm2417_vm2, %v2885_v17, %v2414_v34  ;;  %v2180_v60 = vmul.f32 %v2179_v15, %v5395_v2  ;;  %v5930_v51 = vsub.f32 %v5205_v43, %v5151_v32 }
 0x323   : > { %v2423_v20 = vsel %vm2420_vm3, %v2422_v26, %v2418_v56  ;;  %v5648_v33 = vadd.f32 1.0, %v2891_v1  ;;  %2896 = vrcp.f32 %v5628_v42  ;;  %v2262_v5 = vmul.f32 1.442695, %v2236_v35 }
 0x324   : > { %v5646_v45 = vmul.f32 0.0078125, %v5930_v51  ;;  %2538 = vst [vmem:[%s5416_s22 + $0x40] sm:$0xff] %v2423_v20  ;;  %v2238_v25 = vsub.f32 0.0, %v2180_v60  ;;  %v2198_v63 = vsub.f32 1.0, %v2197_v39  ;;  %v5655_v2 = vmul.f32 0.00390625, %v1969_v46 }
 0x325   : > { %v2893_v48 = vpop.eup %2892  ;;  %v2404_v53 = vand.u32 2147483647, %v5621_v9  ;;  %2898 = vrcp.f32 %v5648_v33  ;;  %vm2201_vm4 = vweird.f32 %v5609_v19  ;;  %v2205_v32 = vand.u32 2147483647, %v5609_v19 }
 0x326   : > { %v2895_v43 = vpop.eup %2894  ;;  %v2396_v47 = vmul.f32 %v2893_v48, %v5621_v9  ;;  %2900 = vpow2.f32 %v2262_v5  ;;  %v2266_v59 = vmul.f32 1.442695, %v2238_v25  ;;  %v2207_v11 = vand.u32 2147483648, %v5609_v19 }
 0x327   : > { %v2406_v49 = vand.u32 2147483648, %v5621_v9  ;;  %v2436_v0 = vand.u32 2147483648, %v5648_v33  ;;  %v5665_v46 = vadd.f32 1.0, %v2895_v43  ;;  %v2199_v62 = vmul.f32 %v5631_v24, %v2198_v63 }
 0x328   : > { %v2397_v54 = vsub.f32 1.0, %v2396_v47  ;;  %v2434_v57 = vand.u32 2147483647, %v5648_v33  ;;  %2902 = vpow2.f32 %v2266_v59  ;;  %vm2202_vm5 = vweird.f32 %v5631_v24 }
 0x329   : > { %v5670_v61 = vpop.eup %2896  ;;  %vm2400_vm6 = vweird.f32 %v5621_v9  ;;  %vm5673_vm7 = vcmp.eq.f32.partialorder %v2404_v53, 8.507059e+37  ;;  %2904 = vrcp.f32 %v5665_v46  ;;  %vm5678_vm8 = vcmp.eq.f32.partialorder %v2205_v32, 8.507059e+37  ;;  %vm2203_vm11 = vmor %vm2201_vm4, %vm2202_vm5 }
 0x32a   : > { %v2398_v44 = vmul.f32 %v2893_v48, %v2397_v54  ;;  %vm2401_vm9 = vweird.f32 %v2893_v48  ;;  %v2200_v50 = vadd.f32 %v5631_v24, %v2199_v62  ;;  %v2182_v13 = vmul.f32 %v5670_v61, %v5628_v42 }
 0x32b   : > { %v2899_v17 = vpop.eup %2898  ;;  %v2407_v58 = vor.u32 1.1754944e-38, %v2406_v49  ;;  %vm2430_vm10 = vweird.f32 %v5648_v33  ;;  %v2437_v7 = vor.u32 1.1754944e-38, %v2436_v0  ;;  %v2208_v29 = vor.u32 1.1754944e-38, %v2207_v11  ;;  %vm2402_vm13 = vmor %vm2400_vm6, %vm2401_vm9 }
 0x32c   : > { %v2901_v36 = vpop.eup %2900  ;;  %v2399_v12 = vadd.f32 %v2893_v48, %v2398_v44  ;;  %v2426_v23 = vmul.f32 %v2899_v17, %v5648_v33  ;;  %vm5689_vm12 = vcmp.eq.f32.partialorder %v2434_v57, 8.507059e+37  ;;  %v2464_v16 = vand.u32 2147483647, %v5665_v46 }
 0x32d   : > { %v2204_v27 = vsel %vm2203_vm11, %v5631_v24, %v2200_v50  ;;  %v5698_v19 = vadd.f32 1.0, %v2901_v36  ;;  %v2183_v52 = vsub.f32 1.0, %v2182_v13  ;;  %vm2186_vm14 = vweird.f32 %v5628_v42 }
 0x32e   : > { %v2209_v21 = vsel %vm5678_vm8, %v2208_v29, %v2204_v27  ;;  %2906 = vrcp.f32 %v5655_v2  ;;  %v2903_v37 = vpop.eup %2902  ;;  %v2403_v6 = vsel %vm2402_vm13, %v2893_v48, %v2399_v12  ;;  %v2427_v38 = vsub.f32 1.0, %v2426_v23 }
 0x32f   : > { %v2466_v41 = vand.u32 2147483648, %v5665_v46  ;;  %v2210_v31 = vmul.f32 %v2209_v21, %v5636_v4  ;;  %v2905_v9 = vpop.eup %2904  ;;  %v2408_v40 = vsel %vm5673_vm7, %v2407_v58, %v2403_v6  ;;  %2908 = vrcp.f32 %v5698_v19 }
 0x330   : > { %v2190_v10 = vand.u32 2147483647, %v5628_v42  ;;  %v2192_v3 = vand.u32 2147483648, %v5628_v42  ;;  %2537 = vst [vmem:[%s5416_s22 + $0x38] sm:$0xff] %v2408_v40  ;;  %v2428_v34 = vmul.f32 %v2899_v17, %v2427_v38  ;;  %vm2431_vm15 = vweird.f32 %v2899_v17 }
 0x331   : > { %v2456_v14 = vmul.f32 %v2905_v9, %v5665_v46  ;;  %vm2460_vm0 = vweird.f32 %v5665_v46  ;;  %v5714_v18 = vadd.f32 1.0, %v2903_v37  ;;  %v2240_v24 = vsub.f32 0.0, %v2210_v31  ;;  %vm2432_vm3 = vmor %vm2430_vm10, %vm2431_vm15 }
 0x332   : > { %v2184_v30 = vmul.f32 %v5670_v61, %v2183_v52  ;;  %vm2187_vm1 = vweird.f32 %v5670_v61  ;;  %v2429_v4 = vadd.f32 %v2899_v17, %v2428_v34  ;;  %vm5718_vm2 = vcmp.eq.f32.partialorder %v2464_v16, 8.507059e+37 }
 0x333   : > { %v2457_v26 = vsub.f32 1.0, %v2456_v14  ;;  %v2467_v1 = vor.u32 1.1754944e-38, %v2466_v41  ;;  %vm2461_vm4 = vweird.f32 %v2905_v9  ;;  %2910 = vrcp.f32 %v5714_v18  ;;  %vm2188_vm8 = vmor %vm2186_vm14, %vm2187_vm1 }
 0x334   : > { %v2907_v56 = vpop.eup %2906  ;;  %vm5725_vm5 = vcmp.eq.f32.partialorder %v2190_v10, 8.507059e+37  ;;  %v2193_v60 = vor.u32 1.1754944e-38, %v2192_v3  ;;  %v2433_v39 = vsel %vm2432_vm3, %v2899_v17, %v2429_v4  ;;  %v2270_v20 = vmul.f32 1.442695, %v2240_v24  ;;  %vm2462_vm9 = vmor %vm2460_vm0, %vm2461_vm4 }
 0x335   : > { %v2458_v51 = vmul.f32 %v2905_v9, %v2457_v26  ;;  %v2185_v5 = vadd.f32 %v5670_v61, %v2184_v30  ;;  %v2909_v25 = vpop.eup %2908  ;;  %v2438_v63 = vsel %vm5689_vm12, %v2437_v7, %v2433_v39  ;;  %vm2445_vm6 = vweird.f32 %v5698_v19 }
 0x336   : > { %v2212_v33 = vmul.f32 %v2907_v56, %v5655_v2  ;;  %vm2216_vm7 = vweird.f32 %v5655_v2  ;;  %2539 = vst [vmem:[%s5416_s22 + $0x48] sm:$0xff] %v2438_v63  ;;  %v2441_v53 = vmul.f32 %v2909_v25, %v5698_v19  ;;  %v2449_v32 = vand.u32 2147483647, %v5698_v19 }
 0x337   : > { %v2459_v48 = vadd.f32 %v2905_v9, %v2458_v51  ;;  %2912 = vpow2.f32 %v2270_v20  ;;  %v2451_v43 = vand.u32 2147483648, %v5698_v19  ;;  %v2189_v47 = vsel %vm2188_vm8, %v5670_v61, %v2185_v5 }
 0x338   : > { %v2213_v59 = vsub.f32 1.0, %v2212_v33  ;;  %v2220_v11 = vand.u32 2147483647, %v5655_v2  ;;  %v2442_v0 = vsub.f32 1.0, %v2441_v53  ;;  %v2194_v62 = vsel %vm5725_vm5, %v2193_v60, %v2189_v47 }
 0x339   : > { %v2463_v49 = vsel %vm2462_vm9, %v2905_v9, %v2459_v48  ;;  %v2222_v42 = vand.u32 2147483648, %v5655_v2  ;;  %v2911_v54 = vpop.eup %2910  ;;  %v2195_v46 = vmul.f32 %v2194_v62, %v5381_v22  ;;  %vm2217_vm10 = vweird.f32 %v2907_v56 }
 0x33a   : > { %v2468_v57 = vsel %vm5718_vm2, %v2467_v1, %v2463_v49  ;;  %v2214_v55 = vmul.f32 %v2907_v56, %v2213_v59  ;;  %v2443_v61 = vmul.f32 %v2909_v25, %v2442_v0  ;;  %vm2446_vm11 = vweird.f32 %v2909_v25  ;;  %vm2218_vm13 = vmor %vm2216_vm7, %vm2217_vm10 }
 0x33b   : > { %2541 = vst [vmem:[%s5416_s22 + $0x58] sm:$0xff] %v2468_v57  ;;  %vm5755_vm12 = vcmp.eq.f32.partialorder %v2449_v32, 8.507059e+37  ;;  %v2471_v44 = vmul.f32 %v2911_v54, %v5714_v18  ;;  %v2452_v50 = vor.u32 1.1754944e-38, %v2451_v43  ;;  %v2479_v13 = vand.u32 2147483647, %v5714_v18  ;;  %vm2447_vm14 = vmor %vm2445_vm6, %vm2446_vm11 }
 0x33c   : > { %v2239_v17 = vsub.f32 0.0, %v2195_v46  ;;  %v2215_v58 = vadd.f32 %v2907_v56, %v2214_v55  ;;  %v2444_v29 = vadd.f32 %v2909_v25, %v2443_v61  ;;  %v2481_v36 = vand.u32 2147483648, %v5714_v18 }
 0x33d   : > { %v2913_v7 = vpop.eup %2912  ;;  %v2472_v22 = vsub.f32 1.0, %v2471_v44  ;;  %v2223_v12 = vor.u32 1.1754944e-38, %v2222_v42  ;;  %vm2221_vm15 = vcmp.eq.f32.partialorder %v2220_v11, 8.507059e+37  ;;  %vm2476_vm0 = vweird.f32 %v2911_v54 }
 0x33e   : > { %v2288_v23 = vadd.f32 1.0, %v2913_v7  ;;  %v2268_v8 = vmul.f32 1.442695, %v2239_v17  ;;  %v2219_v16 = vsel %vm2218_vm13, %v2907_v56, %v2215_v58  ;;  %v2448_v27 = vsel %vm2447_vm14, %v2909_v25, %v2444_v29 }
 0x33f   : > { %v2473_v21 = vmul.f32 %v2911_v54, %v2472_v22  ;;  %v2224_v52 = vsel %vm2221_vm15, %v2223_v12, %v2219_v16  ;;  %v2453_v37 = vsel %vm5755_vm12, %v2452_v50, %v2448_v27  ;;  %vm2475_vm1 = vweird.f32 %v5714_v18 }
 0x340   : > { %2914 = vrcp.f32 %v2288_v23  ;;  %2540 = vst [vmem:[%s5416_s22 + $0x50] sm:$0xff] %v2453_v37  ;;  %v2225_v19 = vmul.f32 %v2224_v52, %v5646_v45  ;;  %vm2477_vm2 = vmor %vm2475_vm1, %vm2476_vm0  ;;  %v2482_v6 = vor.u32 1.1754944e-38, %v2481_v36  ;;  %vm2480_vm3 = vcmp.eq.f32.partialorder %v2479_v13, 8.507059e+37 }
 0x341   : > { %v2474_v2 = vadd.f32 %v2911_v54, %v2473_v21  ;;  %2916 = vpow2.f32 %v2268_v8  ;;  %v2511_v24 = vand.u32 2147483648, %v2288_v23  ;;  %v2509_v45 = vand.u32 2147483647, %v2288_v23 }
 0x342   : > { %v2241_v41 = vsub.f32 0.0, %v2225_v19  ;;  %vm2505_vm5 = vweird.f32 %v2288_v23 }
 0x343   : > { %v2478_v38 = vsel %vm2477_vm2, %v2911_v54, %v2474_v2  ;;  %v2512_v26 = vor.u32 1.1754944e-38, %v2511_v24  ;;  %vm2510_vm7 = vcmp.eq.f32.partialorder %v2509_v45, 8.507059e+37 }
 0x344   : > { %v2483_v31 = vsel %vm2480_vm3, %v2482_v6, %v2478_v38  ;;  %v2272_v9 = vmul.f32 1.442695, %v2241_v41 }
 0x345   : > { %2542 = vst [vmem:[%s5416_s22 + $0x60] sm:$0xff] %v2483_v31 }
 0x346   : > { %v2915_v40 = vpop.eup %2914  ;;  %2918 = vpow2.f32 %v2272_v9 }
 0x347   : > { %v2917_v10 = vpop.eup %2916  ;;  %v2501_v3 = vmul.f32 %v2915_v40, %v2288_v23  ;;  %vm2506_vm4 = vweird.f32 %v2915_v40 }
 0x348   : > { %v2287_v34 = vadd.f32 1.0, %v2917_v10  ;;  %vm2507_vm6 = vmor %vm2505_vm5, %vm2506_vm4 }
 0x349   : > { %v2502_v14 = vsub.f32 1.0, %v2501_v3 }
 0x34a   : > { %2920 = vrcp.f32 %v2287_v34  ;;  %v2496_v51 = vand.u32 2147483648, %v2287_v34  ;;  %v2494_v5 = vand.u32 2147483647, %v2287_v34  ;;  %vm2490_vm9 = vweird.f32 %v2287_v34 }
 0x34b   : > { %v2503_v18 = vmul.f32 %v2915_v40, %v2502_v14 }
 0x34c   : > { %v2919_v30 = vpop.eup %2918  ;;  %v2497_v48 = vor.u32 1.1754944e-38, %v2496_v51  ;;  %vm2495_vm11 = vcmp.eq.f32.partialorder %v2494_v5, 8.507059e+37 }
 0x34d   : > { %v2504_v4 = vadd.f32 %v2915_v40, %v2503_v18  ;;  %v2289_v15 = vadd.f32 1.0, %v2919_v30 }
 0x34f   : > { %v2508_v1 = vsel %vm2507_vm6, %v2915_v40, %v2504_v4  ;;  %2922 = vrcp.f32 %v2289_v15  ;;  %v2526_v47 = vand.u32 2147483648, %v2289_v15  ;;  %v2524_v11 = vand.u32 2147483647, %v2289_v15 }
 0x350   : > { %v2921_v56 = vpop.eup %2920  ;;  %v2513_v35 = vsel %vm2510_vm7, %v2512_v26, %v2508_v1  ;;  %vm2520_vm13 = vweird.f32 %v2289_v15 }
 0x351   : > { %2544 = vst [vmem:[%s5416_s22 + $0x70] sm:$0xff] %v2513_v35  ;;  %v2486_v60 = vmul.f32 %v2921_v56, %v2287_v34  ;;  %vm2491_vm8 = vweird.f32 %v2921_v56  ;;  %v2527_v0 = vor.u32 1.1754944e-38, %v2526_v47  ;;  %vm2525_vm15 = vcmp.eq.f32.partialorder %v2524_v11, 8.507059e+37 }
 0x352   : > { %vm2492_vm10 = vmor %vm2490_vm9, %vm2491_vm8 }
 0x353   : > { %v2487_v39 = vsub.f32 1.0, %v2486_v60 }
 0x355   : > { %v2488_v20 = vmul.f32 %v2921_v56, %v2487_v39  ;;  %v2923_v25 = vpop.eup %2922 }
 0x356   : > { %v2516_v33 = vmul.f32 %v2923_v25, %v2289_v15  ;;  %vm2521_vm12 = vweird.f32 %v2923_v25 }
 0x357   : > { %v2489_v63 = vadd.f32 %v2921_v56, %v2488_v20  ;;  %vm2522_vm14 = vmor %vm2520_vm13, %vm2521_vm12 }
 0x358   : > { %v2517_v32 = vsub.f32 1.0, %v2516_v33 }
 0x359   : > { %v2493_v53 = vsel %vm2492_vm10, %v2921_v56, %v2489_v63 }
 0x35a   : > { %v2498_v43 = vsel %vm2495_vm11, %v2497_v48, %v2493_v53  ;;  %v2518_v59 = vmul.f32 %v2923_v25, %v2517_v32 }
 0x35b   : > { %2543 = vst [vmem:[%s5416_s22 + $0x68] sm:$0xff] %v2498_v43 }
 0x35c   : > { %v2519_v49 = vadd.f32 %v2923_v25, %v2518_v59 }
 0x35e   : > { %v2523_v62 = vsel %vm2522_vm14, %v2923_v25, %v2519_v49 }
 0x35f   : > { %v2528_v42 = vsel %vm2525_vm15, %v2527_v0, %v2523_v62 }
 0x360   : > { %2545 = vst [vmem:[%s5416_s22 + $0x78] sm:$0xff] %v2528_v42 }
 0x361 PF: > { %s12_s6 = sadd.s32 1, %s3003_s6  }
 0x362   : > { %p9_p7 = scmp.ge.s32.totalorder %s12_s6, 4  }
 0x364   :  { %11 = sbr.rel (!%p9_p7) target bundleno = 1 (0x1), region = 57 }
 0x369   :  { %2568 = vsyncpa [#allocation3], 1 }
 0x36a   :  { %2570 = vsyncpa [#allocation3 + $0x1], 1 }

// kernel: cdsnet_forward.3
= control target key start
LH: loop header
LB: loop body
LE: loop exit
PB: predicated region body
PF: predicated region fallthrough
CT: control target
= control target key end

     0   :  { %s638_s9 = smov 0   ;;  %s924_s0 = inlined_call_operand.vmem [shape: f32[4,64,128], index: 0, kind: input, shape index: {}]   ;;  %s925_s1 = inlined_call_operand.vmem [shape: f32[4,64,1], index: 1, kind: input, shape index: {}]   ;;  %s926_s2 = inlined_call_operand.vmem [shape: f32[4,1,128], index: 2, kind: output, shape index: {}]  }
   0x1 LB: > { %s553_s10 = sadd.s32 4294967295, %s619_s9   ;;  %p557_p0 = scmp.ge.s32.totalorder %s619_s9, 1  ;;  %s619_s9 = sphi %s638_s9, %s12_s9  }
   0x2   : > { %p122_p1 = scmp.lt.s32.totalorder %s619_s9, 5 }
   0x4   : > { %p123_p2 = pnand %p557_p0, %p122_p1 }
   0x5   : > { %p147_p3 = scmp.lt.s32.totalorder (!%p123_p2), %s553_s10, 3 }
   0x6   : > { %126 = sbr.rel (%p123_p2) target bundleno = 340 (0x154), region = 28 }
   0xb   : > { %v621_v0 = vmov 0   ;;  %s942_s10 = smov (!%p147_p3, %s553_s10), 3 }
   0xc   : > { %577 = vset.pattern.permute.xlu1 %v621_v0  ;;  %576 = vset.pattern.permute.xlu0 %v621_v0  ;;  %s564_s11 = sshll.u32 %s942_s10, 6  ;;  %s159_s20 = scalar_lea.vmem %s926_s2, %s942_s10 }
   0xd   : > { %578 = vset.pattern.permute.xlu2 %v621_v0  ;;  %s156_s14 = scalar_lea.vmem %s925_s1, %s564_s11  ;;  %s655_s17 = scalar_lea.vmem %s924_s0, %s564_s11 }
   0xe   : > { %v170_v1 = vld [vmem:[%s156_s14 + $0x10] sm:$0xff]  ;;  %v168_v2 = vld [vmem:[%s156_s14] sm:$0xff]  ;;  %v171_v4 = vld [vmem:[%s156_s14 + $0x18] sm:$0xff] }
   0xf   : > { %188 = vperm.xlu1 %577, %v170_v1   ;;  %178 = vperm.xlu0 %576, %v168_v2   ;;  %v172_v3 = vld [vmem:[%s156_s14 + $0x20] sm:$0xff]  ;;  %v169_v5 = vld [vmem:[%s156_s14 + $0x8] sm:$0xff]  ;;  %v175_v7 = vld [vmem:[%s156_s14 + $0x38] sm:$0xff] }
  0x10   : > { %198 = vperm.xlu2 %578, %v172_v3   ;;  %v173_v6 = vld [vmem:[%s156_s14 + $0x28] sm:$0xff]  ;;  %v174_v8 = vld [vmem:[%s156_s14 + $0x30] sm:$0xff]  ;;  %v160_v10 = vld [vmem:[%s655_s17] sm:$0xff] }
  0x11   : > { %v162_v9 = vld [vmem:[%s655_s17 + $0x10] sm:$0xff]  ;;  %v163_v18 = vld [vmem:[%s655_s17 + $0x18] sm:$0xff]  ;;  %v161_v19 = vld [vmem:[%s655_s17 + $0x8] sm:$0xff] }
  0x12   : > { %v165_v27 = vld [vmem:[%s655_s17 + $0x28] sm:$0xff]  ;;  %v164_v28 = vld [vmem:[%s655_s17 + $0x20] sm:$0xff]  ;;  %v166_v29 = vld [vmem:[%s655_s17 + $0x30] sm:$0xff] }
  0x13   : > { %v167_v38 = vld [vmem:[%s655_s17 + $0x38] sm:$0xff] }
  0x17   : > { %193 = vperm.xlu1 %577, %v171_v4   ;;  %183 = vperm.xlu0 %576, %v169_v5  }
  0x18   : > { %203 = vperm.xlu2 %578, %v173_v6  }
  0x1f   : > { %213 = vperm.xlu1 %577, %v175_v7   ;;  %208 = vperm.xlu0 %576, %v174_v8  }
  0x6a   : > { %v199_v15 = vpop.permute.xlu2 %198 }
  0x6b   : > { %v682_v31 = vmul.f32 %v199_v15, %v164_v28 }
  0x6d   : > { %v228_v36 = vmul.f32 %v682_v31, %v682_v31 }
  0x72   : > { %v204_v26 = vpop.permute.xlu2 %203 }
  0x73   : > { %v680_v30 = vmul.f32 %v204_v26, %v165_v27 }
  0x75   : > { %v229_v35 = vmul.f32 %v680_v30, %v680_v30 }
  0x81   : > { %v189_v11 = vpop.permute.xlu1 %188  ;;  %v179_v12 = vpop.permute.xlu0 %178 }
  0x82   : > { %v659_v13 = vmul.f32 %v189_v11, %v162_v9  ;;  %v661_v14 = vmul.f32 %v179_v12, %v160_v10 }
  0x84   : > { %v226_v16 = vmul.f32 %v659_v13, %v659_v13  ;;  %v224_v17 = vmul.f32 %v661_v14, %v661_v14 }
  0x86   : > { %236 = vadd.xlane.f32.xlu1 %v226_v16  ;;  %232 = vadd.xlane.f32.xlu2 %v224_v17 }
  0x89   : > { %v194_v20 = vpop.permute.xlu1 %193  ;;  %v184_v21 = vpop.permute.xlu0 %183 }
  0x8a   : > { %v669_v22 = vmul.f32 %v194_v20, %v163_v18  ;;  %v671_v23 = vmul.f32 %v184_v21, %v161_v19 }
  0x8c   : > { %v225_v24 = vmul.f32 %v671_v23, %v671_v23  ;;  %v227_v25 = vmul.f32 %v669_v22, %v669_v22 }
  0x8e   : > { %234 = vadd.xlane.f32.xlu0 %v225_v24  ;;  %238 = vadd.xlane.f32.xlu2 %v227_v25 }
  0x91   : > { %v209_v32 = vpop.permute.xlu0 %208  ;;  %v214_v37 = vpop.permute.xlu1 %213 }
  0x92   : > { %v684_v33 = vmul.f32 %v209_v32, %v166_v29  ;;  %v693_v39 = vmul.f32 %v214_v37, %v167_v38 }
  0x94   : > { %v230_v34 = vmul.f32 %v684_v33, %v684_v33  ;;  %v231_v40 = vmul.f32 %v693_v39, %v693_v39 }
  0x96   : > { %244 = vadd.xlane.f32.xlu1 %v230_v34  ;;  %242 = vadd.xlane.f32.xlu0 %v229_v35 }
  0x97   : > { %240 = vadd.xlane.f32.xlu2 %v228_v36 }
  0x9f   : > { %246 = vadd.xlane.f32.xlu2 %v231_v40 }
  0xf9   : > { %v237_v41 = vpop.xlane.xlu1 %236  ;;  %v233_v42 = vpop.xlane.xlu2 %232 }
  0xfa   : > { %579 = vrsqrt.f32 %v237_v41  ;;  %vm279_vm0 = vcmp.eq.f32.partialorder %v237_v41, inf  ;;  %vm255_vm1 = vcmp.eq.f32.partialorder %v233_v42, inf  ;;  %v258_v4 = vand.u32 2147483648, %v233_v42 }
  0xfb   : > { %581 = vrsqrt.f32 %v233_v42  ;;  %v282_v9 = vand.u32 2147483648, %v237_v41  ;;  %vm257_vm2 = vcmp.eq.f32.partialorder %v233_v42, 0.0  ;;  %vm281_vm3 = vcmp.eq.f32.partialorder %v237_v41, 0.0 }
 0x100   : > { %v580_v43 = vpop.eup %579 }
 0x101   : > { %v582_v44 = vpop.eup %581  ;;  %v273_v45 = vmul.f32 %v580_v43, %v237_v41  ;;  %v697_v46 = vpop.xlane.xlu0 %234 }
 0x102   : > { %v699_v47 = vpop.xlane.xlu2 %238  ;;  %v249_v48 = vmul.f32 %v582_v44, %v233_v42  ;;  %583 = vrsqrt.f32 %v697_v46  ;;  %vm267_vm4 = vcmp.eq.f32.partialorder %v697_v46, inf  ;;  %vm269_vm5 = vcmp.eq.f32.partialorder %v697_v46, 0.0 }
 0x103   : > { %v274_v49 = vmul.f32 %v580_v43, %v273_v45  ;;  %585 = vrsqrt.f32 %v699_v47  ;;  %v270_v25 = vand.u32 2147483648, %v697_v46  ;;  %vm291_vm6 = vcmp.eq.f32.partialorder %v699_v47, inf }
 0x104   : > { %v250_v50 = vmul.f32 %v582_v44, %v249_v48  ;;  %vm293_vm7 = vcmp.eq.f32.partialorder %v699_v47, 0.0  ;;  %v294_v34 = vand.u32 2147483648, %v699_v47 }
 0x105   : > { %v275_v51 = vmul.f32 0.5, %v274_v49 }
 0x106   : > { %v251_v52 = vmul.f32 0.5, %v250_v50 }
 0x107   : > { %v276_v53 = vsub.f32 1.5, %v275_v51 }
 0x108   : > { %v584_v54 = vpop.eup %583  ;;  %v252_v55 = vsub.f32 1.5, %v251_v52 }
 0x109   : > { %v586_v56 = vpop.eup %585  ;;  %v277_v57 = vmul.f32 %v580_v43, %v276_v53  ;;  %v261_v58 = vmul.f32 %v584_v54, %v697_v46  ;;  %v704_v59 = vpop.xlane.xlu1 %244 }
 0x10a   : > { %v706_v60 = vpop.xlane.xlu0 %242  ;;  %v253_v61 = vmul.f32 %v582_v44, %v252_v55  ;;  %v285_v62 = vmul.f32 %v586_v56, %v699_v47  ;;  %587 = vrsqrt.f32 %v704_v59  ;;  %v710_v1 = vpop.xlane.xlu2 %240  ;;  %vm327_vm8 = vcmp.eq.f32.partialorder %v704_v59, inf }
 0x10b   : > { %v278_v63 = vmul.f32 %v277_v57, %v237_v41  ;;  %v262_v0 = vmul.f32 %v584_v54, %v261_v58  ;;  %589 = vrsqrt.f32 %v706_v60  ;;  %vm329_vm9 = vcmp.eq.f32.partialorder %v704_v59, 0.0 }
 0x10c   : > { %v254_v2 = vmul.f32 %v253_v61, %v233_v42  ;;  %v286_v3 = vmul.f32 %v586_v56, %v285_v62  ;;  %591 = vrsqrt.f32 %v710_v1  ;;  %v330_v62 = vand.u32 2147483648, %v704_v59 }
 0x10d   : > { %v263_v5 = vmul.f32 0.5, %v262_v0  ;;  %v280_v6 = vsel %vm279_vm0, %v237_v41, %v278_v63  ;;  %vm315_vm10 = vcmp.eq.f32.partialorder %v706_v60, inf  ;;  %vm317_vm11 = vcmp.eq.f32.partialorder %v706_v60, 0.0 }
 0x10e   : > { %v256_v7 = vsel %vm255_vm1, %v233_v42, %v254_v2  ;;  %v287_v8 = vmul.f32 0.5, %v286_v3  ;;  %v283_v16 = vsel %vm281_vm3, %v282_v9, %v280_v6  ;;  %vm303_vm12 = vcmp.eq.f32.partialorder %v710_v1, inf }
 0x10f   : > { %v264_v10 = vsub.f32 1.5, %v263_v5  ;;  %v259_v11 = vsel %vm257_vm2, %v258_v4, %v256_v7  ;;  %v718_v24 = vmax.f32 %v283_v16, 1e-12  ;;  %v318_v5 = vand.u32 2147483648, %v706_v60 }
 0x110   : > { %v288_v12 = vsub.f32 1.5, %v287_v8  ;;  %v588_v15 = vpop.eup %587  ;;  %v715_v18 = vmax.f32 %v259_v11, 1e-12  ;;  %vm305_vm13 = vcmp.eq.f32.partialorder %v710_v1, 0.0 }
 0x111   : > { %v590_v17 = vpop.eup %589  ;;  %v265_v19 = vmul.f32 %v584_v54, %v264_v10  ;;  %v321_v26 = vmul.f32 %v588_v15, %v704_v59  ;;  %vm387_vm2 = vweird.f32 %v718_v24 }
 0x112   : > { %v289_v20 = vmul.f32 %v586_v56, %v288_v12  ;;  %v592_v21 = vpop.eup %591  ;;  %v309_v27 = vmul.f32 %v590_v17, %v706_v60  ;;  %v729_v37 = vpop.xlane.xlu2 %246  ;;  %593 = vrcp.f32 %v715_v18 }
 0x113   : > { %v266_v28 = vmul.f32 %v265_v19, %v697_v46  ;;  %v297_v32 = vmul.f32 %v592_v21, %v710_v1  ;;  %v322_v35 = vmul.f32 %v588_v15, %v321_v26  ;;  %595 = vrcp.f32 %v718_v24 }
 0x114   : > { %v290_v29 = vmul.f32 %v289_v20, %v699_v47  ;;  %v310_v36 = vmul.f32 %v590_v17, %v309_v27  ;;  %597 = vrsqrt.f32 %v729_v37 }
 0x115   : > { %v268_v38 = vsel %vm267_vm4, %v697_v46, %v266_v28  ;;  %v298_v41 = vmul.f32 %v592_v21, %v297_v32  ;;  %v323_v48 = vmul.f32 0.5, %v322_v35  ;;  %v391_v32 = vand.u32 2147483647, %v718_v24 }
 0x116   : > { %v292_v40 = vsel %vm291_vm6, %v699_v47, %v290_v29  ;;  %v271_v42 = vsel %vm269_vm5, %v270_v25, %v268_v38  ;;  %v311_v49 = vmul.f32 0.5, %v310_v36  ;;  %v393_v35 = vand.u32 2147483648, %v718_v24 }
 0x117   : > { %v295_v43 = vsel %vm293_vm7, %v294_v34, %v292_v40  ;;  %v739_v44 = vmax.f32 %v271_v42, 1e-12  ;;  %v299_v50 = vmul.f32 0.5, %v298_v41  ;;  %v324_v46 = vsub.f32 1.5, %v323_v48 }
 0x118   : > { %v741_v45 = vmax.f32 %v295_v43, 1e-12  ;;  %v746_v47 = vpop.eup %593  ;;  %v312_v52 = vsub.f32 1.5, %v311_v49  ;;  %vm818_vm3 = vcmp.eq.f32.partialorder %v391_v32, 8.507059e+37  ;;  %vm357_vm4 = vweird.f32 %v715_v18 }
 0x119   : > { %599 = vrcp.f32 %v739_v44  ;;  %v748_v51 = vpop.eup %595  ;;  %v300_v54 = vsub.f32 1.5, %v299_v50  ;;  %v353_v55 = vmul.f32 %v746_v47, %v715_v18  ;;  %v325_v56 = vmul.f32 %v588_v15, %v324_v46 }
 0x11a   : > { %601 = vrcp.f32 %v741_v45  ;;  %v750_v53 = vpop.eup %597  ;;  %v313_v57 = vmul.f32 %v590_v17, %v312_v52  ;;  %v383_v61 = vmul.f32 %v748_v51, %v718_v24  ;;  %v306_v15 = vand.u32 2147483648, %v710_v1 }
 0x11b   : > { %v301_v63 = vmul.f32 %v592_v21, %v300_v54  ;;  %v333_v3 = vmul.f32 %v750_v53, %v729_v37  ;;  %v326_v4 = vmul.f32 %v325_v56, %v704_v59  ;;  %v354_v6 = vsub.f32 1.0, %v353_v55 }
 0x11c   : > { %v314_v8 = vmul.f32 %v313_v57, %v706_v60  ;;  %v384_v10 = vsub.f32 1.0, %v383_v61  ;;  %vm388_vm15 = vweird.f32 %v748_v51  ;;  %vm358_vm0 = vweird.f32 %v746_v47 }
 0x11d   : > { %v302_v9 = vmul.f32 %v301_v63, %v710_v1  ;;  %v328_v12 = vsel %vm327_vm8, %v704_v59, %v326_v4  ;;  %v334_v20 = vmul.f32 %v750_v53, %v333_v3  ;;  %v355_v59 = vmul.f32 %v746_v47, %v354_v6  ;;  %vm830_vm6 = vmor %vm357_vm4, %vm358_vm0 }
 0x11e   : > { %v331_v16 = vsel %vm329_vm9, %v330_v62, %v328_v12  ;;  %v316_v17 = vsel %vm315_vm10, %v706_v60, %v314_v8  ;;  %v385_v29 = vmul.f32 %v748_v51, %v384_v10  ;;  %v361_v60 = vand.u32 2147483647, %v715_v18  ;;  %vm845_vm8 = vmor %vm387_vm2, %vm388_vm15 }
 0x11f   : > { %v755_v58 = vpop.eup %599  ;;  %v304_v19 = vsel %vm303_vm12, %v710_v1, %v302_v9  ;;  %v789_v25 = vmax.f32 %v331_v16, 1e-12  ;;  %v319_v26 = vsel %vm317_vm11, %v318_v5, %v316_v17  ;;  %v363_v1 = vand.u32 2147483648, %v715_v18 }
 0x120   : > { %v761_v0 = vpop.eup %601  ;;  %v368_v2 = vmul.f32 %v755_v58, %v739_v44  ;;  %v307_v27 = vsel %vm305_vm13, %v306_v15, %v304_v19  ;;  %v796_v28 = vmax.f32 %v319_v26, 1e-12  ;;  %vm373_vm14 = vweird.f32 %v755_v58 }
 0x121   : > { %v398_v11 = vmul.f32 %v761_v0, %v741_v45  ;;  %603 = vrcp.f32 %v789_v25  ;;  %v801_v34 = vmax.f32 %v307_v27, 1e-12  ;;  %v335_v40 = vmul.f32 0.5, %v334_v20 }
 0x122   : > { %v369_v7 = vsub.f32 1.0, %v368_v2  ;;  %605 = vrcp.f32 %v796_v28  ;;  %v356_v41 = vadd.f32 %v746_v47, %v355_v59  ;;  %v378_v42 = vand.u32 2147483648, %v739_v44 }
 0x123   : > { %v399_v36 = vsub.f32 1.0, %v398_v11  ;;  %v386_v43 = vadd.f32 %v748_v51, %v385_v29  ;;  %vm372_vm1 = vweird.f32 %v739_v44  ;;  %v376_v48 = vand.u32 2147483647, %v739_v44 }
 0x124   : > { %v370_v21 = vmul.f32 %v755_v58, %v369_v7  ;;  %607 = vrcp.f32 %v801_v34  ;;  %vm823_vm5 = vmor %vm372_vm1, %vm373_vm14  ;;  %v394_v54 = vor.u32 1.1754944e-38, %v393_v35  ;;  %vm834_vm7 = vcmp.eq.f32.partialorder %v361_v60, 8.507059e+37 }
 0x125   : > { %v400_v46 = vmul.f32 %v761_v0, %v399_v36  ;;  %v336_v55 = vsub.f32 1.5, %v335_v40  ;;  %v360_v61 = vsel %vm830_vm6, %v746_v47, %v356_v41  ;;  %v364_v62 = vor.u32 1.1754944e-38, %v363_v1 }
 0x126   : > { %v371_v38 = vadd.f32 %v755_v58, %v370_v21  ;;  %v379_v63 = vor.u32 1.1754944e-38, %v378_v42  ;;  %vm339_vm9 = vcmp.eq.f32.partialorder %v729_v37, inf  ;;  %vm377_vm10 = vcmp.eq.f32.partialorder %v376_v48, 8.507059e+37 }
 0x127   : > { %v828_v52 = vpop.eup %603  ;;  %v408_v2 = vand.u32 2147483648, %v741_v45  ;;  %v401_v5 = vadd.f32 %v761_v0, %v400_v46  ;;  %vm403_vm11 = vweird.f32 %v761_v0  ;;  %v337_v47 = vmul.f32 %v750_v53, %v336_v55 }
 0x128   : > { %v375_v18 = vsel %vm823_vm5, %v755_v58, %v371_v38  ;;  %v841_v56 = vpop.eup %605  ;;  %v390_v58 = vsel %vm845_vm8, %v748_v51, %v386_v43  ;;  %v365_v7 = vsel %vm834_vm7, %v364_v62, %v360_v61  ;;  %v443_v51 = vmul.f32 %v828_v52, %v789_v25 }
 0x129   : > { %v428_v3 = vmul.f32 %v841_v56, %v796_v28  ;;  %v380_v4 = vsel %vm377_vm10, %v379_v63, %v375_v18  ;;  %vm341_vm12 = vcmp.eq.f32.partialorder %v729_v37, 0.0  ;;  %vm402_vm13 = vweird.f32 %v741_v45 }
 0x12a   : > { %v608_v6 = vpop.eup %607  ;;  %v338_v10 = vmul.f32 %v337_v47, %v729_v37  ;;  %v342_v11 = vand.u32 2147483648, %v729_v37  ;;  %v395_v53 = vsel %vm818_vm3, %v394_v54, %v390_v58  ;;  %v381_v12 = vmul.f32 %v380_v4, %v671_v23  ;;  %vm874_vm14 = vmor %vm402_vm13, %vm403_vm11 }
 0x12b   : > { %v429_v8 = vsub.f32 1.0, %v428_v3  ;;  %v413_v9 = vmul.f32 %v608_v6, %v801_v34  ;;  %v406_v16 = vand.u32 2147483647, %v741_v45  ;;  %v409_v17 = vor.u32 1.1754944e-38, %v408_v2 }
 0x12c   : > { %v366_v19 = vmul.f32 %v365_v7, %v661_v14  ;;  %v405_v20 = vsel %vm874_vm14, %v761_v0, %v401_v5  ;;  %v340_v26 = vsel %vm339_vm9, %v729_v37, %v338_v10  ;;  %v444_v27 = vsub.f32 1.0, %v443_v51 }
 0x12d   : > { %v414_v21 = vsub.f32 1.0, %v413_v9  ;;  %v430_v23 = vmul.f32 %v841_v56, %v429_v8  ;;  %v423_v59 = vand.u32 2147483648, %v801_v34  ;;  %v343_v45 = vsel %vm341_vm12, %v342_v11, %v340_v26 }
 0x12e   : > { %vm418_vm15 = vweird.f32 %v608_v6  ;;  %v421_v14 = vand.u32 2147483647, %v801_v34  ;;  %v351_v32 = vmax.f32 %v343_v45, 1e-12  ;;  %v396_v0 = vmul.f32 %v395_v53, %v659_v13 }
 0x12f   : > { %v415_v29 = vmul.f32 %v608_v6, %v414_v21  ;;  %v472_v35 = vadd.f32 %v381_v12, %v366_v19  ;;  %vm407_vm0 = vcmp.eq.f32.partialorder %v406_v16, 8.507059e+37  ;;  %vm417_vm1 = vweird.f32 %v801_v34 }
 0x130   : > { %v410_v60 = vsel %vm407_vm0, %v409_v17, %v405_v20  ;;  %609 = vrcp.f32 %v351_v32  ;;  %v445_v1 = vmul.f32 %v828_v52, %v444_v27  ;;  %v431_v38 = vadd.f32 %v841_v56, %v430_v23  ;;  %vm419_vm3 = vmor %vm417_vm1, %vm418_vm15 }
 0x131   : > { %v416_v36 = vadd.f32 %v608_v6, %v415_v29  ;;  %vm433_vm2 = vweird.f32 %v841_v56  ;;  %v424_v37 = vor.u32 1.1754944e-38, %v423_v59  ;;  %v438_v40 = vand.u32 2147483648, %v796_v28 }
 0x132   : > { %vm422_vm4 = vcmp.eq.f32.partialorder %v421_v14, 8.507059e+37  ;;  %v473_v13 = vadd.f32 %v472_v35, %v396_v0  ;;  %vm432_vm5 = vweird.f32 %v796_v28  ;;  %v436_v42 = vand.u32 2147483647, %v796_v28 }
 0x133   : > { %v420_v41 = vsel %vm419_vm3, %v608_v6, %v416_v36  ;;  %v411_v34 = vmul.f32 %v410_v60, %v669_v22  ;;  %vm900_vm6 = vmor %vm432_vm5, %vm433_vm2  ;;  %v622_v49 = vmov 64.0   ;;  %v446_v50 = vadd.f32 %v828_v52, %v445_v1 }
 0x134   : > { %v425_v43 = vsel %vm422_vm4, %v424_v37, %v420_v41  ;;  %611 = vrcp.f32 %v622_v49  ;;  %vm448_vm7 = vweird.f32 %v828_v52  ;;  %v435_v46 = vsel %vm900_vm6, %v841_v56, %v431_v38 }
 0x135   : > { %v426_v54 = vmul.f32 %v425_v43, %v682_v31  ;;  %v451_v44 = vand.u32 2147483647, %v789_v25  ;;  %v453_v22 = vand.u32 2147483648, %v789_v25  ;;  %v439_v24 = vor.u32 1.1754944e-38, %v438_v40 }
 0x136   : > { %v610_v28 = vpop.eup %609  ;;  %v474_v18 = vadd.f32 %v473_v13, %v411_v34  ;;  %vm447_vm8 = vweird.f32 %v789_v25  ;;  %vm437_vm9 = vcmp.eq.f32.partialorder %v436_v42, 8.507059e+37  ;;  %v468_v58 = vand.u32 2147483648, %v351_v32 }
 0x137   : > { %v458_v55 = vmul.f32 %v610_v28, %v351_v32  ;;  %vm449_vm10 = vmor %vm447_vm8, %vm448_vm7  ;;  %v440_v57 = vsel %vm437_vm9, %v439_v24, %v435_v46  ;;  %vm452_vm11 = vcmp.eq.f32.partialorder %v451_v44, 8.507059e+37  ;;  %v454_v31 = vor.u32 1.1754944e-38, %v453_v22 }
 0x138   : > { %v450_v61 = vsel %vm449_vm10, %v828_v52, %v446_v50  ;;  %v475_v62 = vadd.f32 %v474_v18, %v426_v54  ;;  %v441_v2 = vmul.f32 %v440_v57, %v680_v30  ;;  %vm463_vm12 = vweird.f32 %v610_v28 }
 0x139   : > { %v459_v63 = vsub.f32 1.0, %v458_v55  ;;  %v466_v4 = vand.u32 2147483647, %v351_v32  ;;  %v455_v5 = vsel %vm452_vm11, %v454_v31, %v450_v61  ;;  %vm462_vm13 = vweird.f32 %v351_v32 }
 0x13a   : > { %v612_v56 = vpop.eup %611  ;;  %v476_v47 = vadd.f32 %v475_v62, %v441_v2  ;;  %vm464_vm14 = vmor %vm462_vm13, %vm463_vm12  ;;  %v469_v7 = vor.u32 1.1754944e-38, %v468_v58  ;;  %v456_v52 = vmul.f32 %v455_v5, %v684_v33 }
 0x13b   : > { %v460_v3 = vmul.f32 %v610_v28, %v459_v63  ;;  %v486_v6 = vmul.f32 64.0, %v612_v56  ;;  %vm467_vm15 = vcmp.eq.f32.partialorder %v466_v4, 8.507059e+37  ;;  %vm490_vm0 = vweird.f32 %v612_v56 }
 0x13c   : > { %v477_v9 = vadd.f32 %v476_v47, %v456_v52 }
 0x13d   : > { %v461_v25 = vadd.f32 %v610_v28, %v460_v3  ;;  %v487_v30 = vsub.f32 1.0, %v486_v6 }
 0x13f   : > { %v465_v51 = vsel %vm464_vm14, %v610_v28, %v461_v25  ;;  %v488_v12 = vmul.f32 %v612_v56, %v487_v30 }
 0x140   : > { %v470_v8 = vsel %vm467_vm15, %v469_v7, %v465_v51 }
 0x141   : > { %v471_v10 = vmul.f32 %v470_v8, %v693_v39  ;;  %v489_v17 = vadd.f32 %v612_v56, %v488_v12 }
 0x143   : > { %v478_v11 = vadd.f32 %v477_v9, %v471_v10  ;;  %v491_v21 = vsel %vm490_vm0, %v612_v56, %v489_v17 }
 0x145   : > { %v479_v53 = vrot.slane %v478_v11, 4 }
 0x147   : > { %v480_v15 = vadd.f32 %v479_v53, %v478_v11 }
 0x149   : > { %v481_v16 = vrot.slane %v480_v15, 2 }
 0x14b   : > { %v482_v19 = vadd.f32 %v481_v16, %v480_v15 }
 0x14d   : > { %v483_v20 = vrot.slane %v482_v19, 1 }
 0x14f   : > { %v484_v26 = vadd.f32 %v483_v20, %v482_v19 }
 0x151   : > { %v492_v33 = vmul.f32 %v491_v21, %v484_v26 }
 0x153   : > { %493 = vst [vmem:[%s159_s20] sm:$0x1] %v492_v33 }
 0x154 PF: > { %s12_s9 = sadd.s32 1, %s619_s9  }
 0x155   : > { %p9_p4 = scmp.ge.s32.totalorder %s12_s9, 6  }
 0x157   :  { %11 = sbr.rel (!%p9_p4) target bundleno = 1 (0x1), region = 61 }

</bundles_post_ra>
